<compile_context>
chip_gen: v5e
topology: v5e:2x2
jax: 0.10.0
libtpu: 0.0.40
codegen_flags: <defaults>
</compile_context>

<pallas_src>
import numpy as np
import jax
import jax.numpy as jnp
from jax import lax
from jax.experimental import pallas as pl
from jax.experimental.pallas import tpu as pltpu


# ----------------------------------------------------------------------------
# Pallas kernels
# ----------------------------------------------------------------------------
def matmul_bias_kernel(x_ref, w_ref, b_ref, o_ref):
    """o = x @ w + b   (bf16 inputs, f32 accumulation)."""
    o_ref[...] = (
        jnp.dot(x_ref[...], w_ref[...], preferred_element_type=jnp.float32)
        + b_ref[...]
    ).astype(o_ref.dtype)


def dual_matmul_bias_kernel(x1_ref, x2_ref, w1_ref, w2_ref, b_ref, o_ref):
    """o = x1 @ w1 + x2 @ w2 + b  ==  concat(x1, x2) @ concat(w1, w2) + b."""
    acc = jnp.dot(x1_ref[...], w1_ref[...], preferred_element_type=jnp.float32)
    acc = acc + jnp.dot(x2_ref[...], w2_ref[...], preferred_element_type=jnp.float32)
    o_ref[...] = (acc + b_ref[...]).astype(o_ref.dtype)


def _make_lstm_bidir_kernel(write_seq):
    """Both LSTM directions of one layer in a single pallas_call.

    grid = (direction, time-chunk).  gx_ref holds the precomputed
    x @ W_ih + bias gate pre-activations for this (direction, chunk); only the
    recurrent h @ W_hh matmul runs on the serial critical path.  Reverse-time
    traversal (direction 1) is handled by the chunk index_map plus the
    in-kernel index `t`.

    write_seq=True : out_ref is the (TT, B, H) hidden-sequence chunk.
    write_seq=False: out_ref is the (B, H) final hidden state (last layer only;
                     no per-timestep stores, no sequence writeback).
    """

    def kernel(gx_ref, whh_ref, out_ref, h_scr, c_scr):
        d = pl.program_id(0)          # 0 = forward, 1 = reverse
        s = pl.program_id(1)          # time-chunk index (sequential recurrence)
        TT = gx_ref.shape[0]          # timesteps per chunk
        H = h_scr.shape[-1]

        @pl.when(s == 0)
        def _init():
            h_scr[...] = jnp.zeros_like(h_scr)
            c_scr[...] = jnp.zeros_like(c_scr)

        whh = whh_ref[...]            # (H, 4H) bf16, VMEM-resident

        def step(i, carry):
            h, c = carry                                   # f32 (B, H)
            t = i + d * (TT - 1 - 2 * i)                   # fwd: i ; rev: TT-1-i
            gates = gx_ref[t] + jnp.dot(                   # (B, 4H) f32
                h.astype(whh.dtype), whh, preferred_element_type=jnp.float32)
            i_g = jax.nn.sigmoid(gates[:, 0 * H:1 * H])    # PyTorch order i,f,g,o
            f_g = jax.nn.sigmoid(gates[:, 1 * H:2 * H])
            g_g = jnp.tanh(gates[:, 2 * H:3 * H])
            o_g = jax.nn.sigmoid(gates[:, 3 * H:4 * H])
            c_new = f_g * c + i_g * g_g
            h_new = o_g * jnp.tanh(c_new)
            if write_seq:
                out_ref[t] = h_new.astype(out_ref.dtype)
            return h_new, c_new

        h_fin, c_fin = lax.fori_loop(0, TT, step, (h_scr[...], c_scr[...]),
                                     unroll=True)
        h_scr[...] = h_fin
        c_scr[...] = c_fin
        if not write_seq:
            # Revisited output block (index_map constant over the chunk axis):
            # stays VMEM-resident; the value after the last chunk is what lands
            # in HBM -> exactly the direction's final hidden state.
            out_ref[...] = h_fin.astype(out_ref.dtype)

    return kernel


# ----------------------------------------------------------------------------
# pallas_call wrappers
# ----------------------------------------------------------------------------
def _largest_divisor(n, cap):
    best = 1
    for c in range(1, min(n, cap) + 1):
        if n % c == 0:
            best = c
    return best


def _row_tile(m, cap=512):
    """Row tile for the projection GEMMs: full M if small, else multiple of 8."""
    if m <= cap:
        return m
    best = None
    t = 8
    while t <= cap:
        if m % t == 0:
            best = t
        t += 8
    return best if best is not None else m


_PROJ_PARAMS = pltpu.CompilerParams(
    dimension_semantics=("parallel", "parallel"),
    vmem_limit_bytes=32 * 1024 * 1024,
)


def run_input_proj(x_flat, w_cat, b_cat):
    """(M, K) @ (K, 8H) + b, split per direction -> (2, M, 4H) f32."""
    M, K = x_flat.shape
    G = w_cat.shape[1] // 2
    TM = _row_tile(M)
    return pl.pallas_call(
        matmul_bias_kernel,
        out_shape=jax.ShapeDtypeStruct((2, M, G), jnp.float32),
        grid=(M // TM, 2),
        in_specs=[
            pl.BlockSpec((TM, K), lambda m, d: (m, 0)),
            pl.BlockSpec((K, G), lambda m, d: (0, d)),
            pl.BlockSpec((1, G), lambda m, d: (0, d)),
        ],
        out_specs=pl.BlockSpec((None, TM, G), lambda m, d: (d, m, 0)),
        compiler_params=_PROJ_PARAMS,
    )(x_flat, w_cat, b_cat)


def run_dual_input_proj(x1, x2, w1_cat, w2_cat, b_cat):
    """fwd/rev hidden streams -> next layer's gate pre-activations, no concat."""
    M, K = x1.shape
    G = w1_cat.shape[1] // 2
    TM = _row_tile(M)
    return pl.pallas_call(
        dual_matmul_bias_kernel,
        out_shape=jax.ShapeDtypeStruct((2, M, G), jnp.float32),
        grid=(M // TM, 2),
        in_specs=[
            pl.BlockSpec((TM, K), lambda m, d: (m, 0)),
            pl.BlockSpec((TM, K), lambda m, d: (m, 0)),
            pl.BlockSpec((K, G), lambda m, d: (0, d)),
            pl.BlockSpec((K, G), lambda m, d: (0, d)),
            pl.BlockSpec((1, G), lambda m, d: (0, d)),
        ],
        out_specs=pl.BlockSpec((None, TM, G), lambda m, d: (d, m, 0)),
        compiler_params=_PROJ_PARAMS,
    )(x1, x2, w1_cat, w2_cat, b_cat)


def run_dual_matmul_bias(x1, x2, w1, w2, b):
    """Small fused Linear: concat(x1, x2) @ concat(w1, w2) + b, one launch."""
    M, K = x1.shape
    N = w1.shape[1]
    return pl.pallas_call(
        dual_matmul_bias_kernel,
        out_shape=jax.ShapeDtypeStruct((M, N), jnp.float32),
        grid=(1,),
        in_specs=[
            pl.BlockSpec((M, K), lambda i: (0, 0)),
            pl.BlockSpec((M, K), lambda i: (0, 0)),
            pl.BlockSpec((K, N), lambda i: (0, 0)),
            pl.BlockSpec((K, N), lambda i: (0, 0)),
            pl.BlockSpec((1, N), lambda i: (0, 0)),
        ],
        out_specs=pl.BlockSpec((M, N), lambda i: (0, 0)),
    )(x1, x2, w1, w2, b)


def run_bilstm_layer(gx, whh, time_chunk, need_sequence=True):
    """gx: (2, T, B, 4H) f32 precomputed gates-in; whh: (2, H, 4H) bf16.

    need_sequence=True  -> (2, T, B, H) bf16 hidden sequences (0=fwd, 1=rev,
                           both indexed by natural time).
    need_sequence=False -> (2, B, H) bf16 final hidden state per direction
                           (== out[:, -1, :H] / out[:, 0, H:] of nn.LSTM).
    """
    _, T, B, G4 = gx.shape
    H = whh.shape[1]
    TT = time_chunk
    n_chunks = T // TT

    def ts_map(d, s):
        # fwd direction walks chunks 0..n-1; reverse walks n-1..0.
        return (d, s + d * (n_chunks - 1 - 2 * s), 0, 0)

    if need_sequence:
        out_shape = jax.ShapeDtypeStruct((2, T, B, H), jnp.bfloat16)
        out_spec = pl.BlockSpec((None, TT, B, H), ts_map)
    else:
        out_shape = jax.ShapeDtypeStruct((2, B, H), jnp.bfloat16)
        out_spec = pl.BlockSpec((None, B, H), lambda d, s: (d, 0, 0))

    return pl.pallas_call(
        _make_lstm_bidir_kernel(need_sequence),
        out_shape=out_shape,
        grid_spec=pltpu.PrefetchScalarGridSpec(
            num_scalar_prefetch=0,
            grid=(2, n_chunks),
            in_specs=[
                pl.BlockSpec((None, TT, B, G4), ts_map),
                pl.BlockSpec((None, H, G4), lambda d, s: (d, 0, 0)),
            ],
            out_specs=out_spec,
            scratch_shapes=[
                pltpu.VMEM((B, H), jnp.float32),   # h state (per core/direction)
                pltpu.VMEM((B, H), jnp.float32),   # c state
            ],
        ),
        compiler_params=pltpu.CompilerParams(
            # direction axis independent (v7x megacore splits it); time is a
            # sequential recurrence.
            dimension_semantics=("parallel", "arbitrary"),
            vmem_limit_bytes=32 * 1024 * 1024,
        ),
    )(gx, whh)


# ----------------------------------------------------------------------------
# Model: parameters + forward
# ----------------------------------------------------------------------------
def init_params(key, input_size, hidden_size, num_layers, output_size):
    """Uniform(-1/sqrt(H), 1/sqrt(H)) init, matching nn.LSTM parameter shapes."""
    H = hidden_size
    bound = 1.0 / np.sqrt(H)
    keys = iter(jax.random.split(key, num_layers * 2 * 4 + 2))

    def u(shape):
        return jax.random.uniform(next(keys), shape, jnp.float32, -bound, bound)

    layers = []
    for l in range(num_layers):
        in_dim = input_size if l == 0 else 2 * H
        w_ih, w_hh, b = [], [], []
        for _ in range(2):                          # fwd, then reverse
            w_ih_d = u((4 * H, in_dim))             # PyTorch weight_ih_l{l}[_reverse]
            w_hh_d = u((4 * H, H))                  # PyTorch weight_hh_l{l}[_reverse]
            b_ih_d = u((4 * H,))
            b_hh_d = u((4 * H,))
            w_ih.append(jnp.transpose(w_ih_d))      # (in_dim, 4H)
            w_hh.append(jnp.transpose(w_hh_d))      # (H, 4H)
            b.append(b_ih_d + b_hh_d)               # combined bias
        layers.append({
            "w_ih_cat": jnp.concatenate(w_ih, axis=1).astype(jnp.bfloat16),  # (in_dim, 8H)
            "w_hh": jnp.stack(w_hh, axis=0).astype(jnp.bfloat16),            # (2, H, 4H)
            "b_cat": jnp.concatenate(b, axis=0)[None, :],                    # (1, 8H) f32
        })

    fc_w = u((output_size, 2 * H))                  # PyTorch fc.weight
    fc_b = u((output_size,))
    return {
        "layers": layers,
        "fc_w": jnp.transpose(fc_w).astype(jnp.bfloat16),   # (2H, O)
        "fc_b": fc_b[None, :],                              # (1, O) f32
    }


def lstm_model_forward(params, x, time_chunk_cap=16):
    """x: (B, T, input_size) batch_first, like PyTorch. Returns (B, output_size)."""
    H = params["layers"][0]["w_hh"].shape[1]
    B, T, Din = x.shape
    n_layers = len(params["layers"])
    TT = _largest_divisor(T, time_chunk_cap)        # timesteps per grid step

    x_tb = jnp.transpose(x, (1, 0, 2)).astype(jnp.bfloat16)      # (T, B, Din)

    # Layer 0: hoisted input projection (one big GEMM, bias folded in).
    layer0 = params["layers"][0]
    gx = run_input_proj(x_tb.reshape(T * B, Din),
                        layer0["w_ih_cat"], layer0["b_cat"])     # (2, T*B, 4H) f32
    gx = gx.reshape(2, T, B, 4 * H)
    out = run_bilstm_layer(gx, layer0["w_hh"], TT,
                           need_sequence=(n_layers > 1))

    for li, layer in enumerate(params["layers"][1:], start=1):
        w_cat = layer["w_ih_cat"]                                # (2H, 8H) bf16
        gx = run_dual_input_proj(
            out[0].reshape(T * B, H), out[1].reshape(T * B, H),
            w_cat[:H], w_cat[H:], layer["b_cat"])                # (2, T*B, 4H) f32
        gx = gx.reshape(2, T, B, 4 * H)
        out = run_bilstm_layer(gx, layer["w_hh"], TT,
                               need_sequence=(li < n_layers - 1))
        # TODO(synk): nn.LSTM inter-layer dropout (training mode) omitted;
        # this reproduces eval-mode (inference) semantics.

    # Last layer emitted only the final hidden states: (2, B, H).
    out_forward = out[0]             # fwd direction, last timestep   (B, H)
    out_reverse = out[1]             # rev direction, first timestep  (B, H)
    fc_w = params["fc_w"]
    return run_dual_matmul_bias(out_forward, out_reverse,
                                fc_w[:H], fc_w[H:], params["fc_b"])   # (B, O) f32


# ----------------------------------------------------------------------------
# Pure-JAX f32 reference (for self-check)
# ----------------------------------------------------------------------------
def ref_forward(params, x):
    H = params["layers"][0]["w_hh"].shape[1]
    B, T, _ = x.shape
    layer_in = jnp.transpose(x, (1, 0, 2)).astype(jnp.float32)    # (T, B, F)
    for layer in params["layers"]:
        w_cat = layer["w_ih_cat"].astype(jnp.float32)
        b_cat = layer["b_cat"][0]
        outs = []
        for d in range(2):
            w_ih = w_cat[:, d * 4 * H:(d + 1) * 4 * H]
            w_hh = layer["w_hh"][d].astype(jnp.float32)
            b = b_cat[d * 4 * H:(d + 1) * 4 * H]
            xs = layer_in if d == 0 else layer_in[::-1]
            h = jnp.zeros((B, H), jnp.float32)
            c = jnp.zeros((B, H), jnp.float32)
            hs = []
            for t in range(T):
                g = xs[t] @ w_ih + h @ w_hh + b
                i_g = jax.nn.sigmoid(g[:, :H])
                f_g = jax.nn.sigmoid(g[:, H:2 * H])
                g_g = jnp.tanh(g[:, 2 * H:3 * H])
                o_g = jax.nn.sigmoid(g[:, 3 * H:])
                c = f_g * c + i_g * g_g
                h = o_g * jnp.tanh(c)
                hs.append(h)
            hseq = jnp.stack(hs)
            if d == 1:
                hseq = hseq[::-1]
            outs.append(hseq)
        layer_in = jnp.concatenate(outs, axis=-1)
    concat = jnp.concatenate([layer_in[-1, :, :H], layer_in[0, :, H:]], axis=-1)
    return concat @ params["fc_w"].astype(jnp.float32) + params["fc_b"]


# ----------------------------------------------------------------------------
if __name__ == "__main__":
    B, T = 2, 8
    input_size, hidden_size, num_layers, output_size = 16, 32, 2, 4

    key = jax.random.PRNGKey(0)
    k_param, k_x = jax.random.split(key)
    params = init_params(k_param, input_size, hidden_size, num_layers, output_size)
    x = jax.random.normal(k_x, (B, T, input_size), jnp.float32)

    forward = jax.jit(lstm_model_forward)
    out = jax.block_until_ready(forward(params, x))
    ref = jax.block_until_ready(ref_forward(params, x))

    assert out.shape == (B, output_size), out.shape
    max_err = np.max(np.abs(np.asarray(out) - np.asarray(ref)))
    # bf16 matmul inputs (f32 accumulation) vs. pure-f32 reference -> relaxed tol.
    assert np.allclose(np.asarray(out), np.asarray(ref), rtol=3e-2, atol=3e-2), max_err
    print("KERNEL_OK")
</pallas_src>

<mosaic_0001>
module attributes {stable_mosaic.version = 11 : i64} {
  func.func @matmul_bias_kernel(%arg0: i32, %arg1: i32, %arg2: memref<16x16xbf16, #tpu.memory_space<vmem>>, %arg3: memref<16x128xbf16, #tpu.memory_space<vmem>>, %arg4: memref<1x128xf32, #tpu.memory_space<vmem>>, %arg5: memref<1x16x128xf32, #tpu.memory_space<vmem>>) attributes {dimension_semantics = [#tpu.dimension_semantics<parallel>, #tpu.dimension_semantics<parallel>], iteration_bounds = array<i64: 1, 2>, scalar_prefetch = 0 : i64, scratch_operands = 0 : i64, tpu.core_type = #tpu.core_type<tc>, window_params = [{transform_indices = @transform_0, window_bounds = array<i64: 16, 16>}, {transform_indices = @transform_1, window_bounds = array<i64: 16, 128>}, {transform_indices = @transform_2, window_bounds = array<i64: 1, 128>}, {transform_indices = @transform_3, window_bounds = array<i64: 1, 16, 128>}]} {
    %c0 = arith.constant 0 : index
    %c0_0 = arith.constant 0 : index
    %0 = vector.load %arg2[%c0, %c0_0] : memref<16x16xbf16, #tpu.memory_space<vmem>>, vector<16x16xbf16>
    %c0_1 = arith.constant 0 : index
    %c0_2 = arith.constant 0 : index
    %1 = vector.load %arg3[%c0_1, %c0_2] : memref<16x128xbf16, #tpu.memory_space<vmem>>, vector<16x128xbf16>
    %cst = arith.constant dense<0.000000e+00> : vector<16x128xf32>
    %2 = tpu.matmul %0, %1, %cst {dimension_numbers = #tpu.dot_dimension_numbers<[1], [0], [0], [1], [0, 0, 1, 1], [], []>} : vector<16x16xbf16>, vector<16x128xbf16>, vector<16x128xf32> -> vector<16x128xf32>
    %c0_3 = arith.constant 0 : index
    %c0_4 = arith.constant 0 : index
    %3 = vector.load %arg4[%c0_3, %c0_4] : memref<1x128xf32, #tpu.memory_space<vmem>>, vector<1x128xf32>
    %4 = vector.broadcast %3 : vector<1x128xf32> to vector<16x128xf32>
    %5 = arith.addf %2, %4 : vector<16x128xf32>
    %c0_5 = arith.constant 0 : index
    %c0_6 = arith.constant 0 : index
    %c0_7 = arith.constant 0 : index
    %6 = vector.load %arg5[%c0_5, %c0_6, %c0_7] : memref<1x16x128xf32, #tpu.memory_space<vmem>>, vector<1x16x128xf32>
    %7 = vector.shape_cast %6 : vector<1x16x128xf32> to vector<16x128xf32>
    %8 = vector.shape_cast %5 : vector<16x128xf32> to vector<1x16x128xf32>
    tpu.vector_store %arg5[%c0_5, %c0_6, %c0_7], %8 {strides = array<i32>} : memref<1x16x128xf32, #tpu.memory_space<vmem>>, vector<1x16x128xf32>,
    return
  }
  func.func @transform_0(%arg0: i32, %arg1: i32) -> (i32, i32) {
    %c0_i32 = arith.constant 0 : i32
    %c0_i32_0 = arith.constant 0 : i32
    return %arg0, %c0_i32 : i32, i32
  }
  func.func @transform_1(%arg0: i32, %arg1: i32) -> (i32, i32) {
    %c0_i32 = arith.constant 0 : i32
    %c0_i32_0 = arith.constant 0 : i32
    return %c0_i32, %arg1 : i32, i32
  }
  func.func @transform_2(%arg0: i32, %arg1: i32) -> (i32, i32) {
    %c0_i32 = arith.constant 0 : i32
    %c0_i32_0 = arith.constant 0 : i32
    return %c0_i32, %arg1 : i32, i32
  }
  func.func @transform_3(%arg0: i32, %arg1: i32) -> (i32, i32, i32) {
    %c0_i32 = arith.constant 0 : i32
    %c0_i32_0 = arith.constant 0 : i32
    return %arg1, %arg0, %c0_i32 : i32, i32, i32
  }
}

module attributes {stable_mosaic.version = 11 : i64} {
  func.func @kernel(%arg0: i32, %arg1: i32, %arg2: memref<1x8x2x128xf32, #tpu.memory_space<vmem>>, %arg3: memref<1x32x128xbf16, #tpu.memory_space<vmem>>, %arg4: memref<1x8x2x32xbf16, #tpu.memory_space<vmem>>, %arg5: memref<2x32xf32, #tpu.memory_space<vmem>>, %arg6: memref<2x32xf32, #tpu.memory_space<vmem>>) attributes {dimension_semantics = [#tpu.dimension_semantics<parallel>, #tpu.dimension_semantics<arbitrary>], iteration_bounds = array<i64: 2, 1>, scalar_prefetch = 0 : i64, scratch_operands = 2 : i64, tpu.core_type = #tpu.core_type<tc>, window_params = [{transform_indices = @transform_0, window_bounds = array<i64: 1, 8, 2, 128>}, {transform_indices = @transform_1, window_bounds = array<i64: 1, 32, 128>}, {transform_indices = @transform_2, window_bounds = array<i64: 1, 8, 2, 32>}]} {
    %c0_i32 = arith.constant 0 : i32
    %0 = arith.cmpi eq, %arg1, %c0_i32 : i32
    %1 = arith.extui %0 : i1 to i32
    %c0_i32_0 = arith.constant 0 : i32
    %2 = arith.cmpi ne, %1, %c0_i32_0 : i32
    scf.if %2 {
      %cst_107 = arith.constant 0.000000e+00 : f32
      %329 = vector.broadcast %cst_107 : f32 to vector<2x32xf32>
      %c0_108 = arith.constant 0 : index
      %c0_109 = arith.constant 0 : index
      %330 = vector.load %arg5[%c0_108, %c0_109] : memref<2x32xf32, #tpu.memory_space<vmem>>, vector<2x32xf32>
      tpu.vector_store %arg5[%c0_108, %c0_109], %329 {strides = array<i32>} : memref<2x32xf32, #tpu.memory_space<vmem>>, vector<2x32xf32>,
      %cst_110 = arith.constant 0.000000e+00 : f32
      %331 = vector.broadcast %cst_110 : f32 to vector<2x32xf32>
      %c0_111 = arith.constant 0 : index
      %c0_112 = arith.constant 0 : index
      %332 = vector.load %arg6[%c0_111, %c0_112] : memref<2x32xf32, #tpu.memory_space<vmem>>, vector<2x32xf32>
      tpu.vector_store %arg6[%c0_111, %c0_112], %331 {strides = array<i32>} : memref<2x32xf32, #tpu.memory_space<vmem>>, vector<2x32xf32>,
    } else {
    }
    %c0 = arith.constant 0 : index
    %c0_1 = arith.constant 0 : index
    %c0_2 = arith.constant 0 : index
    %3 = vector.load %arg3[%c0, %c0_1, %c0_2] : memref<1x32x128xbf16, #tpu.memory_space<vmem>>, vector<1x32x128xbf16>
    %4 = vector.shape_cast %3 : vector<1x32x128xbf16> to vector<32x128xbf16>
    %c0_3 = arith.constant 0 : index
    %c0_4 = arith.constant 0 : index
    %5 = vector.load %arg5[%c0_3, %c0_4] : memref<2x32xf32, #tpu.memory_space<vmem>>, vector<2x32xf32>
    %c0_5 = arith.constant 0 : index
    %c0_6 = arith.constant 0 : index
    %6 = vector.load %arg6[%c0_5, %c0_6] : memref<2x32xf32, #tpu.memory_space<vmem>>, vector<2x32xf32>
    %c0_i32_7 = arith.constant 0 : i32
    %c2_i32 = arith.constant 2 : i32
    %7 = arith.muli %c2_i32, %c0_i32_7 : i32
    %c7_i32 = arith.constant 7 : i32
    %8 = arith.subi %c7_i32, %7 : i32
    %9 = arith.muli %arg0, %8 : i32
    %10 = arith.addi %c0_i32_7, %9 : i32
    %c0_8 = arith.constant 0 : index
    %11 = arith.index_cast %10 : i32 to index
    %c0_9 = arith.constant 0 : index
    %c0_10 = arith.constant 0 : index
    %12 = vector.load %arg2[%c0_8, %11, %c0_9, %c0_10] : memref<1x8x2x128xf32, #tpu.memory_space<vmem>>, vector<1x1x2x128xf32>
    %13 = vector.shape_cast %12 : vector<1x1x2x128xf32> to vector<2x128xf32>
    %14 = arith.truncf %5 : vector<2x32xf32> to vector<2x32xbf16>
    %cst = arith.constant dense<0.000000e+00> : vector<2x128xf32>
    %15 = tpu.matmul %14, %4, %cst {dimension_numbers = #tpu.dot_dimension_numbers<[1], [0], [0], [1], [0, 0, 1, 1], [], []>} : vector<2x32xbf16>, vector<32x128xbf16>, vector<2x128xf32> -> vector<2x128xf32>
    %16 = arith.addf %13, %15 : vector<2x128xf32>
    %17 = vector.extract_strided_slice %16 {offsets = [0, 0], sizes = [2, 32], strides = [1, 1]} : vector<2x128xf32> to vector<2x32xf32>
    %18 = arith.negf %17 : vector<2x32xf32>
    %19 = math.exp %18 : vector<2x32xf32>
    %cst_11 = arith.constant 1.000000e+00 : f32
    %20 = vector.broadcast %cst_11 : f32 to vector<2x32xf32>
    %21 = arith.addf %20, %19 : vector<2x32xf32>
    %22 = arith.divf %20, %21 : vector<2x32xf32>
    %23 = vector.extract_strided_slice %16 {offsets = [0, 32], sizes = [2, 32], strides = [1, 1]} : vector<2x128xf32> to vector<2x32xf32>
    %24 = arith.negf %23 : vector<2x32xf32>
    %25 = math.exp %24 : vector<2x32xf32>
    %cst_12 = arith.constant 1.000000e+00 : f32
    %26 = vector.broadcast %cst_12 : f32 to vector<2x32xf32>
    %27 = arith.addf %26, %25 : vector<2x32xf32>
    %28 = arith.divf %26, %27 : vector<2x32xf32>
    %29 = vector.extract_strided_slice %16 {offsets = [0, 64], sizes = [2, 32], strides = [1, 1]} : vector<2x128xf32> to vector<2x32xf32>
    %30 = math.tanh %29 : vector<2x32xf32>
    %31 = vector.extract_strided_slice %16 {offsets = [0, 96], sizes = [2, 32], strides = [1, 1]} : vector<2x128xf32> to vector<2x32xf32>
    %32 = arith.negf %31 : vector<2x32xf32>
    %33 = math.exp %32 : vector<2x32xf32>
    %cst_13 = arith.constant 1.000000e+00 : f32
    %34 = vector.broadcast %cst_13 : f32 to vector<2x32xf32>
    %35 = arith.addf %34, %33 : vector<2x32xf32>
    %36 = arith.divf %34, %35 : vector<2x32xf32>
    %37 = arith.mulf %28, %6 : vector<2x32xf32>
    %38 = arith.mulf %22, %30 : vector<2x32xf32>
    %39 = arith.addf %37, %38 : vector<2x32xf32>
    %40 = math.tanh %39 : vector<2x32xf32>
    %41 = arith.mulf %36, %40 : vector<2x32xf32>
    %42 = arith.truncf %41 : vector<2x32xf32> to vector<2x32xbf16>
    %c0_14 = arith.constant 0 : index
    %43 = arith.index_cast %10 : i32 to index
    %c0_15 = arith.constant 0 : index
    %c0_16 = arith.constant 0 : index
    %44 = vector.load %arg4[%c0_14, %43, %c0_15, %c0_16] : memref<1x8x2x32xbf16, #tpu.memory_space<vmem>>, vector<1x1x2x32xbf16>
    %45 = vector.shape_cast %44 : vector<1x1x2x32xbf16> to vector<2x32xbf16>
    %46 = vector.shape_cast %42 : vector<2x32xbf16> to vector<1x1x2x32xbf16>
    tpu.vector_store %arg4[%c0_14, %43, %c0_15, %c0_16], %46 {strides = array<i32>} : memref<1x8x2x32xbf16, #tpu.memory_space<vmem>>, vector<1x1x2x32xbf16>,
    %c1_i32 = arith.constant 1 : i32
    %c2_i32_17 = arith.constant 2 : i32
    %47 = arith.muli %c2_i32_17, %c1_i32 : i32
    %c7_i32_18 = arith.constant 7 : i32
    %48 = arith.subi %c7_i32_18, %47 : i32
    %49 = arith.muli %arg0, %48 : i32
    %50 = arith.addi %c1_i32, %49 : i32
    %c0_19 = arith.constant 0 : index
    %51 = arith.index_cast %50 : i32 to index
    %c0_20 = arith.constant 0 : index
    %c0_21 = arith.constant 0 : index
    %52 = vector.load %arg2[%c0_19, %51, %c0_20, %c0_21] : memref<1x8x2x128xf32, #tpu.memory_space<vmem>>, vector<1x1x2x128xf32>
    %53 = vector.shape_cast %52 : vector<1x1x2x128xf32> to vector<2x128xf32>
    %54 = arith.truncf %41 : vector<2x32xf32> to vector<2x32xbf16>
    %cst_22 = arith.constant dense<0.000000e+00> : vector<2x128xf32>
    %55 = tpu.matmul %54, %4, %cst_22 {dimension_numbers = #tpu.dot_dimension_numbers<[1], [0], [0], [1], [0, 0, 1, 1], [], []>} : vector<2x32xbf16>, vector<32x128xbf16>, vector<2x128xf32> -> vector<2x128xf32>
    %56 = arith.addf %53, %55 : vector<2x128xf32>
    %57 = vector.extract_strided_slice %56 {offsets = [0, 0], sizes = [2, 32], strides = [1, 1]} : vector<2x128xf32> to vector<2x32xf32>
    %58 = arith.negf %57 : vector<2x32xf32>
    %59 = math.exp %58 : vector<2x32xf32>
    %cst_23 = arith.constant 1.000000e+00 : f32
    %60 = vector.broadcast %cst_23 : f32 to vector<2x32xf32>
    %61 = arith.addf %60, %59 : vector<2x32xf32>
    %62 = arith.divf %60, %61 : vector<2x32xf32>
    %63 = vector.extract_strided_slice %56 {offsets = [0, 32], sizes = [2, 32], strides = [1, 1]} : vector<2x128xf32> to vector<2x32xf32>
    %64 = arith.negf %63 : vector<2x32xf32>
    %65 = math.exp %64 : vector<2x32xf32>
    %cst_24 = arith.constant 1.000000e+00 : f32
    %66 = vector.broadcast %cst_24 : f32 to vector<2x32xf32>
    %67 = arith.addf %66, %65 : vector<2x32xf32>
    %68 = arith.divf %66, %67 : vector<2x32xf32>
    %69 = vector.extract_strided_slice %56 {offsets = [0, 64], sizes = [2, 32], strides = [1, 1]} : vector<2x128xf32> to vector<2x32xf32>
    %70 = math.tanh %69 : vector<2x32xf32>
    %71 = vector.extract_strided_slice %56 {offsets = [0, 96], sizes = [2, 32], strides = [1, 1]} : vector<2x128xf32> to vector<2x32xf32>
    %72 = arith.negf %71 : vector<2x32xf32>
    %73 = math.exp %72 : vector<2x32xf32>
    %cst_25 = arith.constant 1.000000e+00 : f32
    %74 = vector.broadcast %cst_25 : f32 to vector<2x32xf32>
    %75 = arith.addf %74, %73 : vector<2x32xf32>
    %76 = arith.divf %74, %75 : vector<2x32xf32>
    %77 = arith.mulf %68, %39 : vector<2x32xf32>
    %78 = arith.mulf %62, %70 : vector<2x32xf32>
    %79 = arith.addf %77, %78 : vector<2x32xf32>
    %80 = math.tanh %79 : vector<2x32xf32>
    %81 = arith.mulf %76, %80 : vector<2x32xf32>
    %82 = arith.truncf %81 : vector<2x32xf32> to vector<2x32xbf16>
    %c0_26 = arith.constant 0 : index
    %83 = arith.index_cast %50 : i32 to index
    %c0_27 = arith.constant 0 : index
    %c0_28 = arith.constant 0 : index
    %84 = vector.load %arg4[%c0_26, %83, %c0_27, %c0_28] : memref<1x8x2x32xbf16, #tpu.memory_space<vmem>>, vector<1x1x2x32xbf16>
    %85 = vector.shape_cast %84 : vector<1x1x2x32xbf16> to vector<2x32xbf16>
    %86 = vector.shape_cast %82 : vector<2x32xbf16> to vector<1x1x2x32xbf16>
    tpu.vector_store %arg4[%c0_26, %83, %c0_27, %c0_28], %86 {strides = array<i32>} : memref<1x8x2x32xbf16, #tpu.memory_space<vmem>>, vector<1x1x2x32xbf16>,
    %c2_i32_29 = arith.constant 2 : i32
    %c2_i32_30 = arith.constant 2 : i32
    %87 = arith.muli %c2_i32_30, %c2_i32_29 : i32
    %c7_i32_31 = arith.constant 7 : i32
    %88 = arith.subi %c7_i32_31, %87 : i32
    %89 = arith.muli %arg0, %88 : i32
    %90 = arith.addi %c2_i32_29, %89 : i32
    %c0_32 = arith.constant 0 : index
    %91 = arith.index_cast %90 : i32 to index
    %c0_33 = arith.constant 0 : index
    %c0_34 = arith.constant 0 : index
    %92 = vector.load %arg2[%c0_32, %91, %c0_33, %c0_34] : memref<1x8x2x128xf32, #tpu.memory_space<vmem>>, vector<1x1x2x128xf32>
    %93 = vector.shape_cast %92 : vector<1x1x2x128xf32> to vector<2x128xf32>
    %94 = arith.truncf %81 : vector<2x32xf32> to vector<2x32xbf16>
    %cst_35 = arith.constant dense<0.000000e+00> : vector<2x128xf32>
    %95 = tpu.matmul %94, %4, %cst_35 {dimension_numbers = #tpu.dot_dimension_numbers<[1], [0], [0], [1], [0, 0, 1, 1], [], []>} : vector<2x32xbf16>, vector<32x128xbf16>, vector<2x128xf32> -> vector<2x128xf32>
    %96 = arith.addf %93, %95 : vector<2x128xf32>
    %97 = vector.extract_strided_slice %96 {offsets = [0, 0], sizes = [2, 32], strides = [1, 1]} : vector<2x128xf32> to vector<2x32xf32>
    %98 = arith.negf %97 : vector<2x32xf32>
    %99 = math.exp %98 : vector<2x32xf32>
    %cst_36 = arith.constant 1.000000e+00 : f32
    %100 = vector.broadcast %cst_36 : f32 to vector<2x32xf32>
    %101 = arith.addf %100, %99 : vector<2x32xf32>
    %102 = arith.divf %100, %101 : vector<2x32xf32>
    %103 = vector.extract_strided_slice %96 {offsets = [0, 32], sizes = [2, 32], strides = [1, 1]} : vector<2x128xf32> to vector<2x32xf32>
    %104 = arith.negf %103 : vector<2x32xf32>
    %105 = math.exp %104 : vector<2x32xf32>
    %cst_37 = arith.constant 1.000000e+00 : f32
    %106 = vector.broadcast %cst_37 : f32 to vector<2x32xf32>
    %107 = arith.addf %106, %105 : vector<2x32xf32>
    %108 = arith.divf %106, %107 : vector<2x32xf32>
    %109 = vector.extract_strided_slice %96 {offsets = [0, 64], sizes = [2, 32], strides = [1, 1]} : vector<2x128xf32> to vector<2x32xf32>
    %110 = math.tanh %109 : vector<2x32xf32>
    %111 = vector.extract_strided_slice %96 {offsets = [0, 96], sizes = [2, 32], strides = [1, 1]} : vector<2x128xf32> to vector<2x32xf32>
    %112 = arith.negf %111 : vector<2x32xf32>
    %113 = math.exp %112 : vector<2x32xf32>
    %cst_38 = arith.constant 1.000000e+00 : f32
    %114 = vector.broadcast %cst_38 : f32 to vector<2x32xf32>
    %115 = arith.addf %114, %113 : vector<2x32xf32>
    %116 = arith.divf %114, %115 : vector<2x32xf32>
    %117 = arith.mulf %108, %79 : vector<2x32xf32>
    %118 = arith.mulf %102, %110 : vector<2x32xf32>
    %119 = arith.addf %117, %118 : vector<2x32xf32>
    %120 = math.tanh %119 : vector<2x32xf32>
    %121 = arith.mulf %116, %120 : vector<2x32xf32>
    %122 = arith.truncf %121 : vector<2x32xf32> to vector<2x32xbf16>
    %c0_39 = arith.constant 0 : index
    %123 = arith.index_cast %90 : i32 to index
    %c0_40 = arith.constant 0 : index
    %c0_41 = arith.constant 0 : index
    %124 = vector.load %arg4[%c0_39, %123, %c0_40, %c0_41] : memref<1x8x2x32xbf16, #tpu.memory_space<vmem>>, vector<1x1x2x32xbf16>
    %125 = vector.shape_cast %124 : vector<1x1x2x32xbf16> to vector<2x32xbf16>
    %126 = vector.shape_cast %122 : vector<2x32xbf16> to vector<1x1x2x32xbf16>
    tpu.vector_store %arg4[%c0_39, %123, %c0_40, %c0_41], %126 {strides = array<i32>} : memref<1x8x2x32xbf16, #tpu.memory_space<vmem>>, vector<1x1x2x32xbf16>,
    %c3_i32 = arith.constant 3 : i32
    %c2_i32_42 = arith.constant 2 : i32
    %127 = arith.muli %c2_i32_42, %c3_i32 : i32
    %c7_i32_43 = arith.constant 7 : i32
    %128 = arith.subi %c7_i32_43, %127 : i32
    %129 = arith.muli %arg0, %128 : i32
    %130 = arith.addi %c3_i32, %129 : i32
    %c0_44 = arith.constant 0 : index
    %131 = arith.index_cast %130 : i32 to index
    %c0_45 = arith.constant 0 : index
    %c0_46 = arith.constant 0 : index
    %132 = vector.load %arg2[%c0_44, %131, %c0_45, %c0_46] : memref<1x8x2x128xf32, #tpu.memory_space<vmem>>, vector<1x1x2x128xf32>
    %133 = vector.shape_cast %132 : vector<1x1x2x128xf32> to vector<2x128xf32>
    %134 = arith.truncf %121 : vector<2x32xf32> to vector<2x32xbf16>
    %cst_47 = arith.constant dense<0.000000e+00> : vector<2x128xf32>
    %135 = tpu.matmul %134, %4, %cst_47 {dimension_numbers = #tpu.dot_dimension_numbers<[1], [0], [0], [1], [0, 0, 1, 1], [], []>} : vector<2x32xbf16>, vector<32x128xbf16>, vector<2x128xf32> -> vector<2x128xf32>
    %136 = arith.addf %133, %135 : vector<2x128xf32>
    %137 = vector.extract_strided_slice %136 {offsets = [0, 0], sizes = [2, 32], strides = [1, 1]} : vector<2x128xf32> to vector<2x32xf32>
    %138 = arith.negf %137 : vector<2x32xf32>
    %139 = math.exp %138 : vector<2x32xf32>
    %cst_48 = arith.constant 1.000000e+00 : f32
    %140 = vector.broadcast %cst_48 : f32 to vector<2x32xf32>
    %141 = arith.addf %140, %139 : vector<2x32xf32>
    %142 = arith.divf %140, %141 : vector<2x32xf32>
    %143 = vector.extract_strided_slice %136 {offsets = [0, 32], sizes = [2, 32], strides = [1, 1]} : vector<2x128xf32> to vector<2x32xf32>
    %144 = arith.negf %143 : vector<2x32xf32>
    %145 = math.exp %144 : vector<2x32xf32>
    %cst_49 = arith.constant 1.000000e+00 : f32
    %146 = vector.broadcast %cst_49 : f32 to vector<2x32xf32>
    %147 = arith.addf %146, %145 : vector<2x32xf32>
    %148 = arith.divf %146, %147 : vector<2x32xf32>
    %149 = vector.extract_strided_slice %136 {offsets = [0, 64], sizes = [2, 32], strides = [1, 1]} : vector<2x128xf32> to vector<2x32xf32>
    %150 = math.tanh %149 : vector<2x32xf32>
    %151 = vector.extract_strided_slice %136 {offsets = [0, 96], sizes = [2, 32], strides = [1, 1]} : vector<2x128xf32> to vector<2x32xf32>
    %152 = arith.negf %151 : vector<2x32xf32>
    %153 = math.exp %152 : vector<2x32xf32>
    %cst_50 = arith.constant 1.000000e+00 : f32
    %154 = vector.broadcast %cst_50 : f32 to vector<2x32xf32>
    %155 = arith.addf %154, %153 : vector<2x32xf32>
    %156 = arith.divf %154, %155 : vector<2x32xf32>
    %157 = arith.mulf %148, %119 : vector<2x32xf32>
    %158 = arith.mulf %142, %150 : vector<2x32xf32>
    %159 = arith.addf %157, %158 : vector<2x32xf32>
    %160 = math.tanh %159 : vector<2x32xf32>
    %161 = arith.mulf %156, %160 : vector<2x32xf32>
    %162 = arith.truncf %161 : vector<2x32xf32> to vector<2x32xbf16>
    %c0_51 = arith.constant 0 : index
    %163 = arith.index_cast %130 : i32 to index
    %c0_52 = arith.constant 0 : index
    %c0_53 = arith.constant 0 : index
    %164 = vector.load %arg4[%c0_51, %163, %c0_52, %c0_53] : memref<1x8x2x32xbf16, #tpu.memory_space<vmem>>, vector<1x1x2x32xbf16>
    %165 = vector.shape_cast %164 : vector<1x1x2x32xbf16> to vector<2x32xbf16>
    %166 = vector.shape_cast %162 : vector<2x32xbf16> to vector<1x1x2x32xbf16>
    tpu.vector_store %arg4[%c0_51, %163, %c0_52, %c0_53], %166 {strides = array<i32>} : memref<1x8x2x32xbf16, #tpu.memory_space<vmem>>, vector<1x1x2x32xbf16>,
    %c4_i32 = arith.constant 4 : i32
    %c2_i32_54 = arith.constant 2 : i32
    %167 = arith.muli %c2_i32_54, %c4_i32 : i32
    %c7_i32_55 = arith.constant 7 : i32
    %168 = arith.subi %c7_i32_55, %167 : i32
    %169 = arith.muli %arg0, %168 : i32
    %170 = arith.addi %c4_i32, %169 : i32
    %c0_56 = arith.constant 0 : index
    %171 = arith.index_cast %170 : i32 to index
    %c0_57 = arith.constant 0 : index
    %c0_58 = arith.constant 0 : index
    %172 = vector.load %arg2[%c0_56, %171, %c0_57, %c0_58] : memref<1x8x2x128xf32, #tpu.memory_space<vmem>>, vector<1x1x2x128xf32>
    %173 = vector.shape_cast %172 : vector<1x1x2x128xf32> to vector<2x128xf32>
    %174 = arith.truncf %161 : vector<2x32xf32> to vector<2x32xbf16>
    %cst_59 = arith.constant dense<0.000000e+00> : vector<2x128xf32>
    %175 = tpu.matmul %174, %4, %cst_59 {dimension_numbers = #tpu.dot_dimension_numbers<[1], [0], [0], [1], [0, 0, 1, 1], [], []>} : vector<2x32xbf16>, vector<32x128xbf16>, vector<2x128xf32> -> vector<2x128xf32>
    %176 = arith.addf %173, %175 : vector<2x128xf32>
    %177 = vector.extract_strided_slice %176 {offsets = [0, 0], sizes = [2, 32], strides = [1, 1]} : vector<2x128xf32> to vector<2x32xf32>
    %178 = arith.negf %177 : vector<2x32xf32>
    %179 = math.exp %178 : vector<2x32xf32>
    %cst_60 = arith.constant 1.000000e+00 : f32
    %180 = vector.broadcast %cst_60 : f32 to vector<2x32xf32>
    %181 = arith.addf %180, %179 : vector<2x32xf32>
    %182 = arith.divf %180, %181 : vector<2x32xf32>
    %183 = vector.extract_strided_slice %176 {offsets = [0, 32], sizes = [2, 32], strides = [1, 1]} : vector<2x128xf32> to vector<2x32xf32>
    %184 = arith.negf %183 : vector<2x32xf32>
    %185 = math.exp %184 : vector<2x32xf32>
    %cst_61 = arith.constant 1.000000e+00 : f32
    %186 = vector.broadcast %cst_61 : f32 to vector<2x32xf32>
    %187 = arith.addf %186, %185 : vector<2x32xf32>
    %188 = arith.divf %186, %187 : vector<2x32xf32>
    %189 = vector.extract_strided_slice %176 {offsets = [0, 64], sizes = [2, 32], strides = [1, 1]} : vector<2x128xf32> to vector<2x32xf32>
    %190 = math.tanh %189 : vector<2x32xf32>
    %191 = vector.extract_strided_slice %176 {offsets = [0, 96], sizes = [2, 32], strides = [1, 1]} : vector<2x128xf32> to vector<2x32xf32>
    %192 = arith.negf %191 : vector<2x32xf32>
    %193 = math.exp %192 : vector<2x32xf32>
    %cst_62 = arith.constant 1.000000e+00 : f32
    %194 = vector.broadcast %cst_62 : f32 to vector<2x32xf32>
    %195 = arith.addf %194, %193 : vector<2x32xf32>
    %196 = arith.divf %194, %195 : vector<2x32xf32>
    %197 = arith.mulf %188, %159 : vector<2x32xf32>
    %198 = arith.mulf %182, %190 : vector<2x32xf32>
    %199 = arith.addf %197, %198 : vector<2x32xf32>
    %200 = math.tanh %199 : vector<2x32xf32>
    %201 = arith.mulf %196, %200 : vector<2x32xf32>
    %202 = arith.truncf %201 : vector<2x32xf32> to vector<2x32xbf16>
    %c0_63 = arith.constant 0 : index
    %203 = arith.index_cast %170 : i32 to index
    %c0_64 = arith.constant 0 : index
    %c0_65 = arith.constant 0 : index
    %204 = vector.load %arg4[%c0_63, %203, %c0_64, %c0_65] : memref<1x8x2x32xbf16, #tpu.memory_space<vmem>>, vector<1x1x2x32xbf16>
    %205 = vector.shape_cast %204 : vector<1x1x2x32xbf16> to vector<2x32xbf16>
    %206 = vector.shape_cast %202 : vector<2x32xbf16> to vector<1x1x2x32xbf16>
    tpu.vector_store %arg4[%c0_63, %203, %c0_64, %c0_65], %206 {strides = array<i32>} : memref<1x8x2x32xbf16, #tpu.memory_space<vmem>>, vector<1x1x2x32xbf16>,
    %c5_i32 = arith.constant 5 : i32
    %c2_i32_66 = arith.constant 2 : i32
    %207 = arith.muli %c2_i32_66, %c5_i32 : i32
    %c7_i32_67 = arith.constant 7 : i32
    %208 = arith.subi %c7_i32_67, %207 : i32
    %209 = arith.muli %arg0, %208 : i32
    %210 = arith.addi %c5_i32, %209 : i32
    %c0_68 = arith.constant 0 : index
    %211 = arith.index_cast %210 : i32 to index
    %c0_69 = arith.constant 0 : index
    %c0_70 = arith.constant 0 : index
    %212 = vector.load %arg2[%c0_68, %211, %c0_69, %c0_70] : memref<1x8x2x128xf32, #tpu.memory_space<vmem>>, vector<1x1x2x128xf32>
    %213 = vector.shape_cast %212 : vector<1x1x2x128xf32> to vector<2x128xf32>
    %214 = arith.truncf %201 : vector<2x32xf32> to vector<2x32xbf16>
    %cst_71 = arith.constant dense<0.000000e+00> : vector<2x128xf32>
    %215 = tpu.matmul %214, %4, %cst_71 {dimension_numbers = #tpu.dot_dimension_numbers<[1], [0], [0], [1], [0, 0, 1, 1], [], []>} : vector<2x32xbf16>, vector<32x128xbf16>, vector<2x128xf32> -> vector<2x128xf32>
    %216 = arith.addf %213, %215 : vector<2x128xf32>
    %217 = vector.extract_strided_slice %216 {offsets = [0, 0], sizes = [2, 32], strides = [1, 1]} : vector<2x128xf32> to vector<2x32xf32>
    %218 = arith.negf %217 : vector<2x32xf32>
    %219 = math.exp %218 : vector<2x32xf32>
    %cst_72 = arith.constant 1.000000e+00 : f32
    %220 = vector.broadcast %cst_72 : f32 to vector<2x32xf32>
    %221 = arith.addf %220, %219 : vector<2x32xf32>
    %222 = arith.divf %220, %221 : vector<2x32xf32>
    %223 = vector.extract_strided_slice %216 {offsets = [0, 32], sizes = [2, 32], strides = [1, 1]} : vector<2x128xf32> to vector<2x32xf32>
    %224 = arith.negf %223 : vector<2x32xf32>
    %225 = math.exp %224 : vector<2x32xf32>
    %cst_73 = arith.constant 1.000000e+00 : f32
    %226 = vector.broadcast %cst_73 : f32 to vector<2x32xf32>
    %227 = arith.addf %226, %225 : vector<2x32xf32>
    %228 = arith.divf %226, %227 : vector<2x32xf32>
    %229 = vector.extract_strided_slice %216 {offsets = [0, 64], sizes = [2, 32], strides = [1, 1]} : vector<2x128xf32> to vector<2x32xf32>
    %230 = math.tanh %229 : vector<2x32xf32>
    %231 = vector.extract_strided_slice %216 {offsets = [0, 96], sizes = [2, 32], strides = [1, 1]} : vector<2x128xf32> to vector<2x32xf32>
    %232 = arith.negf %231 : vector<2x32xf32>
    %233 = math.exp %232 : vector<2x32xf32>
    %cst_74 = arith.constant 1.000000e+00 : f32
    %234 = vector.broadcast %cst_74 : f32 to vector<2x32xf32>
    %235 = arith.addf %234, %233 : vector<2x32xf32>
    %236 = arith.divf %234, %235 : vector<2x32xf32>
    %237 = arith.mulf %228, %199 : vector<2x32xf32>
    %238 = arith.mulf %222, %230 : vector<2x32xf32>
    %239 = arith.addf %237, %238 : vector<2x32xf32>
    %240 = math.tanh %239 : vector<2x32xf32>
    %241 = arith.mulf %236, %240 : vector<2x32xf32>
    %242 = arith.truncf %241 : vector<2x32xf32> to vector<2x32xbf16>
    %c0_75 = arith.constant 0 : index
    %243 = arith.index_cast %210 : i32 to index
    %c0_76 = arith.constant 0 : index
    %c0_77 = arith.constant 0 : index
    %244 = vector.load %arg4[%c0_75, %243, %c0_76, %c0_77] : memref<1x8x2x32xbf16, #tpu.memory_space<vmem>>, vector<1x1x2x32xbf16>
    %245 = vector.shape_cast %244 : vector<1x1x2x32xbf16> to vector<2x32xbf16>
    %246 = vector.shape_cast %242 : vector<2x32xbf16> to vector<1x1x2x32xbf16>
    tpu.vector_store %arg4[%c0_75, %243, %c0_76, %c0_77], %246 {strides = array<i32>} : memref<1x8x2x32xbf16, #tpu.memory_space<vmem>>, vector<1x1x2x32xbf16>,
    %c6_i32 = arith.constant 6 : i32
    %c2_i32_78 = arith.constant 2 : i32
    %247 = arith.muli %c2_i32_78, %c6_i32 : i32
    %c7_i32_79 = arith.constant 7 : i32
    %248 = arith.subi %c7_i32_79, %247 : i32
    %249 = arith.muli %arg0, %248 : i32
    %250 = arith.addi %c6_i32, %249 : i32
    %c0_80 = arith.constant 0 : index
    %251 = arith.index_cast %250 : i32 to index
    %c0_81 = arith.constant 0 : index
    %c0_82 = arith.constant 0 : index
    %252 = vector.load %arg2[%c0_80, %251, %c0_81, %c0_82] : memref<1x8x2x128xf32, #tpu.memory_space<vmem>>, vector<1x1x2x128xf32>
    %253 = vector.shape_cast %252 : vector<1x1x2x128xf32> to vector<2x128xf32>
    %254 = arith.truncf %241 : vector<2x32xf32> to vector<2x32xbf16>
    %cst_83 = arith.constant dense<0.000000e+00> : vector<2x128xf32>
    %255 = tpu.matmul %254, %4, %cst_83 {dimension_numbers = #tpu.dot_dimension_numbers<[1], [0], [0], [1], [0, 0, 1, 1], [], []>} : vector<2x32xbf16>, vector<32x128xbf16>, vector<2x128xf32> -> vector<2x128xf32>
    %256 = arith.addf %253, %255 : vector<2x128xf32>
    %257 = vector.extract_strided_slice %256 {offsets = [0, 0], sizes = [2, 32], strides = [1, 1]} : vector<2x128xf32> to vector<2x32xf32>
    %258 = arith.negf %257 : vector<2x32xf32>
    %259 = math.exp %258 : vector<2x32xf32>
    %cst_84 = arith.constant 1.000000e+00 : f32
    %260 = vector.broadcast %cst_84 : f32 to vector<2x32xf32>
    %261 = arith.addf %260, %259 : vector<2x32xf32>
    %262 = arith.divf %260, %261 : vector<2x32xf32>
    %263 = vector.extract_strided_slice %256 {offsets = [0, 32], sizes = [2, 32], strides = [1, 1]} : vector<2x128xf32> to vector<2x32xf32>
    %264 = arith.negf %263 : vector<2x32xf32>
    %265 = math.exp %264 : vector<2x32xf32>
    %cst_85 = arith.constant 1.000000e+00 : f32
    %266 = vector.broadcast %cst_85 : f32 to vector<2x32xf32>
    %267 = arith.addf %266, %265 : vector<2x32xf32>
    %268 = arith.divf %266, %267 : vector<2x32xf32>
    %269 = vector.extract_strided_slice %256 {offsets = [0, 64], sizes = [2, 32], strides = [1, 1]} : vector<2x128xf32> to vector<2x32xf32>
    %270 = math.tanh %269 : vector<2x32xf32>
    %271 = vector.extract_strided_slice %256 {offsets = [0, 96], sizes = [2, 32], strides = [1, 1]} : vector<2x128xf32> to vector<2x32xf32>
    %272 = arith.negf %271 : vector<2x32xf32>
    %273 = math.exp %272 : vector<2x32xf32>
    %cst_86 = arith.constant 1.000000e+00 : f32
    %274 = vector.broadcast %cst_86 : f32 to vector<2x32xf32>
    %275 = arith.addf %274, %273 : vector<2x32xf32>
    %276 = arith.divf %274, %275 : vector<2x32xf32>
    %277 = arith.mulf %268, %239 : vector<2x32xf32>
    %278 = arith.mulf %262, %270 : vector<2x32xf32>
    %279 = arith.addf %277, %278 : vector<2x32xf32>
    %280 = math.tanh %279 : vector<2x32xf32>
    %281 = arith.mulf %276, %280 : vector<2x32xf32>
    %282 = arith.truncf %281 : vector<2x32xf32> to vector<2x32xbf16>
    %c0_87 = arith.constant 0 : index
    %283 = arith.index_cast %250 : i32 to index
    %c0_88 = arith.constant 0 : index
    %c0_89 = arith.constant 0 : index
    %284 = vector.load %arg4[%c0_87, %283, %c0_88, %c0_89] : memref<1x8x2x32xbf16, #tpu.memory_space<vmem>>, vector<1x1x2x32xbf16>
    %285 = vector.shape_cast %284 : vector<1x1x2x32xbf16> to vector<2x32xbf16>
    %286 = vector.shape_cast %282 : vector<2x32xbf16> to vector<1x1x2x32xbf16>
    tpu.vector_store %arg4[%c0_87, %283, %c0_88, %c0_89], %286 {strides = array<i32>} : memref<1x8x2x32xbf16, #tpu.memory_space<vmem>>, vector<1x1x2x32xbf16>,
    %c7_i32_90 = arith.constant 7 : i32
    %c2_i32_91 = arith.constant 2 : i32
    %287 = arith.muli %c2_i32_91, %c7_i32_90 : i32
    %c7_i32_92 = arith.constant 7 : i32
    %288 = arith.subi %c7_i32_92, %287 : i32
    %289 = arith.muli %arg0, %288 : i32
    %290 = arith.addi %c7_i32_90, %289 : i32
    %c0_93 = arith.constant 0 : index
    %291 = arith.index_cast %290 : i32 to index
    %c0_94 = arith.constant 0 : index
    %c0_95 = arith.constant 0 : index
    %292 = vector.load %arg2[%c0_93, %291, %c0_94, %c0_95] : memref<1x8x2x128xf32, #tpu.memory_space<vmem>>, vector<1x1x2x128xf32>
    %293 = vector.shape_cast %292 : vector<1x1x2x128xf32> to vector<2x128xf32>
    %294 = arith.truncf %281 : vector<2x32xf32> to vector<2x32xbf16>
    %cst_96 = arith.constant dense<0.000000e+00> : vector<2x128xf32>
    %295 = tpu.matmul %294, %4, %cst_96 {dimension_numbers = #tpu.dot_dimension_numbers<[1], [0], [0], [1], [0, 0, 1, 1], [], []>} : vector<2x32xbf16>, vector<32x128xbf16>, vector<2x128xf32> -> vector<2x128xf32>
    %296 = arith.addf %293, %295 : vector<2x128xf32>
    %297 = vector.extract_strided_slice %296 {offsets = [0, 0], sizes = [2, 32], strides = [1, 1]} : vector<2x128xf32> to vector<2x32xf32>
    %298 = arith.negf %297 : vector<2x32xf32>
    %299 = math.exp %298 : vector<2x32xf32>
    %cst_97 = arith.constant 1.000000e+00 : f32
    %300 = vector.broadcast %cst_97 : f32 to vector<2x32xf32>
    %301 = arith.addf %300, %299 : vector<2x32xf32>
    %302 = arith.divf %300, %301 : vector<2x32xf32>
    %303 = vector.extract_strided_slice %296 {offsets = [0, 32], sizes = [2, 32], strides = [1, 1]} : vector<2x128xf32> to vector<2x32xf32>
    %304 = arith.negf %303 : vector<2x32xf32>
    %305 = math.exp %304 : vector<2x32xf32>
    %cst_98 = arith.constant 1.000000e+00 : f32
    %306 = vector.broadcast %cst_98 : f32 to vector<2x32xf32>
    %307 = arith.addf %306, %305 : vector<2x32xf32>
    %308 = arith.divf %306, %307 : vector<2x32xf32>
    %309 = vector.extract_strided_slice %296 {offsets = [0, 64], sizes = [2, 32], strides = [1, 1]} : vector<2x128xf32> to vector<2x32xf32>
    %310 = math.tanh %309 : vector<2x32xf32>
    %311 = vector.extract_strided_slice %296 {offsets = [0, 96], sizes = [2, 32], strides = [1, 1]} : vector<2x128xf32> to vector<2x32xf32>
    %312 = arith.negf %311 : vector<2x32xf32>
    %313 = math.exp %312 : vector<2x32xf32>
    %cst_99 = arith.constant 1.000000e+00 : f32
    %314 = vector.broadcast %cst_99 : f32 to vector<2x32xf32>
    %315 = arith.addf %314, %313 : vector<2x32xf32>
    %316 = arith.divf %314, %315 : vector<2x32xf32>
    %317 = arith.mulf %308, %279 : vector<2x32xf32>
    %318 = arith.mulf %302, %310 : vector<2x32xf32>
    %319 = arith.addf %317, %318 : vector<2x32xf32>
    %320 = math.tanh %319 : vector<2x32xf32>
    %321 = arith.mulf %316, %320 : vector<2x32xf32>
    %322 = arith.truncf %321 : vector<2x32xf32> to vector<2x32xbf16>
    %c0_100 = arith.constant 0 : index
    %323 = arith.index_cast %290 : i32 to index
    %c0_101 = arith.constant 0 : index
    %c0_102 = arith.constant 0 : index
    %324 = vector.load %arg4[%c0_100, %323, %c0_101, %c0_102] : memref<1x8x2x32xbf16, #tpu.memory_space<vmem>>, vector<1x1x2x32xbf16>
    %325 = vector.shape_cast %324 : vector<1x1x2x32xbf16> to vector<2x32xbf16>
    %326 = vector.shape_cast %322 : vector<2x32xbf16> to vector<1x1x2x32xbf16>
    tpu.vector_store %arg4[%c0_100, %323, %c0_101, %c0_102], %326 {strides = array<i32>} : memref<1x8x2x32xbf16, #tpu.memory_space<vmem>>, vector<1x1x2x32xbf16>,
    %c8_i32 = arith.constant 8 : i32
    %c0_103 = arith.constant 0 : index
    %c0_104 = arith.constant 0 : index
    %327 = vector.load %arg5[%c0_103, %c0_104] : memref<2x32xf32, #tpu.memory_space<vmem>>, vector<2x32xf32>
    tpu.vector_store %arg5[%c0_103, %c0_104], %321 {strides = array<i32>} : memref<2x32xf32, #tpu.memory_space<vmem>>, vector<2x32xf32>,
    %c0_105 = arith.constant 0 : index
    %c0_106 = arith.constant 0 : index
    %328 = vector.load %arg6[%c0_105, %c0_106] : memref<2x32xf32, #tpu.memory_space<vmem>>, vector<2x32xf32>
    tpu.vector_store %arg6[%c0_105, %c0_106], %319 {strides = array<i32>} : memref<2x32xf32, #tpu.memory_space<vmem>>, vector<2x32xf32>,
    return
  }
  func.func @transform_0(%arg0: i32, %arg1: i32) -> (i32, i32, i32, i32) {
    %c2_i32 = arith.constant 2 : i32
    %0 = arith.muli %c2_i32, %arg1 : i32
    %c0_i32 = arith.constant 0 : i32
    %1 = arith.subi %c0_i32, %0 : i32
    %2 = arith.muli %arg0, %1 : i32
    %3 = arith.addi %arg1, %2 : i32
    %c0_i32_0 = arith.constant 0 : i32
    %c0_i32_1 = arith.constant 0 : i32
    %c0_i32_2 = arith.constant 0 : i32
    return %arg0, %3, %c0_i32_0, %c0_i32_1 : i32, i32, i32, i32
  }
  func.func @transform_1(%arg0: i32, %arg1: i32) -> (i32, i32, i32) {
    %c0_i32 = arith.constant 0 : i32
    %c0_i32_0 = arith.constant 0 : i32
    %c0_i32_1 = arith.constant 0 : i32
    return %arg0, %c0_i32, %c0_i32_0 : i32, i32, i32
  }
  func.func @transform_2(%arg0: i32, %arg1: i32) -> (i32, i32, i32, i32) {
    %c2_i32 = arith.constant 2 : i32
    %0 = arith.muli %c2_i32, %arg1 : i32
    %c0_i32 = arith.constant 0 : i32
    %1 = arith.subi %c0_i32, %0 : i32
    %2 = arith.muli %arg0, %1 : i32
    %3 = arith.addi %arg1, %2 : i32
    %c0_i32_0 = arith.constant 0 : i32
    %c0_i32_1 = arith.constant 0 : i32
    %c0_i32_2 = arith.constant 0 : i32
    return %arg0, %3, %c0_i32_0, %c0_i32_1 : i32, i32, i32, i32
  }
}

module attributes {stable_mosaic.version = 11 : i64} {
  func.func @kernel(%arg0: i32, %arg1: i32, %arg2: memref<1x8x2x128xf32, #tpu.memory_space<vmem>>, %arg3: memref<1x32x128xbf16, #tpu.memory_space<vmem>>, %arg4: memref<1x2x32xbf16, #tpu.memory_space<vmem>>, %arg5: memref<2x32xf32, #tpu.memory_space<vmem>>, %arg6: memref<2x32xf32, #tpu.memory_space<vmem>>) attributes {dimension_semantics = [#tpu.dimension_semantics<parallel>, #tpu.dimension_semantics<arbitrary>], iteration_bounds = array<i64: 2, 1>, scalar_prefetch = 0 : i64, scratch_operands = 2 : i64, tpu.core_type = #tpu.core_type<tc>, window_params = [{transform_indices = @transform_0, window_bounds = array<i64: 1, 8, 2, 128>}, {transform_indices = @transform_1, window_bounds = array<i64: 1, 32, 128>}, {transform_indices = @transform_2, window_bounds = array<i64: 1, 2, 32>}]} {
    %c0_i32 = arith.constant 0 : i32
    %0 = arith.cmpi eq, %arg1, %c0_i32 : i32
    %1 = arith.extui %0 : i1 to i32
    %c0_i32_0 = arith.constant 0 : i32
    %2 = arith.cmpi ne, %1, %c0_i32_0 : i32
    scf.if %2 {
      %cst_86 = arith.constant 0.000000e+00 : f32
      %293 = vector.broadcast %cst_86 : f32 to vector<2x32xf32>
      %c0_87 = arith.constant 0 : index
      %c0_88 = arith.constant 0 : index
      %294 = vector.load %arg5[%c0_87, %c0_88] : memref<2x32xf32, #tpu.memory_space<vmem>>, vector<2x32xf32>
      tpu.vector_store %arg5[%c0_87, %c0_88], %293 {strides = array<i32>} : memref<2x32xf32, #tpu.memory_space<vmem>>, vector<2x32xf32>,
      %cst_89 = arith.constant 0.000000e+00 : f32
      %295 = vector.broadcast %cst_89 : f32 to vector<2x32xf32>
      %c0_90 = arith.constant 0 : index
      %c0_91 = arith.constant 0 : index
      %296 = vector.load %arg6[%c0_90, %c0_91] : memref<2x32xf32, #tpu.memory_space<vmem>>, vector<2x32xf32>
      tpu.vector_store %arg6[%c0_90, %c0_91], %295 {strides = array<i32>} : memref<2x32xf32, #tpu.memory_space<vmem>>, vector<2x32xf32>,
    } else {
    }
    %c0 = arith.constant 0 : index
    %c0_1 = arith.constant 0 : index
    %c0_2 = arith.constant 0 : index
    %3 = vector.load %arg3[%c0, %c0_1, %c0_2] : memref<1x32x128xbf16, #tpu.memory_space<vmem>>, vector<1x32x128xbf16>
    %4 = vector.shape_cast %3 : vector<1x32x128xbf16> to vector<32x128xbf16>
    %c0_3 = arith.constant 0 : index
    %c0_4 = arith.constant 0 : index
    %5 = vector.load %arg5[%c0_3, %c0_4] : memref<2x32xf32, #tpu.memory_space<vmem>>, vector<2x32xf32>
    %c0_5 = arith.constant 0 : index
    %c0_6 = arith.constant 0 : index
    %6 = vector.load %arg6[%c0_5, %c0_6] : memref<2x32xf32, #tpu.memory_space<vmem>>, vector<2x32xf32>
    %c0_i32_7 = arith.constant 0 : i32
    %c2_i32 = arith.constant 2 : i32
    %7 = arith.muli %c2_i32, %c0_i32_7 : i32
    %c7_i32 = arith.constant 7 : i32
    %8 = arith.subi %c7_i32, %7 : i32
    %9 = arith.muli %arg0, %8 : i32
    %10 = arith.addi %c0_i32_7, %9 : i32
    %c0_8 = arith.constant 0 : index
    %11 = arith.index_cast %10 : i32 to index
    %c0_9 = arith.constant 0 : index
    %c0_10 = arith.constant 0 : index
    %12 = vector.load %arg2[%c0_8, %11, %c0_9, %c0_10] : memref<1x8x2x128xf32, #tpu.memory_space<vmem>>, vector<1x1x2x128xf32>
    %13 = vector.shape_cast %12 : vector<1x1x2x128xf32> to vector<2x128xf32>
    %14 = arith.truncf %5 : vector<2x32xf32> to vector<2x32xbf16>
    %cst = arith.constant dense<0.000000e+00> : vector<2x128xf32>
    %15 = tpu.matmul %14, %4, %cst {dimension_numbers = #tpu.dot_dimension_numbers<[1], [0], [0], [1], [0, 0, 1, 1], [], []>} : vector<2x32xbf16>, vector<32x128xbf16>, vector<2x128xf32> -> vector<2x128xf32>
    %16 = arith.addf %13, %15 : vector<2x128xf32>
    %17 = vector.extract_strided_slice %16 {offsets = [0, 0], sizes = [2, 32], strides = [1, 1]} : vector<2x128xf32> to vector<2x32xf32>
    %18 = arith.negf %17 : vector<2x32xf32>
    %19 = math.exp %18 : vector<2x32xf32>
    %cst_11 = arith.constant 1.000000e+00 : f32
    %20 = vector.broadcast %cst_11 : f32 to vector<2x32xf32>
    %21 = arith.addf %20, %19 : vector<2x32xf32>
    %22 = arith.divf %20, %21 : vector<2x32xf32>
    %23 = vector.extract_strided_slice %16 {offsets = [0, 32], sizes = [2, 32], strides = [1, 1]} : vector<2x128xf32> to vector<2x32xf32>
    %24 = arith.negf %23 : vector<2x32xf32>
    %25 = math.exp %24 : vector<2x32xf32>
    %cst_12 = arith.constant 1.000000e+00 : f32
    %26 = vector.broadcast %cst_12 : f32 to vector<2x32xf32>
    %27 = arith.addf %26, %25 : vector<2x32xf32>
    %28 = arith.divf %26, %27 : vector<2x32xf32>
    %29 = vector.extract_strided_slice %16 {offsets = [0, 64], sizes = [2, 32], strides = [1, 1]} : vector<2x128xf32> to vector<2x32xf32>
    %30 = math.tanh %29 : vector<2x32xf32>
    %31 = vector.extract_strided_slice %16 {offsets = [0, 96], sizes = [2, 32], strides = [1, 1]} : vector<2x128xf32> to vector<2x32xf32>
    %32 = arith.negf %31 : vector<2x32xf32>
    %33 = math.exp %32 : vector<2x32xf32>
    %cst_13 = arith.constant 1.000000e+00 : f32
    %34 = vector.broadcast %cst_13 : f32 to vector<2x32xf32>
    %35 = arith.addf %34, %33 : vector<2x32xf32>
    %36 = arith.divf %34, %35 : vector<2x32xf32>
    %37 = arith.mulf %28, %6 : vector<2x32xf32>
    %38 = arith.mulf %22, %30 : vector<2x32xf32>
    %39 = arith.addf %37, %38 : vector<2x32xf32>
    %40 = math.tanh %39 : vector<2x32xf32>
    %41 = arith.mulf %36, %40 : vector<2x32xf32>
    %c1_i32 = arith.constant 1 : i32
    %c2_i32_14 = arith.constant 2 : i32
    %42 = arith.muli %c2_i32_14, %c1_i32 : i32
    %c7_i32_15 = arith.constant 7 : i32
    %43 = arith.subi %c7_i32_15, %42 : i32
    %44 = arith.muli %arg0, %43 : i32
    %45 = arith.addi %c1_i32, %44 : i32
    %c0_16 = arith.constant 0 : index
    %46 = arith.index_cast %45 : i32 to index
    %c0_17 = arith.constant 0 : index
    %c0_18 = arith.constant 0 : index
    %47 = vector.load %arg2[%c0_16, %46, %c0_17, %c0_18] : memref<1x8x2x128xf32, #tpu.memory_space<vmem>>, vector<1x1x2x128xf32>
    %48 = vector.shape_cast %47 : vector<1x1x2x128xf32> to vector<2x128xf32>
    %49 = arith.truncf %41 : vector<2x32xf32> to vector<2x32xbf16>
    %cst_19 = arith.constant dense<0.000000e+00> : vector<2x128xf32>
    %50 = tpu.matmul %49, %4, %cst_19 {dimension_numbers = #tpu.dot_dimension_numbers<[1], [0], [0], [1], [0, 0, 1, 1], [], []>} : vector<2x32xbf16>, vector<32x128xbf16>, vector<2x128xf32> -> vector<2x128xf32>
    %51 = arith.addf %48, %50 : vector<2x128xf32>
    %52 = vector.extract_strided_slice %51 {offsets = [0, 0], sizes = [2, 32], strides = [1, 1]} : vector<2x128xf32> to vector<2x32xf32>
    %53 = arith.negf %52 : vector<2x32xf32>
    %54 = math.exp %53 : vector<2x32xf32>
    %cst_20 = arith.constant 1.000000e+00 : f32
    %55 = vector.broadcast %cst_20 : f32 to vector<2x32xf32>
    %56 = arith.addf %55, %54 : vector<2x32xf32>
    %57 = arith.divf %55, %56 : vector<2x32xf32>
    %58 = vector.extract_strided_slice %51 {offsets = [0, 32], sizes = [2, 32], strides = [1, 1]} : vector<2x128xf32> to vector<2x32xf32>
    %59 = arith.negf %58 : vector<2x32xf32>
    %60 = math.exp %59 : vector<2x32xf32>
    %cst_21 = arith.constant 1.000000e+00 : f32
    %61 = vector.broadcast %cst_21 : f32 to vector<2x32xf32>
    %62 = arith.addf %61, %60 : vector<2x32xf32>
    %63 = arith.divf %61, %62 : vector<2x32xf32>
    %64 = vector.extract_strided_slice %51 {offsets = [0, 64], sizes = [2, 32], strides = [1, 1]} : vector<2x128xf32> to vector<2x32xf32>
    %65 = math.tanh %64 : vector<2x32xf32>
    %66 = vector.extract_strided_slice %51 {offsets = [0, 96], sizes = [2, 32], strides = [1, 1]} : vector<2x128xf32> to vector<2x32xf32>
    %67 = arith.negf %66 : vector<2x32xf32>
    %68 = math.exp %67 : vector<2x32xf32>
    %cst_22 = arith.constant 1.000000e+00 : f32
    %69 = vector.broadcast %cst_22 : f32 to vector<2x32xf32>
    %70 = arith.addf %69, %68 : vector<2x32xf32>
    %71 = arith.divf %69, %70 : vector<2x32xf32>
    %72 = arith.mulf %63, %39 : vector<2x32xf32>
    %73 = arith.mulf %57, %65 : vector<2x32xf32>
    %74 = arith.addf %72, %73 : vector<2x32xf32>
    %75 = math.tanh %74 : vector<2x32xf32>
    %76 = arith.mulf %71, %75 : vector<2x32xf32>
    %c2_i32_23 = arith.constant 2 : i32
    %c2_i32_24 = arith.constant 2 : i32
    %77 = arith.muli %c2_i32_24, %c2_i32_23 : i32
    %c7_i32_25 = arith.constant 7 : i32
    %78 = arith.subi %c7_i32_25, %77 : i32
    %79 = arith.muli %arg0, %78 : i32
    %80 = arith.addi %c2_i32_23, %79 : i32
    %c0_26 = arith.constant 0 : index
    %81 = arith.index_cast %80 : i32 to index
    %c0_27 = arith.constant 0 : index
    %c0_28 = arith.constant 0 : index
    %82 = vector.load %arg2[%c0_26, %81, %c0_27, %c0_28] : memref<1x8x2x128xf32, #tpu.memory_space<vmem>>, vector<1x1x2x128xf32>
    %83 = vector.shape_cast %82 : vector<1x1x2x128xf32> to vector<2x128xf32>
    %84 = arith.truncf %76 : vector<2x32xf32> to vector<2x32xbf16>
    %cst_29 = arith.constant dense<0.000000e+00> : vector<2x128xf32>
    %85 = tpu.matmul %84, %4, %cst_29 {dimension_numbers = #tpu.dot_dimension_numbers<[1], [0], [0], [1], [0, 0, 1, 1], [], []>} : vector<2x32xbf16>, vector<32x128xbf16>, vector<2x128xf32> -> vector<2x128xf32>
    %86 = arith.addf %83, %85 : vector<2x128xf32>
    %87 = vector.extract_strided_slice %86 {offsets = [0, 0], sizes = [2, 32], strides = [1, 1]} : vector<2x128xf32> to vector<2x32xf32>
    %88 = arith.negf %87 : vector<2x32xf32>
    %89 = math.exp %88 : vector<2x32xf32>
    %cst_30 = arith.constant 1.000000e+00 : f32
    %90 = vector.broadcast %cst_30 : f32 to vector<2x32xf32>
    %91 = arith.addf %90, %89 : vector<2x32xf32>
    %92 = arith.divf %90, %91 : vector<2x32xf32>
    %93 = vector.extract_strided_slice %86 {offsets = [0, 32], sizes = [2, 32], strides = [1, 1]} : vector<2x128xf32> to vector<2x32xf32>
    %94 = arith.negf %93 : vector<2x32xf32>
    %95 = math.exp %94 : vector<2x32xf32>
    %cst_31 = arith.constant 1.000000e+00 : f32
    %96 = vector.broadcast %cst_31 : f32 to vector<2x32xf32>
    %97 = arith.addf %96, %95 : vector<2x32xf32>
    %98 = arith.divf %96, %97 : vector<2x32xf32>
    %99 = vector.extract_strided_slice %86 {offsets = [0, 64], sizes = [2, 32], strides = [1, 1]} : vector<2x128xf32> to vector<2x32xf32>
    %100 = math.tanh %99 : vector<2x32xf32>
    %101 = vector.extract_strided_slice %86 {offsets = [0, 96], sizes = [2, 32], strides = [1, 1]} : vector<2x128xf32> to vector<2x32xf32>
    %102 = arith.negf %101 : vector<2x32xf32>
    %103 = math.exp %102 : vector<2x32xf32>
    %cst_32 = arith.constant 1.000000e+00 : f32
    %104 = vector.broadcast %cst_32 : f32 to vector<2x32xf32>
    %105 = arith.addf %104, %103 : vector<2x32xf32>
    %106 = arith.divf %104, %105 : vector<2x32xf32>
    %107 = arith.mulf %98, %74 : vector<2x32xf32>
    %108 = arith.mulf %92, %100 : vector<2x32xf32>
    %109 = arith.addf %107, %108 : vector<2x32xf32>
    %110 = math.tanh %109 : vector<2x32xf32>
    %111 = arith.mulf %106, %110 : vector<2x32xf32>
    %c3_i32 = arith.constant 3 : i32
    %c2_i32_33 = arith.constant 2 : i32
    %112 = arith.muli %c2_i32_33, %c3_i32 : i32
    %c7_i32_34 = arith.constant 7 : i32
    %113 = arith.subi %c7_i32_34, %112 : i32
    %114 = arith.muli %arg0, %113 : i32
    %115 = arith.addi %c3_i32, %114 : i32
    %c0_35 = arith.constant 0 : index
    %116 = arith.index_cast %115 : i32 to index
    %c0_36 = arith.constant 0 : index
    %c0_37 = arith.constant 0 : index
    %117 = vector.load %arg2[%c0_35, %116, %c0_36, %c0_37] : memref<1x8x2x128xf32, #tpu.memory_space<vmem>>, vector<1x1x2x128xf32>
    %118 = vector.shape_cast %117 : vector<1x1x2x128xf32> to vector<2x128xf32>
    %119 = arith.truncf %111 : vector<2x32xf32> to vector<2x32xbf16>
    %cst_38 = arith.constant dense<0.000000e+00> : vector<2x128xf32>
    %120 = tpu.matmul %119, %4, %cst_38 {dimension_numbers = #tpu.dot_dimension_numbers<[1], [0], [0], [1], [0, 0, 1, 1], [], []>} : vector<2x32xbf16>, vector<32x128xbf16>, vector<2x128xf32> -> vector<2x128xf32>
    %121 = arith.addf %118, %120 : vector<2x128xf32>
    %122 = vector.extract_strided_slice %121 {offsets = [0, 0], sizes = [2, 32], strides = [1, 1]} : vector<2x128xf32> to vector<2x32xf32>
    %123 = arith.negf %122 : vector<2x32xf32>
    %124 = math.exp %123 : vector<2x32xf32>
    %cst_39 = arith.constant 1.000000e+00 : f32
    %125 = vector.broadcast %cst_39 : f32 to vector<2x32xf32>
    %126 = arith.addf %125, %124 : vector<2x32xf32>
    %127 = arith.divf %125, %126 : vector<2x32xf32>
    %128 = vector.extract_strided_slice %121 {offsets = [0, 32], sizes = [2, 32], strides = [1, 1]} : vector<2x128xf32> to vector<2x32xf32>
    %129 = arith.negf %128 : vector<2x32xf32>
    %130 = math.exp %129 : vector<2x32xf32>
    %cst_40 = arith.constant 1.000000e+00 : f32
    %131 = vector.broadcast %cst_40 : f32 to vector<2x32xf32>
    %132 = arith.addf %131, %130 : vector<2x32xf32>
    %133 = arith.divf %131, %132 : vector<2x32xf32>
    %134 = vector.extract_strided_slice %121 {offsets = [0, 64], sizes = [2, 32], strides = [1, 1]} : vector<2x128xf32> to vector<2x32xf32>
    %135 = math.tanh %134 : vector<2x32xf32>
    %136 = vector.extract_strided_slice %121 {offsets = [0, 96], sizes = [2, 32], strides = [1, 1]} : vector<2x128xf32> to vector<2x32xf32>
    %137 = arith.negf %136 : vector<2x32xf32>
    %138 = math.exp %137 : vector<2x32xf32>
    %cst_41 = arith.constant 1.000000e+00 : f32
    %139 = vector.broadcast %cst_41 : f32 to vector<2x32xf32>
    %140 = arith.addf %139, %138 : vector<2x32xf32>
    %141 = arith.divf %139, %140 : vector<2x32xf32>
    %142 = arith.mulf %133, %109 : vector<2x32xf32>
    %143 = arith.mulf %127, %135 : vector<2x32xf32>
    %144 = arith.addf %142, %143 : vector<2x32xf32>
    %145 = math.tanh %144 : vector<2x32xf32>
    %146 = arith.mulf %141, %145 : vector<2x32xf32>
    %c4_i32 = arith.constant 4 : i32
    %c2_i32_42 = arith.constant 2 : i32
    %147 = arith.muli %c2_i32_42, %c4_i32 : i32
    %c7_i32_43 = arith.constant 7 : i32
    %148 = arith.subi %c7_i32_43, %147 : i32
    %149 = arith.muli %arg0, %148 : i32
    %150 = arith.addi %c4_i32, %149 : i32
    %c0_44 = arith.constant 0 : index
    %151 = arith.index_cast %150 : i32 to index
    %c0_45 = arith.constant 0 : index
    %c0_46 = arith.constant 0 : index
    %152 = vector.load %arg2[%c0_44, %151, %c0_45, %c0_46] : memref<1x8x2x128xf32, #tpu.memory_space<vmem>>, vector<1x1x2x128xf32>
    %153 = vector.shape_cast %152 : vector<1x1x2x128xf32> to vector<2x128xf32>
    %154 = arith.truncf %146 : vector<2x32xf32> to vector<2x32xbf16>
    %cst_47 = arith.constant dense<0.000000e+00> : vector<2x128xf32>
    %155 = tpu.matmul %154, %4, %cst_47 {dimension_numbers = #tpu.dot_dimension_numbers<[1], [0], [0], [1], [0, 0, 1, 1], [], []>} : vector<2x32xbf16>, vector<32x128xbf16>, vector<2x128xf32> -> vector<2x128xf32>
    %156 = arith.addf %153, %155 : vector<2x128xf32>
    %157 = vector.extract_strided_slice %156 {offsets = [0, 0], sizes = [2, 32], strides = [1, 1]} : vector<2x128xf32> to vector<2x32xf32>
    %158 = arith.negf %157 : vector<2x32xf32>
    %159 = math.exp %158 : vector<2x32xf32>
    %cst_48 = arith.constant 1.000000e+00 : f32
    %160 = vector.broadcast %cst_48 : f32 to vector<2x32xf32>
    %161 = arith.addf %160, %159 : vector<2x32xf32>
    %162 = arith.divf %160, %161 : vector<2x32xf32>
    %163 = vector.extract_strided_slice %156 {offsets = [0, 32], sizes = [2, 32], strides = [1, 1]} : vector<2x128xf32> to vector<2x32xf32>
    %164 = arith.negf %163 : vector<2x32xf32>
    %165 = math.exp %164 : vector<2x32xf32>
    %cst_49 = arith.constant 1.000000e+00 : f32
    %166 = vector.broadcast %cst_49 : f32 to vector<2x32xf32>
    %167 = arith.addf %166, %165 : vector<2x32xf32>
    %168 = arith.divf %166, %167 : vector<2x32xf32>
    %169 = vector.extract_strided_slice %156 {offsets = [0, 64], sizes = [2, 32], strides = [1, 1]} : vector<2x128xf32> to vector<2x32xf32>
    %170 = math.tanh %169 : vector<2x32xf32>
    %171 = vector.extract_strided_slice %156 {offsets = [0, 96], sizes = [2, 32], strides = [1, 1]} : vector<2x128xf32> to vector<2x32xf32>
    %172 = arith.negf %171 : vector<2x32xf32>
    %173 = math.exp %172 : vector<2x32xf32>
    %cst_50 = arith.constant 1.000000e+00 : f32
    %174 = vector.broadcast %cst_50 : f32 to vector<2x32xf32>
    %175 = arith.addf %174, %173 : vector<2x32xf32>
    %176 = arith.divf %174, %175 : vector<2x32xf32>
    %177 = arith.mulf %168, %144 : vector<2x32xf32>
    %178 = arith.mulf %162, %170 : vector<2x32xf32>
    %179 = arith.addf %177, %178 : vector<2x32xf32>
    %180 = math.tanh %179 : vector<2x32xf32>
    %181 = arith.mulf %176, %180 : vector<2x32xf32>
    %c5_i32 = arith.constant 5 : i32
    %c2_i32_51 = arith.constant 2 : i32
    %182 = arith.muli %c2_i32_51, %c5_i32 : i32
    %c7_i32_52 = arith.constant 7 : i32
    %183 = arith.subi %c7_i32_52, %182 : i32
    %184 = arith.muli %arg0, %183 : i32
    %185 = arith.addi %c5_i32, %184 : i32
    %c0_53 = arith.constant 0 : index
    %186 = arith.index_cast %185 : i32 to index
    %c0_54 = arith.constant 0 : index
    %c0_55 = arith.constant 0 : index
    %187 = vector.load %arg2[%c0_53, %186, %c0_54, %c0_55] : memref<1x8x2x128xf32, #tpu.memory_space<vmem>>, vector<1x1x2x128xf32>
    %188 = vector.shape_cast %187 : vector<1x1x2x128xf32> to vector<2x128xf32>
    %189 = arith.truncf %181 : vector<2x32xf32> to vector<2x32xbf16>
    %cst_56 = arith.constant dense<0.000000e+00> : vector<2x128xf32>
    %190 = tpu.matmul %189, %4, %cst_56 {dimension_numbers = #tpu.dot_dimension_numbers<[1], [0], [0], [1], [0, 0, 1, 1], [], []>} : vector<2x32xbf16>, vector<32x128xbf16>, vector<2x128xf32> -> vector<2x128xf32>
    %191 = arith.addf %188, %190 : vector<2x128xf32>
    %192 = vector.extract_strided_slice %191 {offsets = [0, 0], sizes = [2, 32], strides = [1, 1]} : vector<2x128xf32> to vector<2x32xf32>
    %193 = arith.negf %192 : vector<2x32xf32>
    %194 = math.exp %193 : vector<2x32xf32>
    %cst_57 = arith.constant 1.000000e+00 : f32
    %195 = vector.broadcast %cst_57 : f32 to vector<2x32xf32>
    %196 = arith.addf %195, %194 : vector<2x32xf32>
    %197 = arith.divf %195, %196 : vector<2x32xf32>
    %198 = vector.extract_strided_slice %191 {offsets = [0, 32], sizes = [2, 32], strides = [1, 1]} : vector<2x128xf32> to vector<2x32xf32>
    %199 = arith.negf %198 : vector<2x32xf32>
    %200 = math.exp %199 : vector<2x32xf32>
    %cst_58 = arith.constant 1.000000e+00 : f32
    %201 = vector.broadcast %cst_58 : f32 to vector<2x32xf32>
    %202 = arith.addf %201, %200 : vector<2x32xf32>
    %203 = arith.divf %201, %202 : vector<2x32xf32>
    %204 = vector.extract_strided_slice %191 {offsets = [0, 64], sizes = [2, 32], strides = [1, 1]} : vector<2x128xf32> to vector<2x32xf32>
    %205 = math.tanh %204 : vector<2x32xf32>
    %206 = vector.extract_strided_slice %191 {offsets = [0, 96], sizes = [2, 32], strides = [1, 1]} : vector<2x128xf32> to vector<2x32xf32>
    %207 = arith.negf %206 : vector<2x32xf32>
    %208 = math.exp %207 : vector<2x32xf32>
    %cst_59 = arith.constant 1.000000e+00 : f32
    %209 = vector.broadcast %cst_59 : f32 to vector<2x32xf32>
    %210 = arith.addf %209, %208 : vector<2x32xf32>
    %211 = arith.divf %209, %210 : vector<2x32xf32>
    %212 = arith.mulf %203, %179 : vector<2x32xf32>
    %213 = arith.mulf %197, %205 : vector<2x32xf32>
    %214 = arith.addf %212, %213 : vector<2x32xf32>
    %215 = math.tanh %214 : vector<2x32xf32>
    %216 = arith.mulf %211, %215 : vector<2x32xf32>
    %c6_i32 = arith.constant 6 : i32
    %c2_i32_60 = arith.constant 2 : i32
    %217 = arith.muli %c2_i32_60, %c6_i32 : i32
    %c7_i32_61 = arith.constant 7 : i32
    %218 = arith.subi %c7_i32_61, %217 : i32
    %219 = arith.muli %arg0, %218 : i32
    %220 = arith.addi %c6_i32, %219 : i32
    %c0_62 = arith.constant 0 : index
    %221 = arith.index_cast %220 : i32 to index
    %c0_63 = arith.constant 0 : index
    %c0_64 = arith.constant 0 : index
    %222 = vector.load %arg2[%c0_62, %221, %c0_63, %c0_64] : memref<1x8x2x128xf32, #tpu.memory_space<vmem>>, vector<1x1x2x128xf32>
    %223 = vector.shape_cast %222 : vector<1x1x2x128xf32> to vector<2x128xf32>
    %224 = arith.truncf %216 : vector<2x32xf32> to vector<2x32xbf16>
    %cst_65 = arith.constant dense<0.000000e+00> : vector<2x128xf32>
    %225 = tpu.matmul %224, %4, %cst_65 {dimension_numbers = #tpu.dot_dimension_numbers<[1], [0], [0], [1], [0, 0, 1, 1], [], []>} : vector<2x32xbf16>, vector<32x128xbf16>, vector<2x128xf32> -> vector<2x128xf32>
    %226 = arith.addf %223, %225 : vector<2x128xf32>
    %227 = vector.extract_strided_slice %226 {offsets = [0, 0], sizes = [2, 32], strides = [1, 1]} : vector<2x128xf32> to vector<2x32xf32>
    %228 = arith.negf %227 : vector<2x32xf32>
    %229 = math.exp %228 : vector<2x32xf32>
    %cst_66 = arith.constant 1.000000e+00 : f32
    %230 = vector.broadcast %cst_66 : f32 to vector<2x32xf32>
    %231 = arith.addf %230, %229 : vector<2x32xf32>
    %232 = arith.divf %230, %231 : vector<2x32xf32>
    %233 = vector.extract_strided_slice %226 {offsets = [0, 32], sizes = [2, 32], strides = [1, 1]} : vector<2x128xf32> to vector<2x32xf32>
    %234 = arith.negf %233 : vector<2x32xf32>
    %235 = math.exp %234 : vector<2x32xf32>
    %cst_67 = arith.constant 1.000000e+00 : f32
    %236 = vector.broadcast %cst_67 : f32 to vector<2x32xf32>
    %237 = arith.addf %236, %235 : vector<2x32xf32>
    %238 = arith.divf %236, %237 : vector<2x32xf32>
    %239 = vector.extract_strided_slice %226 {offsets = [0, 64], sizes = [2, 32], strides = [1, 1]} : vector<2x128xf32> to vector<2x32xf32>
    %240 = math.tanh %239 : vector<2x32xf32>
    %241 = vector.extract_strided_slice %226 {offsets = [0, 96], sizes = [2, 32], strides = [1, 1]} : vector<2x128xf32> to vector<2x32xf32>
    %242 = arith.negf %241 : vector<2x32xf32>
    %243 = math.exp %242 : vector<2x32xf32>
    %cst_68 = arith.constant 1.000000e+00 : f32
    %244 = vector.broadcast %cst_68 : f32 to vector<2x32xf32>
    %245 = arith.addf %244, %243 : vector<2x32xf32>
    %246 = arith.divf %244, %245 : vector<2x32xf32>
    %247 = arith.mulf %238, %214 : vector<2x32xf32>
    %248 = arith.mulf %232, %240 : vector<2x32xf32>
    %249 = arith.addf %247, %248 : vector<2x32xf32>
    %250 = math.tanh %249 : vector<2x32xf32>
    %251 = arith.mulf %246, %250 : vector<2x32xf32>
    %c7_i32_69 = arith.constant 7 : i32
    %c2_i32_70 = arith.constant 2 : i32
    %252 = arith.muli %c2_i32_70, %c7_i32_69 : i32
    %c7_i32_71 = arith.constant 7 : i32
    %253 = arith.subi %c7_i32_71, %252 : i32
    %254 = arith.muli %arg0, %253 : i32
    %255 = arith.addi %c7_i32_69, %254 : i32
    %c0_72 = arith.constant 0 : index
    %256 = arith.index_cast %255 : i32 to index
    %c0_73 = arith.constant 0 : index
    %c0_74 = arith.constant 0 : index
    %257 = vector.load %arg2[%c0_72, %256, %c0_73, %c0_74] : memref<1x8x2x128xf32, #tpu.memory_space<vmem>>, vector<1x1x2x128xf32>
    %258 = vector.shape_cast %257 : vector<1x1x2x128xf32> to vector<2x128xf32>
    %259 = arith.truncf %251 : vector<2x32xf32> to vector<2x32xbf16>
    %cst_75 = arith.constant dense<0.000000e+00> : vector<2x128xf32>
    %260 = tpu.matmul %259, %4, %cst_75 {dimension_numbers = #tpu.dot_dimension_numbers<[1], [0], [0], [1], [0, 0, 1, 1], [], []>} : vector<2x32xbf16>, vector<32x128xbf16>, vector<2x128xf32> -> vector<2x128xf32>
    %261 = arith.addf %258, %260 : vector<2x128xf32>
    %262 = vector.extract_strided_slice %261 {offsets = [0, 0], sizes = [2, 32], strides = [1, 1]} : vector<2x128xf32> to vector<2x32xf32>
    %263 = arith.negf %262 : vector<2x32xf32>
    %264 = math.exp %263 : vector<2x32xf32>
    %cst_76 = arith.constant 1.000000e+00 : f32
    %265 = vector.broadcast %cst_76 : f32 to vector<2x32xf32>
    %266 = arith.addf %265, %264 : vector<2x32xf32>
    %267 = arith.divf %265, %266 : vector<2x32xf32>
    %268 = vector.extract_strided_slice %261 {offsets = [0, 32], sizes = [2, 32], strides = [1, 1]} : vector<2x128xf32> to vector<2x32xf32>
    %269 = arith.negf %268 : vector<2x32xf32>
    %270 = math.exp %269 : vector<2x32xf32>
    %cst_77 = arith.constant 1.000000e+00 : f32
    %271 = vector.broadcast %cst_77 : f32 to vector<2x32xf32>
    %272 = arith.addf %271, %270 : vector<2x32xf32>
    %273 = arith.divf %271, %272 : vector<2x32xf32>
    %274 = vector.extract_strided_slice %261 {offsets = [0, 64], sizes = [2, 32], strides = [1, 1]} : vector<2x128xf32> to vector<2x32xf32>
    %275 = math.tanh %274 : vector<2x32xf32>
    %276 = vector.extract_strided_slice %261 {offsets = [0, 96], sizes = [2, 32], strides = [1, 1]} : vector<2x128xf32> to vector<2x32xf32>
    %277 = arith.negf %276 : vector<2x32xf32>
    %278 = math.exp %277 : vector<2x32xf32>
    %cst_78 = arith.constant 1.000000e+00 : f32
    %279 = vector.broadcast %cst_78 : f32 to vector<2x32xf32>
    %280 = arith.addf %279, %278 : vector<2x32xf32>
    %281 = arith.divf %279, %280 : vector<2x32xf32>
    %282 = arith.mulf %273, %249 : vector<2x32xf32>
    %283 = arith.mulf %267, %275 : vector<2x32xf32>
    %284 = arith.addf %282, %283 : vector<2x32xf32>
    %285 = math.tanh %284 : vector<2x32xf32>
    %286 = arith.mulf %281, %285 : vector<2x32xf32>
    %c8_i32 = arith.constant 8 : i32
    %c0_79 = arith.constant 0 : index
    %c0_80 = arith.constant 0 : index
    %287 = vector.load %arg5[%c0_79, %c0_80] : memref<2x32xf32, #tpu.memory_space<vmem>>, vector<2x32xf32>
    tpu.vector_store %arg5[%c0_79, %c0_80], %286 {strides = array<i32>} : memref<2x32xf32, #tpu.memory_space<vmem>>, vector<2x32xf32>,
    %c0_81 = arith.constant 0 : index
    %c0_82 = arith.constant 0 : index
    %288 = vector.load %arg6[%c0_81, %c0_82] : memref<2x32xf32, #tpu.memory_space<vmem>>, vector<2x32xf32>
    tpu.vector_store %arg6[%c0_81, %c0_82], %284 {strides = array<i32>} : memref<2x32xf32, #tpu.memory_space<vmem>>, vector<2x32xf32>,
    %289 = arith.truncf %286 : vector<2x32xf32> to vector<2x32xbf16>
    %c0_83 = arith.constant 0 : index
    %c0_84 = arith.constant 0 : index
    %c0_85 = arith.constant 0 : index
    %290 = vector.load %arg4[%c0_83, %c0_84, %c0_85] : memref<1x2x32xbf16, #tpu.memory_space<vmem>>, vector<1x2x32xbf16>
    %291 = vector.shape_cast %290 : vector<1x2x32xbf16> to vector<2x32xbf16>
    %292 = vector.shape_cast %289 : vector<2x32xbf16> to vector<1x2x32xbf16>
    tpu.vector_store %arg4[%c0_83, %c0_84, %c0_85], %292 {strides = array<i32>} : memref<1x2x32xbf16, #tpu.memory_space<vmem>>, vector<1x2x32xbf16>,
    return
  }
  func.func @transform_0(%arg0: i32, %arg1: i32) -> (i32, i32, i32, i32) {
    %c2_i32 = arith.constant 2 : i32
    %0 = arith.muli %c2_i32, %arg1 : i32
    %c0_i32 = arith.constant 0 : i32
    %1 = arith.subi %c0_i32, %0 : i32
    %2 = arith.muli %arg0, %1 : i32
    %3 = arith.addi %arg1, %2 : i32
    %c0_i32_0 = arith.constant 0 : i32
    %c0_i32_1 = arith.constant 0 : i32
    %c0_i32_2 = arith.constant 0 : i32
    return %arg0, %3, %c0_i32_0, %c0_i32_1 : i32, i32, i32, i32
  }
  func.func @transform_1(%arg0: i32, %arg1: i32) -> (i32, i32, i32) {
    %c0_i32 = arith.constant 0 : i32
    %c0_i32_0 = arith.constant 0 : i32
    %c0_i32_1 = arith.constant 0 : i32
    return %arg0, %c0_i32, %c0_i32_0 : i32, i32, i32
  }
  func.func @transform_2(%arg0: i32, %arg1: i32) -> (i32, i32, i32) {
    %c0_i32 = arith.constant 0 : i32
    %c0_i32_0 = arith.constant 0 : i32
    %c0_i32_1 = arith.constant 0 : i32
    return %arg0, %c0_i32, %c0_i32_0 : i32, i32, i32
  }
}

module attributes {stable_mosaic.version = 11 : i64} {
  func.func @dual_matmul_bias_kernel(%arg0: i32, %arg1: i32, %arg2: memref<16x32xbf16, #tpu.memory_space<vmem>>, %arg3: memref<16x32xbf16, #tpu.memory_space<vmem>>, %arg4: memref<32x128xbf16, #tpu.memory_space<vmem>>, %arg5: memref<32x128xbf16, #tpu.memory_space<vmem>>, %arg6: memref<1x128xf32, #tpu.memory_space<vmem>>, %arg7: memref<1x16x128xf32, #tpu.memory_space<vmem>>) attributes {dimension_semantics = [#tpu.dimension_semantics<parallel>, #tpu.dimension_semantics<parallel>], iteration_bounds = array<i64: 1, 2>, scalar_prefetch = 0 : i64, scratch_operands = 0 : i64, tpu.core_type = #tpu.core_type<tc>, window_params = [{transform_indices = @transform_0, window_bounds = array<i64: 16, 32>}, {transform_indices = @transform_1, window_bounds = array<i64: 16, 32>}, {transform_indices = @transform_2, window_bounds = array<i64: 32, 128>}, {transform_indices = @transform_3, window_bounds = array<i64: 32, 128>}, {transform_indices = @transform_4, window_bounds = array<i64: 1, 128>}, {transform_indices = @transform_5, window_bounds = array<i64: 1, 16, 128>}]} {
    %c0 = arith.constant 0 : index
    %c0_0 = arith.constant 0 : index
    %0 = vector.load %arg2[%c0, %c0_0] : memref<16x32xbf16, #tpu.memory_space<vmem>>, vector<16x32xbf16>
    %c0_1 = arith.constant 0 : index
    %c0_2 = arith.constant 0 : index
    %1 = vector.load %arg4[%c0_1, %c0_2] : memref<32x128xbf16, #tpu.memory_space<vmem>>, vector<32x128xbf16>
    %cst = arith.constant dense<0.000000e+00> : vector<16x128xf32>
    %2 = tpu.matmul %0, %1, %cst {dimension_numbers = #tpu.dot_dimension_numbers<[1], [0], [0], [1], [0, 0, 1, 1], [], []>} : vector<16x32xbf16>, vector<32x128xbf16>, vector<16x128xf32> -> vector<16x128xf32>
    %c0_3 = arith.constant 0 : index
    %c0_4 = arith.constant 0 : index
    %3 = vector.load %arg3[%c0_3, %c0_4] : memref<16x32xbf16, #tpu.memory_space<vmem>>, vector<16x32xbf16>
    %c0_5 = arith.constant 0 : index
    %c0_6 = arith.constant 0 : index
    %4 = vector.load %arg5[%c0_5, %c0_6] : memref<32x128xbf16, #tpu.memory_space<vmem>>, vector<32x128xbf16>
    %cst_7 = arith.constant dense<0.000000e+00> : vector<16x128xf32>
    %5 = tpu.matmul %3, %4, %cst_7 {dimension_numbers = #tpu.dot_dimension_numbers<[1], [0], [0], [1], [0, 0, 1, 1], [], []>} : vector<16x32xbf16>, vector<32x128xbf16>, vector<16x128xf32> -> vector<16x128xf32>
    %6 = arith.addf %2, %5 : vector<16x128xf32>
    %c0_8 = arith.constant 0 : index
    %c0_9 = arith.constant 0 : index
    %7 = vector.load %arg6[%c0_8, %c0_9] : memref<1x128xf32, #tpu.memory_space<vmem>>, vector<1x128xf32>
    %8 = vector.broadcast %7 : vector<1x128xf32> to vector<16x128xf32>
    %9 = arith.addf %6, %8 : vector<16x128xf32>
    %c0_10 = arith.constant 0 : index
    %c0_11 = arith.constant 0 : index
    %c0_12 = arith.constant 0 : index
    %10 = vector.load %arg7[%c0_10, %c0_11, %c0_12] : memref<1x16x128xf32, #tpu.memory_space<vmem>>, vector<1x16x128xf32>
    %11 = vector.shape_cast %10 : vector<1x16x128xf32> to vector<16x128xf32>
    %12 = vector.shape_cast %9 : vector<16x128xf32> to vector<1x16x128xf32>
    tpu.vector_store %arg7[%c0_10, %c0_11, %c0_12], %12 {strides = array<i32>} : memref<1x16x128xf32, #tpu.memory_space<vmem>>, vector<1x16x128xf32>,
    return
  }
  func.func @transform_0(%arg0: i32, %arg1: i32) -> (i32, i32) {
    %c0_i32 = arith.constant 0 : i32
    %c0_i32_0 = arith.constant 0 : i32
    return %arg0, %c0_i32 : i32, i32
  }
  func.func @transform_1(%arg0: i32, %arg1: i32) -> (i32, i32) {
    %c0_i32 = arith.constant 0 : i32
    %c0_i32_0 = arith.constant 0 : i32
    return %arg0, %c0_i32 : i32, i32
  }
  func.func @transform_2(%arg0: i32, %arg1: i32) -> (i32, i32) {
    %c0_i32 = arith.constant 0 : i32
    %c0_i32_0 = arith.constant 0 : i32
    return %c0_i32, %arg1 : i32, i32
  }
  func.func @transform_3(%arg0: i32, %arg1: i32) -> (i32, i32) {
    %c0_i32 = arith.constant 0 : i32
    %c0_i32_0 = arith.constant 0 : i32
    return %c0_i32, %arg1 : i32, i32
  }
  func.func @transform_4(%arg0: i32, %arg1: i32) -> (i32, i32) {
    %c0_i32 = arith.constant 0 : i32
    %c0_i32_0 = arith.constant 0 : i32
    return %c0_i32, %arg1 : i32, i32
  }
  func.func @transform_5(%arg0: i32, %arg1: i32) -> (i32, i32, i32) {
    %c0_i32 = arith.constant 0 : i32
    %c0_i32_0 = arith.constant 0 : i32
    return %arg1, %arg0, %c0_i32 : i32, i32, i32
  }
}

module attributes {stable_mosaic.version = 11 : i64} {
  func.func @dual_matmul_bias_kernel(%arg0: i32, %arg1: memref<2x32xbf16, #tpu.memory_space<vmem>>, %arg2: memref<2x32xbf16, #tpu.memory_space<vmem>>, %arg3: memref<32x4xbf16, #tpu.memory_space<vmem>>, %arg4: memref<32x4xbf16, #tpu.memory_space<vmem>>, %arg5: memref<1x4xf32, #tpu.memory_space<vmem>>, %arg6: memref<2x4xf32, #tpu.memory_space<vmem>>) attributes {dimension_semantics = [#tpu.dimension_semantics<arbitrary>], iteration_bounds = array<i64: 1>, scalar_prefetch = 0 : i64, scratch_operands = 0 : i64, tpu.core_type = #tpu.core_type<tc>, window_params = [{pipeline_mode = #tpu.pipeline_mode<synchronous>, transform_indices = @transform_0, window_bounds = array<i64: 2, 32>}, {pipeline_mode = #tpu.pipeline_mode<synchronous>, transform_indices = @transform_1, window_bounds = array<i64: 2, 32>}, {pipeline_mode = #tpu.pipeline_mode<synchronous>, transform_indices = @transform_2, window_bounds = array<i64: 32, 4>}, {pipeline_mode = #tpu.pipeline_mode<synchronous>, transform_indices = @transform_3, window_bounds = array<i64: 32, 4>}, {pipeline_mode = #tpu.pipeline_mode<synchronous>, transform_indices = @transform_4, window_bounds = array<i64: 1, 4>}, {pipeline_mode = #tpu.pipeline_mode<synchronous>, transform_indices = @transform_5, window_bounds = array<i64: 2, 4>}]} {
    %c0 = arith.constant 0 : index
    %c0_0 = arith.constant 0 : index
    %0 = vector.load %arg1[%c0, %c0_0] : memref<2x32xbf16, #tpu.memory_space<vmem>>, vector<2x32xbf16>
    %c0_1 = arith.constant 0 : index
    %c0_2 = arith.constant 0 : index
    %1 = vector.load %arg3[%c0_1, %c0_2] : memref<32x4xbf16, #tpu.memory_space<vmem>>, vector<32x4xbf16>
    %cst = arith.constant dense<0.000000e+00> : vector<2x4xf32>
    %2 = tpu.matmul %0, %1, %cst {dimension_numbers = #tpu.dot_dimension_numbers<[1], [0], [0], [1], [0, 0, 1, 1], [], []>} : vector<2x32xbf16>, vector<32x4xbf16>, vector<2x4xf32> -> vector<2x4xf32>
    %c0_3 = arith.constant 0 : index
    %c0_4 = arith.constant 0 : index
    %3 = vector.load %arg2[%c0_3, %c0_4] : memref<2x32xbf16, #tpu.memory_space<vmem>>, vector<2x32xbf16>
    %c0_5 = arith.constant 0 : index
    %c0_6 = arith.constant 0 : index
    %4 = vector.load %arg4[%c0_5, %c0_6] : memref<32x4xbf16, #tpu.memory_space<vmem>>, vector<32x4xbf16>
    %cst_7 = arith.constant dense<0.000000e+00> : vector<2x4xf32>
    %5 = tpu.matmul %3, %4, %cst_7 {dimension_numbers = #tpu.dot_dimension_numbers<[1], [0], [0], [1], [0, 0, 1, 1], [], []>} : vector<2x32xbf16>, vector<32x4xbf16>, vector<2x4xf32> -> vector<2x4xf32>
    %6 = arith.addf %2, %5 : vector<2x4xf32>
    %c0_8 = arith.constant 0 : index
    %c0_9 = arith.constant 0 : index
    %7 = vector.load %arg5[%c0_8, %c0_9] : memref<1x4xf32, #tpu.memory_space<vmem>>, vector<1x4xf32>
    %8 = vector.broadcast %7 : vector<1x4xf32> to vector<2x4xf32>
    %9 = arith.addf %6, %8 : vector<2x4xf32>
    %c0_10 = arith.constant 0 : index
    %c0_11 = arith.constant 0 : index
    %10 = vector.load %arg6[%c0_10, %c0_11] : memref<2x4xf32, #tpu.memory_space<vmem>>, vector<2x4xf32>
    tpu.vector_store %arg6[%c0_10, %c0_11], %9 {strides = array<i32>} : memref<2x4xf32, #tpu.memory_space<vmem>>, vector<2x4xf32>,
    return
  }
  func.func @transform_0(%arg0: i32) -> (i32, i32) {
    %c0_i32 = arith.constant 0 : i32
    %c0_i32_0 = arith.constant 0 : i32
    %c0_i32_1 = arith.constant 0 : i32
    return %c0_i32, %c0_i32_0 : i32, i32
  }
  func.func @transform_1(%arg0: i32) -> (i32, i32) {
    %c0_i32 = arith.constant 0 : i32
    %c0_i32_0 = arith.constant 0 : i32
    %c0_i32_1 = arith.constant 0 : i32
    return %c0_i32, %c0_i32_0 : i32, i32
  }
  func.func @transform_2(%arg0: i32) -> (i32, i32) {
    %c0_i32 = arith.constant 0 : i32
    %c0_i32_0 = arith.constant 0 : i32
    %c0_i32_1 = arith.constant 0 : i32
    return %c0_i32, %c0_i32_0 : i32, i32
  }
  func.func @transform_3(%arg0: i32) -> (i32, i32) {
    %c0_i32 = arith.constant 0 : i32
    %c0_i32_0 = arith.constant 0 : i32
    %c0_i32_1 = arith.constant 0 : i32
    return %c0_i32, %c0_i32_0 : i32, i32
  }
  func.func @transform_4(%arg0: i32) -> (i32, i32) {
    %c0_i32 = arith.constant 0 : i32
    %c0_i32_0 = arith.constant 0 : i32
    %c0_i32_1 = arith.constant 0 : i32
    return %c0_i32, %c0_i32_0 : i32, i32
  }
  func.func @transform_5(%arg0: i32) -> (i32, i32) {
    %c0_i32 = arith.constant 0 : i32
    %c0_i32_0 = arith.constant 0 : i32
    %c0_i32_1 = arith.constant 0 : i32
    return %c0_i32, %c0_i32_0 : i32, i32
  }
}

</mosaic_0001>

<bundles_post_ra>
// kernel: lstm_model_forward.5
= control target key start
LH: loop header
LB: loop body
LE: loop exit
PB: predicated region body
PF: predicated region fallthrough
CT: control target
= control target key end

     0   :  { %s554_s12 = smov 0   ;;  %s556_s13 = smov 0   ;;  %s626_s0 = inlined_call_operand.vmem [shape: bf16[16,16], index: 0, kind: input, shape index: {}]   ;;  %s627_s1 = inlined_call_operand.vmem [shape: bf16[16,256], index: 1, kind: input, shape index: {}]   ;;  %s628_s2 = inlined_call_operand.vmem [shape: f32[1,256], index: 2, kind: input, shape index: {}]   ;;  %s629_s3 = inlined_call_operand.vmem [shape: f32[2,16,128], index: 3, kind: output, shape index: {}]  }
   0x1   :  { %s558_s14 = smov 0   ;;  %s560_s15 = smov 0  }
   0x2   :  { %s562_s16 = smov 0  }
   0x3 LB: > { %s22_s17 = sadd.s32 1, %s528_s15  ;;  %p65_p1 = scmp.ne.s32.totalorder %s520_s13, %s516_s12  ;;  %s532_s16 = sphi %s562_s16, %s13_s16   ;;  %s528_s15 = sphi %s560_s15, %s633_s15   ;;  %s524_s14 = sphi %s558_s14, %s632_s14   ;;  %s520_s13 = sphi %s556_s13, %s631_s13   ;;  %s516_s12 = sphi %s554_s12, %s630_s12  }
   0x4   : > { %p23_p0 = scmp.ge.s32.totalorder %s22_s17, 2  ;;  %p66_p2 = scmp.eq.s32.totalorder %s532_s16, 0 }
   0x5   : > { %s58_s19 = sadd.s32 1, %s520_s13  ;;  %p432_p5 = scmp.ge.s32.totalorder %s532_s16, 2 }
   0x6   : > { %s635_s17 = smov (%p23_p0, %s22_s17), 0  ;;  %p67_p3 = por %p66_p2, %p65_p1 }
   0x7   : > { %s55_s18 = ssub.s32 %s528_s15, %s635_s17  ;;  %154 = sbr.rel (%p432_p5) target bundleno = 18 (0x12), region = 20 }
   0x8   : > { %p56_p4 = scmp.eq.s32.totalorder %s55_s18, 0 }
   0xa   : > { %s589_s20 = scalar_select %p56_p4, %s520_s13, %s58_s19  }
   0xc   : > { %157 = sbr.rel (!%p67_p3) target bundleno = 18 (0x12), region = 24  ;;  %s159_s21 = sand.u32 (%p67_p3), 1, %s520_s13  }
   0xd   : > { %s434_s22 = sshll.u32 (%p67_p3), %s528_s15, 2  ;;  %s433_s23 = sshll.u32 (%p67_p3), %s159_s21, 3 }
   0xe   : > { %s163_s26 = scalar_lea.vmem (%p67_p3), %s627_s1, %s434_s22  ;;  %s161_s27 = scalar_lea.vmem (%p67_p3), [#allocation2], %s433_s23 }
   0xf   : > { %v180_v0 = vld [vmem:[%s163_s26] sm:$0xf] (%p67_p3)  ;;  %v182_v1 = vld [vmem:[%s163_s26 + $0x8] sm:$0xf] (%p67_p3) }
  0x10   : > { %181 = vst [vmem:[%s161_s27] sm:$0xf] (%p67_p3), %v180_v0 }
  0x11   : > { %183 = vst [vmem:[%s161_s27 + $0x4] sm:$0xf] %v182_v1 }
  0x12 PF: > { %p435_p6 = scmp.ge.s32.totalorder %s532_s16, 1  ;;  %p216_p7 = scmp.lt.s32.totalorder %s532_s16, 3 }
  0x14   : > { %p217_p8 = pnand %p435_p6, %p216_p7 }
  0x15   : > { %s223_s28 = sand.u32 (!%p217_p8), 1, %s516_s12   ;;  %p264_p9 = scmp.lt.s32.totalorder (!%p217_p8), %s524_s14, 1 }
  0x16   : > { %220 = sbr.rel (%p217_p8) target bundleno = 168 (0xa8), region = 69  ;;  %s436_s29 = sshll.u32 (!%p217_p8), %s223_s28, 3 }
  0x17   : > { %s225_s30 = scalar_lea.vmem (!%p217_p8), [#allocation2], %s436_s29 }
  0x1b   : > { %v452_v2 = vld [vmem:[%s225_s30] sm:$0xff]  ;;  %s637_s14 = smov (!%p264_p9, %s524_s14), 1  ;;  %vm297_vm0 = vcmask 130048  }
  0x1c   : > { %v451_v3 = vld [vmem:[%s626_s0] sm:$0xff]  ;;  %308 = vmatpush.bf16.msra.mxu0 %v452_v2  ;;  %s266_s8 = scalar_lea.vmem %s628_s2, %s637_s14  ;;  %s450_s9 = sshll.u32 %s637_s14, 4 }
  0x1d   : > { %v493_v4 = vld [vmem:[%s266_s8] ss:$0 sm:$0xff]  ;;  %s275_s12 = scalar_lea.vmem %s629_s3, %s450_s9 }
  0x1f   : > { %447 = vmatmul.msk.bf16.vlgmr.msra.gmra.mxu0 %vm297_vm0, %v451_v3 }
  0x9c   : > { %v310_v5 = vpop.f32.mrf.mxu0 }
  0x9d   : > { %v311_v6 = vadd.f32 %v493_v4, %v310_v5 }
  0x9f   : > { %315 = vst [vmem:[%s275_s12] sm:$0xff] %v311_v6 }
  0xa4   : > { %v312_v7 = vpop.f32.mrf.mxu0 }
  0xa5   : > { %v313_v8 = vadd.f32 %v493_v4, %v312_v7 }
  0xa7   : > { %316 = vst [vmem:[%s275_s12 + $0x8] sm:$0xff] %v313_v8 }
  0xa8 PF: > { %s13_s16 = sadd.s32 1, %s532_s16   ;;  %s630_s12 = smov %s520_s13 }
  0xa9   : > { %p10_p10 = scmp.ge.s32.totalorder %s13_s16, 4   ;;  %s631_s13 = smov %s589_s20 }
  0xaa   : > { %s632_s14 = smov %s528_s15  ;;  %s633_s15 = smov %s635_s17 }
  0xab   :  { %12 = sbr.rel (!%p10_p10) target bundleno = 3 (0x3), region = 114 }

// kernel: lstm_model_forward.7
= control target key start
LH: loop header
LB: loop body
LE: loop exit
PB: predicated region body
PF: predicated region fallthrough
CT: control target
= control target key end

     0   :  { %s831_s18 = smov 0   ;;  %s833_s19 = smov 0   ;;  %s919_s0 = inlined_call_operand.vmem [shape: bf16[16,32], index: 0, kind: input, shape index: {}]   ;;  %s920_s1 = inlined_call_operand.vmem [shape: bf16[16,32], index: 1, kind: input, shape index: {}]   ;;  %s921_s2 = inlined_call_operand.vmem [shape: bf16[32,256], index: 2, kind: input, shape index: {}]   ;;  %s922_s3 = inlined_call_operand.vmem [shape: bf16[32,256], index: 3, kind: input, shape index: {}]   ;;  %s923_s4 = inlined_call_operand.vmem [shape: f32[1,256], index: 4, kind: input, shape index: {}]   ;;  %s924_s5 = inlined_call_operand.vmem [shape: f32[2,16,128], index: 5, kind: output, shape index: {}]  }
   0x1   :  { %s835_s20 = smov 0   ;;  %s837_s21 = smov 0  }
   0x2   :  { %s839_s22 = smov 0  }
   0x3 LB: > { %s24_s23 = sadd.s32 1, %s795_s21  ;;  %p93_p1 = scmp.ne.s32.totalorder %s787_s19, %s783_s18  ;;  %s799_s22 = sphi %s839_s22, %s15_s22   ;;  %s795_s21 = sphi %s837_s21, %s929_s21   ;;  %s791_s20 = sphi %s835_s20, %s928_s20   ;;  %s787_s19 = sphi %s833_s19, %s927_s19   ;;  %s783_s18 = sphi %s831_s18, %s926_s18  }
   0x4   : > { %p25_p0 = scmp.ge.s32.totalorder %s24_s23, 2  ;;  %p94_p2 = scmp.eq.s32.totalorder %s799_s22, 0 }
   0x5   : > { %s86_s26 = sadd.s32 1, %s787_s19  ;;  %p675_p5 = scmp.ge.s32.totalorder %s799_s22, 2 }
   0x6   : > { %s931_s23 = smov (%p25_p0, %s24_s23), 0  ;;  %p862_p3 = por %p94_p2, %p93_p1 }
   0x7   : > { %s83_s25 = ssub.s32 %s795_s21, %s931_s23  ;;  %217 = sbr.rel (%p675_p5) target bundleno = 28 (0x1c), region = 24 }
   0x8   : > { %p84_p4 = scmp.eq.s32.totalorder %s83_s25, 0 }
   0xa   : > { %s870_s27 = scalar_select %p84_p4, %s787_s19, %s86_s26  }
   0xc   : > { %220 = sbr.rel (!%p862_p3) target bundleno = 20 (0x14), region = 28  ;;  %s222_s28 = sand.u32 (%p862_p3), 1, %s787_s19  }
   0xd   : > { %s677_s29 = sshll.u32 (%p862_p3), %s795_s21, 2  ;;  %s676_s30 = sshll.u32 (%p862_p3), %s222_s28, 4 }
   0xe   : > { %s226_s8 = scalar_lea.vmem (%p862_p3), %s921_s2, %s677_s29  ;;  %s224_s9 = scalar_lea.vmem (%p862_p3), [#allocation2], %s676_s30 }
   0xf   : > { %v243_v0 = vld [vmem:[%s226_s8] sm:$0xf] (%p862_p3)  ;;  %v245_v1 = vld [vmem:[%s226_s8 + $0x8] sm:$0xf] (%p862_p3)  ;;  %v247_v2 = vld [vmem:[%s226_s8 + $0x10] sm:$0xf] (%p862_p3) }
  0x10   : > { %244 = vst [vmem:[%s224_s9] sm:$0xf] (%p862_p3), %v243_v0  ;;  %v249_v3 = vld [vmem:[%s226_s8 + $0x18] sm:$0xf] (%p862_p3) }
  0x11   : > { %246 = vst [vmem:[%s224_s9 + $0x4] sm:$0xf] %v245_v1 }
  0x12   : > { %248 = vst [vmem:[%s224_s9 + $0x8] sm:$0xf] %v247_v2 }
  0x13   : > { %250 = vst [vmem:[%s224_s9 + $0xc] sm:$0xf] %v249_v3 }
  0x14 PF: > { %282 = sbr.rel (!%p862_p3) target bundleno = 28 (0x1c), region = 69  ;;  %s284_s10 = sand.u32 (%p862_p3), 1, %s787_s19  }
  0x15   : > { %s679_s11 = sshll.u32 (%p862_p3), %s795_s21, 2  ;;  %s678_s12 = sshll.u32 (%p862_p3), %s284_s10, 4 }
  0x16   : > { %s288_s15 = scalar_lea.vmem (%p862_p3), %s922_s3, %s679_s11  ;;  %s286_s16 = scalar_lea.vmem (%p862_p3), [#allocation3], %s678_s12 }
  0x17   : > { %v305_v4 = vld [vmem:[%s288_s15] sm:$0xf] (%p862_p3)  ;;  %v307_v5 = vld [vmem:[%s288_s15 + $0x8] sm:$0xf] (%p862_p3)  ;;  %v309_v6 = vld [vmem:[%s288_s15 + $0x10] sm:$0xf] (%p862_p3) }
  0x18   : > { %306 = vst [vmem:[%s286_s16] sm:$0xf] (%p862_p3), %v305_v4  ;;  %v311_v7 = vld [vmem:[%s288_s15 + $0x18] sm:$0xf] (%p862_p3) }
  0x19   : > { %308 = vst [vmem:[%s286_s16 + $0x4] sm:$0xf] %v307_v5 }
  0x1a   : > { %310 = vst [vmem:[%s286_s16 + $0x8] sm:$0xf] %v309_v6 }
  0x1b   : > { %312 = vst [vmem:[%s286_s16 + $0xc] sm:$0xf] %v311_v7 }
  0x1c PF: > { %p680_p6 = scmp.ge.s32.totalorder %s799_s22, 1  ;;  %p349_p7 = scmp.lt.s32.totalorder %s799_s22, 3 }
  0x1e   : > { %p350_p8 = pnand %p680_p6, %p349_p7 }
  0x1f   : > { %s356_s17 = sand.u32 (!%p350_p8), 1, %s783_s18   ;;  %p423_p9 = scmp.lt.s32.totalorder (!%p350_p8), %s791_s20, 1 }
  0x20   : > { %353 = sbr.rel (%p350_p8) target bundleno = 185 (0xb9), region = 114  ;;  %s681_s24 = sshll.u32 (!%p350_p8), %s356_s17, 4 }
  0x21   : > { %s365_s25 = scalar_lea.vmem (!%p350_p8), [#allocation3], %s681_s24  ;;  %s358_s26 = scalar_lea.vmem (!%p350_p8), [#allocation2], %s681_s24 }
  0x25   : > { %v719_v8 = vld [vmem:[%s365_s25 + $0x8] sm:$0xff]  ;;  %v718_v10 = vld [vmem:[%s365_s25] sm:$0xff]  ;;  %s933_s20 = smov (!%p423_p9, %s791_s20), 1  ;;  %vm466_vm0 = vcmask 261120  }
  0x26   : > { %v716_v9 = vld [vmem:[%s358_s26 + $0x8] sm:$0xff]  ;;  %476 = vmatpush.bf16.msra.mxu0 %v719_v8  ;;  %v715_v11 = vld [vmem:[%s358_s26] sm:$0xff]  ;;  %s425_s8 = scalar_lea.vmem %s923_s4, %s933_s20  ;;  %s713_s9 = sshll.u32 %s933_s20, 4 }
  0x27   : > { %510 = vmatpush.bf16.msra.mxu1 %v716_v9  ;;  %v717_v12 = vld [vmem:[%s920_s1] sm:$0xff]  ;;  %s434_s12 = scalar_lea.vmem %s924_s5, %s713_s9 }
  0x28   : > { %v714_v13 = vld [vmem:[%s919_s0] sm:$0xff] }
  0x29   : > { %v760_v14 = vld [vmem:[%s425_s8] ss:$0 sm:$0xff] }
  0x2a   : > { %477 = vmatpush.bf16.msra.mxu0 %v718_v10 }
  0x2b   : > { %511 = vmatpush.bf16.msra.mxu1 %v715_v11 }
  0x2d   : > { %697 = vmatmul.msk.bf16.vlgmr.msra.gmra.mxu0 %vm466_vm0, %v717_v12 }
  0x2e   : > { %710 = vmatmul.msk.bf16.vlgmr.msra.gmra.mxu1 %vm466_vm0, %v714_v13 }
  0xaa   : > { %v479_v15 = vpop.f32.mrf.mxu0 }
  0xab   : > { %v513_v16 = vpop.f32.mrf.mxu1 }
  0xac   : > { %v514_v17 = vadd.f32 %v513_v16, %v479_v15 }
  0xae   : > { %v522_v18 = vadd.f32 %v760_v14, %v514_v17 }
  0xb0   : > { %524 = vst [vmem:[%s434_s12] sm:$0xff] %v522_v18 }
  0xb2   : > { %v481_v19 = vpop.f32.mrf.mxu0 }
  0xb3   : > { %v515_v20 = vpop.f32.mrf.mxu1 }
  0xb4   : > { %v516_v21 = vadd.f32 %v515_v20, %v481_v19 }
  0xb6   : > { %v523_v22 = vadd.f32 %v760_v14, %v516_v21 }
  0xb8   : > { %525 = vst [vmem:[%s434_s12 + $0x8] sm:$0xff] %v523_v22 }
  0xb9 PF: > { %s15_s22 = sadd.s32 1, %s799_s22   ;;  %s926_s18 = smov %s787_s19 }
  0xba   : > { %p12_p10 = scmp.ge.s32.totalorder %s15_s22, 4   ;;  %s927_s19 = smov %s870_s27 }
  0xbb   : > { %s928_s20 = smov %s795_s21  ;;  %s929_s21 = smov %s931_s23 }
  0xbc   :  { %14 = sbr.rel (!%p12_p10) target bundleno = 3 (0x3), region = 174 }

// kernel: lstm_model_forward.8
= control target key start
LH: loop header
LB: loop body
LE: loop exit
PB: predicated region body
PF: predicated region fallthrough
CT: control target
= control target key end

     0   :  { %s1057_s9 = smov 0   ;;  %s1059_s10 = smov 0   ;;  %s1165_s0 = inlined_call_operand.vmem [shape: f32[2,8,2,128], index: 0, kind: input, shape index: {}]   ;;  %s1166_s1 = inlined_call_operand.vmem [shape: bf16[2,32,128], index: 1, kind: input, shape index: {}]   ;;  %s1167_s2 = inlined_call_operand.vmem [shape: bf16[2,2,32], index: 2, kind: output, shape index: {}]  }
   0x1   :  { %s1061_s11 = smov 0  }
   0x2 LB: > { %s24_s12 = sadd.s32 1, %s1032_s10  ;;  %p873_p0 = scmp.ge.s32.totalorder %s1036_s11, 1  ;;  %s1036_s11 = sphi %s1061_s11, %s12_s11   ;;  %s1032_s10 = sphi %s1059_s10, %s1169_s10   ;;  %s1028_s9 = sphi %s1057_s9, %s1168_s9  }
   0x3   : > { %p26_p1 = scmp.ge.s32.totalorder %s24_s12, 2  ;;  %p157_p2 = scmp.lt.s32.totalorder %s1036_s11, 3 }
   0x5   : > { %s1171_s12 = smov (%p26_p1, %s24_s12), 0  ;;  %p158_p3 = pnand %p873_p0, %p157_p2 }
   0x6   : > { %p195_p4 = scmp.lt.s32.totalorder (!%p158_p3), %s1028_s9, 1  ;;  %s878_s18 = smul.u32 (!%p158_p3), 14, %s1028_s9 }
   0x7   : > { %161 = sbr.rel (%p158_p3) target bundleno = 4692 (0x1254), region = 28  ;;  %s1039_s23 = smov (!%p158_p3), 64  }
   0x8   : > { %s1040_s24 = smov (!%p158_p3), 32   ;;  %s889_s25 = smul.u32 (!%p158_p3), 10, %s1028_s9 }
   0x9   : > { %s893_s27 = smul.u32 (!%p158_p3), 6, %s1028_s9  ;;  %s897_s29 = sshll.u32 (!%p158_p3), %s1028_s9, 1 }
   0xa   : > { %s494_s3 = ssub.s32 (!%p158_p3), 4, %s1028_s9  ;;  %s904_s6 = smul.u32 (!%p158_p3), 4294967290, %s1028_s9 }
   0xb   : > { %s901_s4 = sshll.u32 (!%p158_p3), %s494_s3, 1  ;;  %s908_s8 = smul.u32 (!%p158_p3), 4294967286, %s1028_s9 }
   0xc   : > { %vm221_vm0 = vcmask 254976   ;;  %v1038_v0 = vmov 0.0   ;;  %s1080_s13 = scalar_select %p195_p4, %s1028_s9, 1  ;;  %vm247_vm1 = vcmask 261120  }
   0xd   : > { %222 = vst.msk [vmem:[#allocation2] sm:$0x3] %vm221_vm0, %v1038_v0  ;;  %s912_s15 = smul.u32 4294967282, %s1028_s9  ;;  %s1041_s9 = smov 96  }
   0xe   : > { %223 = vst.msk [vmem:[#allocation3] sm:$0x3] %vm221_vm0, %v1038_v0  ;;  %s918_s14 = sshll.u32 %s1080_s13, 4  ;;  %s215_s19 = scalar_lea.vmem %s1167_s2, %s1080_s13 }
   0xf   : > { %s212_s17 = scalar_lea.vmem %s1166_s1, %s918_s14  ;;  %s1092_s21 = scalar_lea.vmem %s1165_s0, %s918_s14 }
  0x10   : > { %v921_v1 = vld [vmem:[%s212_s17 + $0x8] sm:$0xff]  ;;  %v920_v2 = vld [vmem:[%s212_s17] sm:$0xff]  ;;  %s232_s22 = scalar_lea.vmem %s1092_s21, %s878_s18  ;;  %s810_s26 = scalar_lea.vmem %s1092_s21, %s889_s25 }
  0x11   : > { %257 = vmatpush.bf16.msra.mxu0 %v921_v1  ;;  %324 = vmatpush.bf16.msra.mxu1 %v921_v1  ;;  %v233_v5 = vld [vmem:[%s232_s22] sm:$0x3]  ;;  %v890_v35 = vld [vmem:[%s810_s26 + $0x2] sm:$0x3]  ;;  %s814_s28 = scalar_lea.vmem %s1092_s21, %s893_s27  ;;  %s817_s30 = scalar_lea.vmem %s1092_s21, %s897_s29 }
  0x12   : > { %387 = vmatpush.bf16.msra.mxu2 %v921_v1  ;;  %449 = vmatpush.bf16.msra.mxu3 %v921_v1  ;;  %v894_v63 = vld [vmem:[%s814_s28 + $0x4] sm:$0x3]  ;;  %s496_s5 = scalar_lea.vmem %s1092_s21, %s901_s4  ;;  %s823_s7 = scalar_lea.vmem %s1092_s21, %s904_s6 }
  0x13   : > { %s827_s14 = scalar_lea.vmem %s1092_s21, %s908_s8  ;;  %s831_s16 = scalar_lea.vmem %s1092_s21, %s912_s15 }
  0x14   : > { %v228_v3 = vld [vmem:[#allocation2] sm:$0x3] }
  0x15   : > { %v234_v4 = vpack.c.bf16 %v228_v3, %v228_v3  ;;  %258 = vmatpush.bf16.msra.mxu0 %v920_v2  ;;  %325 = vmatpush.bf16.msra.mxu1 %v920_v2  ;;  %v229_v10 = vld [vmem:[#allocation3] sm:$0x3] }
  0x16   : > { %388 = vmatpush.bf16.msra.mxu2 %v920_v2  ;;  %450 = vmatpush.bf16.msra.mxu3 %v920_v2 }
  0x18   : > { %887 = vmatmul.msk.bf16.vlgmr.msra.gmra.mxu0 %vm247_vm1, %v234_v4 }
  0x19   : > { %511 = vmatpush.bf16.msrb.mxu0 %v921_v1  ;;  %574 = vmatpush.bf16.msrb.mxu1 %v921_v1 }
  0x1a   : > { %637 = vmatpush.bf16.msrb.mxu2 %v921_v1  ;;  %700 = vmatpush.bf16.msrb.mxu3 %v921_v1 }
  0x1d   : > { %512 = vmatpush.bf16.msrb.mxu0 %v920_v2  ;;  %575 = vmatpush.bf16.msrb.mxu1 %v920_v2 }
  0x1e   : > { %638 = vmatpush.bf16.msrb.mxu2 %v920_v2  ;;  %701 = vmatpush.bf16.msrb.mxu3 %v920_v2 }
  0x95   : > { %v260_v6 = vpop.f32.mrf.mxu0 }
  0x96   : > { %v264_v7 = vadd.f32 %v260_v6, %v233_v5 }
  0x98   : > { %950 = vtanh.f32 %v264_v7  ;;  %v888_v11 = vmul.f32 -1.442695, %v264_v7 }
  0x9a   : > { %952 = vpow2.f32 %v888_v11 }
  0x9d   : > { %v262_v8 = vpop.f32.mrf.mxu0 }
  0x9e   : > { %v951_v9 = vpop.eup %950 }
  0x9f   : > { %291 = vrot.lane.b32.xlu0 %v951_v9, %s1039_s23 }
  0xa0   : > { %v953_v12 = vpop.eup %952 }
  0xa1   : > { %v268_v13 = vadd.f32 1.0, %v953_v12 }
  0xa3   : > { %954 = vrcp.f32 %v268_v13  ;;  %v280_v19 = vand.u32 2147483648, %v268_v13  ;;  %vm274_vm3 = vweird.f32 %v268_v13  ;;  %v278_v20 = vand.u32 2147483647, %v268_v13 }
  0xa5   : > { %v281_v22 = vor.u32 1.1754944e-38, %v280_v19  ;;  %vm279_vm5 = vcmp.eq.f32.partialorder %v278_v20, 8.507059e+37 }
  0xa7   : > { %286 = vrot.lane.b32.xlu0 %v229_v10, %s1040_s24 }
  0xa9   : > { %v955_v14 = vpop.eup %954 }
  0xaa   : > { %v270_v15 = vmul.f32 %v955_v14, %v268_v13  ;;  %vm275_vm2 = vweird.f32 %v955_v14 }
  0xab   : > { %vm276_vm4 = vmor %vm274_vm3, %vm275_vm2 }
  0xac   : > { %v271_v16 = vsub.f32 1.0, %v270_v15 }
  0xae   : > { %v272_v17 = vmul.f32 %v955_v14, %v271_v16 }
  0xb0   : > { %v273_v18 = vadd.f32 %v955_v14, %v272_v17 }
  0xb2   : > { %v277_v21 = vsel %vm276_vm4, %v955_v14, %v273_v18 }
  0xb3   : > { %v282_v24 = vsel %vm279_vm5, %v281_v22, %v277_v21 }
 0x111   : > { %v292_v23 = vpop.permute.xlu0 %291 }
 0x112   : > { %v294_v25 = vmul.f32 %v292_v23, %v282_v24 }
 0x114   : > { %296 = vrot.lane.b32.xlu1 %v294_v25, %s1040_s24 }
 0x119   : > { %v287_v26 = vpop.permute.xlu0 %286 }
 0x11a   : > { %v289_v27 = vmul.f32 %v287_v26, %v282_v24 }
 0x186   : > { %v297_v28 = vpop.permute.xlu1 %296 }
 0x187   : > { %v299_v29 = vadd.f32 %v297_v28, %v289_v27  ;;  %v898_v27 = vld [vmem:[%s817_s30 + $0x6] sm:$0x3] }
 0x189   : > { %956 = vtanh.f32 %v299_v29 }
 0x18f   : > { %v957_v30 = vpop.eup %956 }
 0x190   : > { %302 = vrot.lane.b32.xlu1 %v957_v30, %s1039_s23 }
 0x202   : > { %v303_v31 = vpop.permute.xlu1 %302 }
 0x203   : > { %v305_v32 = vmul.f32 %v303_v31, %v282_v24 }
 0x205   : > { %v311_v33 = vpack.c.bf16 %v305_v32, %v305_v32 }
 0x207   : > { %313 = vrot.lane.b32.xlu2 %v311_v33, %s1040_s24 }
 0x261   : > { %v314_v34 = vpop.permute.xlu2 %313 }
 0x262   : > { %891 = vmatmul.msk.bf16.vlgmr.msra.gmra.mxu1 %vm247_vm1, %v314_v34 }
 0x2df   : > { %v327_v36 = vpop.f32.mrf.mxu1 }
 0x2e0   : > { %v331_v37 = vadd.f32 %v890_v35, %v327_v36 }
 0x2e2   : > { %958 = vtanh.f32 %v331_v37  ;;  %v892_v40 = vmul.f32 -1.442695, %v331_v37 }
 0x2e4   : > { %960 = vpow2.f32 %v892_v40 }
 0x2e7   : > { %v329_v38 = vpop.f32.mrf.mxu1 }
 0x2e8   : > { %v959_v39 = vpop.eup %958 }
 0x2e9   : > { %354 = vrot.lane.b32.xlu2 %v959_v39, %s1039_s23 }
 0x2ea   : > { %v961_v41 = vpop.eup %960 }
 0x2eb   : > { %v335_v42 = vadd.f32 1.0, %v961_v41 }
 0x2ed   : > { %962 = vrcp.f32 %v335_v42  ;;  %v347_v48 = vand.u32 2147483648, %v335_v42  ;;  %vm341_vm7 = vweird.f32 %v335_v42  ;;  %v345_v49 = vand.u32 2147483647, %v335_v42 }
 0x2ef   : > { %v348_v51 = vor.u32 1.1754944e-38, %v347_v48  ;;  %vm346_vm9 = vcmp.eq.f32.partialorder %v345_v49, 8.507059e+37 }
 0x2f3   : > { %v963_v43 = vpop.eup %962 }
 0x2f4   : > { %v337_v44 = vmul.f32 %v963_v43, %v335_v42  ;;  %vm342_vm6 = vweird.f32 %v963_v43 }
 0x2f5   : > { %vm343_vm8 = vmor %vm341_vm7, %vm342_vm6 }
 0x2f6   : > { %v338_v45 = vsub.f32 1.0, %v337_v44 }
 0x2f8   : > { %v339_v46 = vmul.f32 %v963_v43, %v338_v45 }
 0x2fa   : > { %v340_v47 = vadd.f32 %v963_v43, %v339_v46 }
 0x2fc   : > { %v344_v50 = vsel %vm343_vm8, %v963_v43, %v340_v47 }
 0x2fd   : > { %v349_v53 = vsel %vm346_vm9, %v348_v51, %v344_v50 }
 0x2fe   : > { %v352_v55 = vmul.f32 %v349_v53, %v299_v29 }
 0x343   : > { %v355_v52 = vpop.permute.xlu2 %354 }
 0x344   : > { %v357_v54 = vmul.f32 %v355_v52, %v349_v53 }
 0x346   : > { %359 = vrot.lane.b32.xlu0 %v357_v54, %s1040_s24 }
 0x3b8   : > { %v360_v56 = vpop.permute.xlu0 %359 }
 0x3b9   : > { %v362_v57 = vadd.f32 %v360_v56, %v352_v55  ;;  %v497_v55 = vld [vmem:[%s496_s5] sm:$0x3] }
 0x3bb   : > { %964 = vtanh.f32 %v362_v57 }
 0x3c1   : > { %v965_v58 = vpop.eup %964 }
 0x3c2   : > { %365 = vrot.lane.b32.xlu1 %v965_v58, %s1039_s23 }
 0x434   : > { %v366_v59 = vpop.permute.xlu1 %365 }
 0x435   : > { %v368_v60 = vmul.f32 %v366_v59, %v349_v53 }
 0x437   : > { %v374_v61 = vpack.c.bf16 %v368_v60, %v368_v60 }
 0x439   : > { %376 = vrot.lane.b32.xlu2 %v374_v61, %s1040_s24 }
 0x493   : > { %v377_v62 = vpop.permute.xlu2 %376 }
 0x494   : > { %895 = vmatmul.msk.bf16.vlgmr.msra.gmra.mxu2 %vm247_vm1, %v377_v62 }
 0x517   : > { %v390_v0 = vpop.f32.mrf.mxu2 }
 0x518   : > { %v394_v1 = vadd.f32 %v894_v63, %v390_v0 }
 0x51a   : > { %966 = vtanh.f32 %v394_v1  ;;  %v896_v4 = vmul.f32 -1.442695, %v394_v1 }
 0x51c   : > { %968 = vpow2.f32 %v896_v4 }
 0x51f   : > { %v392_v2 = vpop.f32.mrf.mxu2 }
 0x520   : > { %v967_v3 = vpop.eup %966 }
 0x521   : > { %417 = vrot.lane.b32.xlu0 %v967_v3, %s1039_s23 }
 0x522   : > { %v969_v5 = vpop.eup %968 }
 0x523   : > { %v398_v6 = vadd.f32 1.0, %v969_v5 }
 0x525   : > { %970 = vrcp.f32 %v398_v6  ;;  %v410_v12 = vand.u32 2147483648, %v398_v6  ;;  %vm404_vm11 = vweird.f32 %v398_v6  ;;  %v408_v13 = vand.u32 2147483647, %v398_v6 }
 0x527   : > { %v411_v15 = vor.u32 1.1754944e-38, %v410_v12  ;;  %vm409_vm13 = vcmp.eq.f32.partialorder %v408_v13, 8.507059e+37 }
 0x52b   : > { %v971_v7 = vpop.eup %970 }
 0x52c   : > { %v400_v8 = vmul.f32 %v971_v7, %v398_v6  ;;  %vm405_vm10 = vweird.f32 %v971_v7 }
 0x52d   : > { %vm406_vm12 = vmor %vm404_vm11, %vm405_vm10 }
 0x52e   : > { %v401_v9 = vsub.f32 1.0, %v400_v8 }
 0x530   : > { %v402_v10 = vmul.f32 %v971_v7, %v401_v9 }
 0x532   : > { %v403_v11 = vadd.f32 %v971_v7, %v402_v10 }
 0x534   : > { %v407_v14 = vsel %vm406_vm12, %v971_v7, %v403_v11 }
 0x535   : > { %v412_v17 = vsel %vm409_vm13, %v411_v15, %v407_v14 }
 0x536   : > { %v415_v19 = vmul.f32 %v412_v17, %v362_v57 }
 0x593   : > { %v418_v16 = vpop.permute.xlu0 %417 }
 0x594   : > { %v420_v18 = vmul.f32 %v418_v16, %v412_v17 }
 0x596   : > { %422 = vrot.lane.b32.xlu1 %v420_v18, %s1040_s24 }
 0x608   : > { %v423_v20 = vpop.permute.xlu1 %422 }
 0x609   : > { %v425_v21 = vadd.f32 %v423_v20, %v415_v19  ;;  %v905_v19 = vld [vmem:[%s823_s7 + $0xa] sm:$0x3] }
 0x60b   : > { %972 = vtanh.f32 %v425_v21 }
 0x611   : > { %v973_v22 = vpop.eup %972 }
 0x612   : > { %428 = vrot.lane.b32.xlu2 %v973_v22, %s1039_s23 }
 0x66c   : > { %v429_v23 = vpop.permute.xlu2 %428 }
 0x66d   : > { %v431_v24 = vmul.f32 %v429_v23, %v412_v17 }
 0x66f   : > { %v436_v25 = vpack.c.bf16 %v431_v24, %v431_v24 }
 0x671   : > { %438 = vrot.lane.b32.xlu0 %v436_v25, %s1040_s24 }
 0x6e3   : > { %v439_v26 = vpop.permute.xlu0 %438 }
 0x6e4   : > { %899 = vmatmul.msk.bf16.vlgmr.msra.gmra.mxu3 %vm247_vm1, %v439_v26 }
 0x767   : > { %v452_v28 = vpop.f32.mrf.mxu3 }
 0x768   : > { %v456_v29 = vadd.f32 %v898_v27, %v452_v28 }
 0x76a   : > { %974 = vtanh.f32 %v456_v29  ;;  %v900_v32 = vmul.f32 -1.442695, %v456_v29 }
 0x76c   : > { %976 = vpow2.f32 %v900_v32 }
 0x76f   : > { %v454_v30 = vpop.f32.mrf.mxu3 }
 0x770   : > { %v975_v31 = vpop.eup %974 }
 0x771   : > { %479 = vrot.lane.b32.xlu1 %v975_v31, %s1039_s23 }
 0x772   : > { %v977_v33 = vpop.eup %976 }
 0x773   : > { %v460_v34 = vadd.f32 1.0, %v977_v33 }
 0x775   : > { %978 = vrcp.f32 %v460_v34  ;;  %v472_v40 = vand.u32 2147483648, %v460_v34  ;;  %vm466_vm15 = vweird.f32 %v460_v34  ;;  %v470_v41 = vand.u32 2147483647, %v460_v34 }
 0x777   : > { %v473_v43 = vor.u32 1.1754944e-38, %v472_v40  ;;  %vm471_vm3 = vcmp.eq.f32.partialorder %v470_v41, 8.507059e+37 }
 0x77b   : > { %v979_v35 = vpop.eup %978 }
 0x77c   : > { %v462_v36 = vmul.f32 %v979_v35, %v460_v34  ;;  %vm467_vm14 = vweird.f32 %v979_v35 }
 0x77d   : > { %vm468_vm2 = vmor %vm466_vm15, %vm467_vm14 }
 0x77e   : > { %v463_v37 = vsub.f32 1.0, %v462_v36 }
 0x780   : > { %v464_v38 = vmul.f32 %v979_v35, %v463_v37 }
 0x782   : > { %v465_v39 = vadd.f32 %v979_v35, %v464_v38 }
 0x784   : > { %v469_v42 = vsel %vm468_vm2, %v979_v35, %v465_v39 }
 0x785   : > { %v474_v45 = vsel %vm471_vm3, %v473_v43, %v469_v42 }
 0x786   : > { %v477_v47 = vmul.f32 %v474_v45, %v425_v21 }
 0x7e3   : > { %v480_v44 = vpop.permute.xlu1 %479 }
 0x7e4   : > { %v482_v46 = vmul.f32 %v480_v44, %v474_v45 }
 0x7e6   : > { %484 = vrot.lane.b32.xlu2 %v482_v46, %s1040_s24 }
 0x840   : > { %v485_v48 = vpop.permute.xlu2 %484 }
 0x841   : > { %v487_v49 = vadd.f32 %v485_v48, %v477_v47  ;;  %v909_v47 = vld [vmem:[%s827_s14 + $0xc] sm:$0x3] }
 0x843   : > { %980 = vtanh.f32 %v487_v49 }
 0x849   : > { %v981_v50 = vpop.eup %980 }
 0x84a   : > { %490 = vrot.lane.b32.xlu0 %v981_v50, %s1039_s23 }
 0x8bc   : > { %v491_v51 = vpop.permute.xlu0 %490 }
 0x8bd   : > { %v493_v52 = vmul.f32 %v491_v51, %v474_v45 }
 0x8bf   : > { %v498_v53 = vpack.c.bf16 %v493_v52, %v493_v52 }
 0x8c1   : > { %500 = vrot.lane.b32.xlu1 %v498_v53, %s1040_s24 }
 0x933   : > { %v501_v54 = vpop.permute.xlu1 %500 }
 0x934   : > { %902 = vmatmul.msk.bf16.vlgmr.msrb.gmra.mxu0 %vm247_vm1, %v501_v54 }
 0x9b1   : > { %v514_v56 = vpop.f32.mrf.mxu0 }
 0x9b2   : > { %v518_v57 = vadd.f32 %v514_v56, %v497_v55 }
 0x9b4   : > { %982 = vtanh.f32 %v518_v57  ;;  %v903_v60 = vmul.f32 -1.442695, %v518_v57 }
 0x9b6   : > { %984 = vpow2.f32 %v903_v60 }
 0x9b9   : > { %v516_v58 = vpop.f32.mrf.mxu0 }
 0x9ba   : > { %v983_v59 = vpop.eup %982 }
 0x9bb   : > { %541 = vrot.lane.b32.xlu2 %v983_v59, %s1039_s23 }
 0x9bc   : > { %v985_v61 = vpop.eup %984 }
 0x9bd   : > { %v522_v62 = vadd.f32 1.0, %v985_v61 }
 0x9bf   : > { %986 = vrcp.f32 %v522_v62  ;;  %v534_v4 = vand.u32 2147483648, %v522_v62  ;;  %vm528_vm5 = vweird.f32 %v522_v62  ;;  %v532_v5 = vand.u32 2147483647, %v522_v62 }
 0x9c1   : > { %v535_v7 = vor.u32 1.1754944e-38, %v534_v4  ;;  %vm533_vm7 = vcmp.eq.f32.partialorder %v532_v5, 8.507059e+37 }
 0x9c5   : > { %v987_v63 = vpop.eup %986 }
 0x9c6   : > { %v524_v0 = vmul.f32 %v987_v63, %v522_v62  ;;  %vm529_vm4 = vweird.f32 %v987_v63 }
 0x9c7   : > { %vm530_vm6 = vmor %vm528_vm5, %vm529_vm4  ;;  %vm759_vm5 = vcmask 1040384  }
 0x9c8   : > { %v525_v1 = vsub.f32 1.0, %v524_v0 }
 0x9ca   : > { %v526_v2 = vmul.f32 %v987_v63, %v525_v1 }
 0x9cc   : > { %v527_v3 = vadd.f32 %v987_v63, %v526_v2 }
 0x9ce   : > { %v531_v6 = vsel %vm530_vm6, %v987_v63, %v527_v3  ;;  %vm767_vm6 = vcmask 253952  }
 0x9cf   : > { %v536_v9 = vsel %vm533_vm7, %v535_v7, %v531_v6 }
 0x9d0   : > { %v539_v11 = vmul.f32 %v536_v9, %v487_v49 }
 0xa15   : > { %v542_v8 = vpop.permute.xlu2 %541 }
 0xa16   : > { %v544_v10 = vmul.f32 %v542_v8, %v536_v9 }
 0xa18   : > { %546 = vrot.lane.b32.xlu0 %v544_v10, %s1040_s24 }
 0xa8a   : > { %v547_v12 = vpop.permute.xlu0 %546 }
 0xa8b   : > { %v549_v13 = vadd.f32 %v547_v12, %v539_v11  ;;  %v913_v11 = vld [vmem:[%s831_s16 + $0xe] sm:$0x3] }
 0xa8d   : > { %988 = vtanh.f32 %v549_v13 }
 0xa93   : > { %v989_v14 = vpop.eup %988 }
 0xa94   : > { %552 = vrot.lane.b32.xlu1 %v989_v14, %s1039_s23 }
 0xb06   : > { %v553_v15 = vpop.permute.xlu1 %552 }
 0xb07   : > { %v555_v16 = vmul.f32 %v553_v15, %v536_v9 }
 0xb09   : > { %v561_v17 = vpack.c.bf16 %v555_v16, %v555_v16 }
 0xb0b   : > { %563 = vrot.lane.b32.xlu2 %v561_v17, %s1040_s24 }
 0xb65   : > { %v564_v18 = vpop.permute.xlu2 %563 }
 0xb66   : > { %906 = vmatmul.msk.bf16.vlgmr.msrb.gmra.mxu1 %vm247_vm1, %v564_v18 }
 0xbe3   : > { %v577_v20 = vpop.f32.mrf.mxu1 }
 0xbe4   : > { %v581_v21 = vadd.f32 %v905_v19, %v577_v20 }
 0xbe6   : > { %990 = vtanh.f32 %v581_v21  ;;  %v907_v24 = vmul.f32 -1.442695, %v581_v21 }
 0xbe8   : > { %992 = vpow2.f32 %v907_v24 }
 0xbeb   : > { %v579_v22 = vpop.f32.mrf.mxu1 }
 0xbec   : > { %v991_v23 = vpop.eup %990 }
 0xbed   : > { %604 = vrot.lane.b32.xlu0 %v991_v23, %s1039_s23 }
 0xbee   : > { %v993_v25 = vpop.eup %992 }
 0xbef   : > { %v585_v26 = vadd.f32 1.0, %v993_v25 }
 0xbf1   : > { %994 = vrcp.f32 %v585_v26  ;;  %v597_v32 = vand.u32 2147483648, %v585_v26  ;;  %vm591_vm9 = vweird.f32 %v585_v26  ;;  %v595_v33 = vand.u32 2147483647, %v585_v26 }
 0xbf3   : > { %v598_v35 = vor.u32 1.1754944e-38, %v597_v32  ;;  %vm596_vm11 = vcmp.eq.f32.partialorder %v595_v33, 8.507059e+37 }
 0xbf7   : > { %v995_v27 = vpop.eup %994 }
 0xbf8   : > { %v587_v28 = vmul.f32 %v995_v27, %v585_v26  ;;  %vm592_vm8 = vweird.f32 %v995_v27 }
 0xbf9   : > { %vm593_vm10 = vmor %vm591_vm9, %vm592_vm8 }
 0xbfa   : > { %v588_v29 = vsub.f32 1.0, %v587_v28 }
 0xbfc   : > { %v589_v30 = vmul.f32 %v995_v27, %v588_v29 }
 0xbfe   : > { %v590_v31 = vadd.f32 %v995_v27, %v589_v30 }
 0xc00   : > { %v594_v34 = vsel %vm593_vm10, %v995_v27, %v590_v31 }
 0xc01   : > { %v599_v37 = vsel %vm596_vm11, %v598_v35, %v594_v34 }
 0xc02   : > { %v602_v39 = vmul.f32 %v599_v37, %v549_v13 }
 0xc5f   : > { %v605_v36 = vpop.permute.xlu0 %604 }
 0xc60   : > { %v607_v38 = vmul.f32 %v605_v36, %v599_v37 }
 0xc62   : > { %609 = vrot.lane.b32.xlu1 %v607_v38, %s1040_s24 }
 0xcd4   : > { %v610_v40 = vpop.permute.xlu1 %609 }
 0xcd5   : > { %v612_v41 = vadd.f32 %v610_v40, %v602_v39 }
 0xcd7   : > { %996 = vtanh.f32 %v612_v41 }
 0xcdd   : > { %v997_v42 = vpop.eup %996 }
 0xcde   : > { %615 = vrot.lane.b32.xlu2 %v997_v42, %s1039_s23 }
 0xd38   : > { %v616_v43 = vpop.permute.xlu2 %615 }
 0xd39   : > { %v618_v44 = vmul.f32 %v616_v43, %v599_v37 }
 0xd3b   : > { %v624_v45 = vpack.c.bf16 %v618_v44, %v618_v44 }
 0xd3d   : > { %626 = vrot.lane.b32.xlu0 %v624_v45, %s1040_s24 }
 0xdaf   : > { %v627_v46 = vpop.permute.xlu0 %626 }
 0xdb0   : > { %910 = vmatmul.msk.bf16.vlgmr.msrb.gmra.mxu2 %vm247_vm1, %v627_v46 }
 0xe33   : > { %v640_v48 = vpop.f32.mrf.mxu2 }
 0xe34   : > { %v644_v49 = vadd.f32 %v909_v47, %v640_v48 }
 0xe36   : > { %998 = vtanh.f32 %v644_v49  ;;  %v911_v52 = vmul.f32 -1.442695, %v644_v49 }
 0xe38   : > { %1000 = vpow2.f32 %v911_v52 }
 0xe3b   : > { %v642_v50 = vpop.f32.mrf.mxu2 }
 0xe3c   : > { %v999_v51 = vpop.eup %998 }
 0xe3d   : > { %667 = vrot.lane.b32.xlu1 %v999_v51, %s1039_s23 }
 0xe3e   : > { %v1001_v53 = vpop.eup %1000 }
 0xe3f   : > { %v648_v54 = vadd.f32 1.0, %v1001_v53 }
 0xe41   : > { %1002 = vrcp.f32 %v648_v54  ;;  %v660_v60 = vand.u32 2147483648, %v648_v54  ;;  %vm654_vm13 = vweird.f32 %v648_v54  ;;  %v658_v61 = vand.u32 2147483647, %v648_v54 }
 0xe43   : > { %v661_v63 = vor.u32 1.1754944e-38, %v660_v60  ;;  %vm659_vm15 = vcmp.eq.f32.partialorder %v658_v61, 8.507059e+37 }
 0xe47   : > { %v1003_v55 = vpop.eup %1002 }
 0xe48   : > { %v650_v56 = vmul.f32 %v1003_v55, %v648_v54  ;;  %vm655_vm12 = vweird.f32 %v1003_v55 }
 0xe49   : > { %vm656_vm14 = vmor %vm654_vm13, %vm655_vm12 }
 0xe4a   : > { %v651_v57 = vsub.f32 1.0, %v650_v56 }
 0xe4c   : > { %v652_v58 = vmul.f32 %v1003_v55, %v651_v57 }
 0xe4e   : > { %v653_v59 = vadd.f32 %v1003_v55, %v652_v58 }
 0xe50   : > { %v657_v62 = vsel %vm656_vm14, %v1003_v55, %v653_v59 }
 0xe51   : > { %v662_v1 = vsel %vm659_vm15, %v661_v63, %v657_v62 }
 0xe52   : > { %v665_v3 = vmul.f32 %v662_v1, %v612_v41 }
 0xeaf   : > { %v668_v0 = vpop.permute.xlu1 %667 }
 0xeb0   : > { %v670_v2 = vmul.f32 %v668_v0, %v662_v1 }
 0xeb2   : > { %672 = vrot.lane.b32.xlu2 %v670_v2, %s1040_s24 }
 0xf0c   : > { %v673_v4 = vpop.permute.xlu2 %672 }
 0xf0d   : > { %v675_v5 = vadd.f32 %v673_v4, %v665_v3 }
 0xf0f   : > { %1004 = vtanh.f32 %v675_v5 }
 0xf15   : > { %v1005_v6 = vpop.eup %1004 }
 0xf16   : > { %678 = vrot.lane.b32.xlu0 %v1005_v6, %s1039_s23 }
 0xf88   : > { %v679_v7 = vpop.permute.xlu0 %678 }
 0xf89   : > { %v681_v8 = vmul.f32 %v679_v7, %v662_v1 }
 0xf8b   : > { %v687_v9 = vpack.c.bf16 %v681_v8, %v681_v8 }
 0xf8d   : > { %689 = vrot.lane.b32.xlu1 %v687_v9, %s1040_s24 }
 0xfff   : > { %v690_v10 = vpop.permute.xlu1 %689 }
0x1000   : > { %914 = vmatmul.msk.bf16.vlgmr.msrb.gmra.mxu3 %vm247_vm1, %v690_v10 }
0x1083   : > { %v703_v12 = vpop.f32.mrf.mxu3 }
0x1084   : > { %v707_v13 = vadd.f32 %v913_v11, %v703_v12 }
0x1086   : > { %1006 = vtanh.f32 %v707_v13  ;;  %v915_v16 = vmul.f32 -1.442695, %v707_v13 }
0x1088   : > { %1008 = vpow2.f32 %v915_v16 }
0x108b   : > { %v705_v14 = vpop.f32.mrf.mxu3 }
0x108c   : > { %v1007_v15 = vpop.eup %1006 }
0x108d   : > { %730 = vrot.lane.b32.xlu2 %v1007_v15, %s1039_s23 }
0x108e   : > { %v1009_v17 = vpop.eup %1008 }
0x108f   : > { %v711_v18 = vadd.f32 1.0, %v1009_v17 }
0x1091   : > { %1010 = vrcp.f32 %v711_v18  ;;  %v723_v24 = vand.u32 2147483648, %v711_v18  ;;  %vm717_vm2 = vweird.f32 %v711_v18  ;;  %v721_v25 = vand.u32 2147483647, %v711_v18 }
0x1093   : > { %v724_v27 = vor.u32 1.1754944e-38, %v723_v24  ;;  %vm722_vm4 = vcmp.eq.f32.partialorder %v721_v25, 8.507059e+37 }
0x1097   : > { %v1011_v19 = vpop.eup %1010 }
0x1098   : > { %v713_v20 = vmul.f32 %v1011_v19, %v711_v18  ;;  %vm718_vm1 = vweird.f32 %v1011_v19 }
0x1099   : > { %vm719_vm3 = vmor %vm717_vm2, %vm718_vm1 }
0x109a   : > { %v714_v21 = vsub.f32 1.0, %v713_v20 }
0x109c   : > { %v715_v22 = vmul.f32 %v1011_v19, %v714_v21 }
0x109e   : > { %v716_v23 = vadd.f32 %v1011_v19, %v715_v22 }
0x10a0   : > { %v720_v26 = vsel %vm719_vm3, %v1011_v19, %v716_v23 }
0x10a1   : > { %v725_v29 = vsel %vm722_vm4, %v724_v27, %v720_v26 }
0x10a2   : > { %v728_v31 = vmul.f32 %v725_v29, %v675_v5 }
0x10e7   : > { %v731_v28 = vpop.permute.xlu2 %730 }
0x10e8   : > { %v733_v30 = vmul.f32 %v731_v28, %v725_v29 }
0x10ea   : > { %735 = vrot.lane.b32.xlu0 %v733_v30, %s1040_s24 }
0x115c   : > { %v736_v32 = vpop.permute.xlu0 %735 }
0x115d   : > { %v738_v33 = vadd.f32 %v736_v32, %v728_v31 }
0x115f   : > { %1012 = vtanh.f32 %v738_v33  ;;  %752 = vrot.lane.b32.xlu0 %v738_v33, %s1041_s9 }
0x1165   : > { %v1013_v34 = vpop.eup %1012 }
0x1166   : > { %741 = vrot.lane.b32.xlu1 %v1013_v34, %s1039_s23 }
0x11d1   : > { %v753_v35 = vpop.permute.xlu0 %752 }
0x11d2   : > { %755 = vst.msk [vmem:[#allocation3] sm:$0x3] %vm221_vm0, %v753_v35 }
0x11d8   : > { %v742_v36 = vpop.permute.xlu1 %741 }
0x11d9   : > { %v744_v37 = vmul.f32 %v742_v36, %v725_v29 }
0x11db   : > { %v756_v38 = vpack.c.bf16 %v744_v37, %v744_v37  ;;  %746 = vrot.lane.b32.xlu2 %v744_v37, %s1040_s24 }
0x11dd   : > { %v758_v39 = vrot.slane %v756_v38, 3 }
0x11df   : > { %v762_v40 = vsel %vm759_vm5, %v756_v38, %v758_v39 }
0x11e0   : > { %764 = vrot.lane.b32.xlu1 %v762_v40, %s1040_s24 }
0x1235   : > { %v747_v41 = vpop.permute.xlu2 %746 }
0x1236   : > { %750 = vst.msk [vmem:[#allocation2] sm:$0x3] %vm221_vm0, %v747_v41 }
0x1252   : > { %v765_v42 = vpop.permute.xlu1 %764 }
0x1253   : > { %768 = vst.msk [vmem:[%s215_s19] sm:$0x1] %vm767_vm6, %v765_v42 }
0x1254 PF: > { %s12_s11 = sadd.s32 1, %s1036_s11   ;;  %s1168_s9 = smov %s1032_s10 }
0x1255   : > { %p9_p5 = scmp.ge.s32.totalorder %s12_s11, 4   ;;  %s1169_s10 = smov %s1171_s12 }
0x1257   :  { %11 = sbr.rel (!%p9_p5) target bundleno = 2 (0x2), region = 73 }

// kernel: lstm_model_forward.6
= control target key start
LH: loop header
LB: loop body
LE: loop exit
PB: predicated region body
PF: predicated region fallthrough
CT: control target
= control target key end

     0   :  { %7 = vsyncpa [#allocation5], 0  ;;  %s1599_s0 = inlined_call_operand.vmem [shape: f32[2,8,2,128], index: 0, kind: input, shape index: {}]   ;;  %s1600_s1 = inlined_call_operand.hbm [shape: bf16[2,32,128], index: 1, kind: input, shape index: {}]   ;;  %s1601_s2 = inlined_call_operand.vmem [shape: bf16[2,8,2,32], index: 2, kind: output, shape index: {}]  }
   0x1   :  { %9 = vsyncpa [#allocation5 + $0x1], 0  ;;  %s1362_s9 = smov 0   ;;  %s1364_s10 = smov 0  }
   0x2   :  { %s1366_s11 = smov 0   ;;  %s1368_s12 = smov 0  }
   0x3   :  { %s1370_s13 = smov 0   ;;  %s1372_s14 = smov 0  }
   0x4 LB: > { %s1072_s15 = sadd.s32 4294967295, %s1339_s14   ;;  %s27_s16 = sadd.s32 1, %s1335_s13  ;;  %s1339_s14 = sphi %s1372_s14, %s15_s14   ;;  %s1335_s13 = sphi %s1370_s13, %s1608_s13   ;;  %s1331_s12 = sphi %s1368_s12, %s1607_s12   ;;  %s1327_s11 = sphi %s1366_s11, %s1606_s11   ;;  %s1323_s10 = sphi %s1364_s10, %s1605_s10   ;;  %s1319_s9 = sphi %s1362_s9, %s1604_s9  }
   0x5   : > { %p29_p0 = scmp.ge.s32.totalorder %s27_s16, 2  ;;  %s70_s17 = sadd.s32 1, %s1327_s11 }
   0x6   : > { %p77_p1 = scmp.ne.s32.totalorder %s1327_s11, %s1323_s10  ;;  %p78_p2 = scmp.eq.s32.totalorder %s1339_s14, 0 }
   0x7   : > { %s1610_s16 = smov (%p29_p0, %s27_s16), 0  ;;  %p83_p4 = scmp.ne.s32.totalorder %s1323_s10, %s1319_s9 }
   0x8   : > { %p1398_p3 = por %p78_p2, %p77_p1  ;;  %s67_s19 = ssub.s32 %s1335_s13, %s1610_s16 }
   0x9   : > { %p84_p5 = scmp.eq.s32.totalorder %s1072_s15, 0  ;;  %p68_p6 = scmp.eq.s32.totalorder %s67_s19, 0 }
   0xa   : > { %p1140_p8 = scmp.lt.s32.totalorder %s1339_s14, 2  ;;  %s164_s22 = sand.u32 1, %s1327_s11  }
   0xb   : > { %p1405_p7 = por %p84_p5, %p83_p4  ;;  %s1130_s23 = sshll.u32 %s1335_s13, 4 }
   0xc   : > { %s1411_s21 = scalar_select %p68_p6, %s1327_s11, %s70_s17  }
   0xd   : > { %s1076_s24 = sshll.u32 %s164_s22, 4  ;;  %s173_s27 = scalar_lea.hbm %s1600_s1, %s1130_s23 }
   0xe   : > { %s174_s28 = sshll.u32 %s173_s27, 4  ;;  %s168_s29 = scalar_lea.vmem [#allocation4], %s1076_s24  ;;  %s175_s28 = int_to_ptr.hbm [resolvable:$true] %s174_s28 }
   0xf   : > { %s176_s30 = sshll.u32 %s168_s29, 4  ;;  %p1137_p9 = pnand %p1140_p8, %p1398_p3  ;;  %s177_s30 = int_to_ptr.vmem [resolvable:$true] %s176_s30 }
  0x10   : > { %p1079_p10 = scmp.ge.s32.totalorder %s1339_s14, 1  ;;  %p184_p11 = scmp.lt.s32.totalorder %s1339_s14, 3 }
  0x11   : > { %s165_s3 = scalar_lea.sflag [#allocation5], %s164_s22  ;;  %s1341_s4 = smov 64  }
  0x12   : > { %s1342_s5 = smov 4   ;;  %p185_p12 = pnand %p1079_p10, %p184_p11 }
  0x13   : > { %1139 = dma.hbm_to_vmem [thread:$0]  (!%p1137_p9), %s175_s28, 256, %s177_s30, %s165_s3, %s1341_s4, %s1341_s4, %s1342_s5  }
  0x14   : > { %188 = sbr.rel (%p185_p12) target bundleno = 4733 (0x127d), region = 28  ;;  %s190_s6 = sand.u32 (!%p185_p12), 1, %s1323_s10  }
  0x15   : > { %s1080_s7 = sshll.u32 (!%p185_p12), %s190_s6, 4  ;;  %s191_s8 = scalar_lea.sflag (!%p185_p12), [#allocation5], %s190_s6 }
  0x16   : > { %s194_s9 = scalar_lea.vmem (!%p185_p12), [#allocation4], %s1080_s7 }
  0x19   : > { %1314 = dma.done.wait (%p1405_p7), %s191_s8, 256  }
  0x1a   : > { %1316 = vsyncadd (%p1405_p7), %s191_s8, 4294967040  ;;  %vm276_vm0 = vcmask 254976   ;;  %v1343_v0 = vmov 0.0   ;;  %v1133_v1 = vld [vmem:[%s194_s9 + $0x8] sm:$0xff]  ;;  %v1132_v2 = vld [vmem:[%s194_s9] sm:$0xff]  ;;  %vm302_vm1 = vcmask 261120  }
  0x1b   : > { %277 = vst.msk [vmem:[#allocation2] sm:$0x3] %vm276_vm0, %v1343_v0  ;;  %312 = vmatpush.bf16.msra.mxu0 %v1133_v1  ;;  %393 = vmatpush.bf16.msra.mxu1 %v1133_v1  ;;  %p241_p13 = scmp.lt.s32.totalorder %s1331_s12, 1  ;;  %s1084_s18 = smul.u32 14, %s1331_s12 }
  0x1c   : > { %278 = vst.msk [vmem:[#allocation3] sm:$0x3] %vm276_vm0, %v1343_v0  ;;  %468 = vmatpush.bf16.msra.mxu2 %v1133_v1  ;;  %542 = vmatpush.bf16.msra.mxu3 %v1133_v1  ;;  %s1344_s24 = smov 64   ;;  %s1345_s25 = smov 32  }
  0x1d   : > { %s1432_s15 = scalar_select %p241_p13, %s1331_s12, 1 }
  0x1e   : > { %s1095_s26 = smul.u32 10, %s1331_s12  ;;  %s1105_s30 = sshll.u32 %s1331_s12, 1 }
  0x1f   : > { %313 = vmatpush.bf16.msra.mxu0 %v1132_v2  ;;  %394 = vmatpush.bf16.msra.mxu1 %v1132_v2  ;;  %s1131_s17 = sshll.u32 %s1432_s15, 4  ;;  %s1100_s28 = smul.u32 6, %s1331_s12 }
  0x20   : > { %469 = vmatpush.bf16.msra.mxu2 %v1132_v2  ;;  %543 = vmatpush.bf16.msra.mxu3 %v1132_v2  ;;  %s1439_s22 = scalar_lea.vmem %s1599_s0, %s1131_s17  ;;  %s599_s4 = ssub.s32 4, %s1331_s12 }
  0x21   : > { %s287_s23 = scalar_lea.vmem %s1439_s22, %s1084_s18  ;;  %s987_s27 = scalar_lea.vmem %s1439_s22, %s1095_s26 }
  0x22   : > { %v283_v3 = vld [vmem:[#allocation2] sm:$0x3]  ;;  %v1096_v37 = vld [vmem:[%s987_s27 + $0x2] sm:$0x3]  ;;  %s994_s29 = scalar_lea.vmem %s1439_s22, %s1100_s28  ;;  %s1000_s3 = scalar_lea.vmem %s1439_s22, %s1105_s30 }
  0x23   : > { %v289_v4 = vpack.c.bf16 %v283_v3, %v283_v3  ;;  %616 = vmatpush.bf16.msrb.mxu0 %v1133_v1  ;;  %691 = vmatpush.bf16.msrb.mxu1 %v1133_v1  ;;  %v288_v5 = vld [vmem:[%s287_s23] sm:$0x3]  ;;  %v284_v10 = vld [vmem:[#allocation3] sm:$0x3]  ;;  %v1101_v3 = vld [vmem:[%s994_s29 + $0x4] sm:$0x3] }
  0x24   : > { %766 = vmatpush.bf16.msrb.mxu2 %v1133_v1  ;;  %841 = vmatpush.bf16.msrb.mxu3 %v1133_v1  ;;  %s1110_s5 = sshll.u32 %s599_s4, 1  ;;  %s1113_s7 = smul.u32 4294967290, %s1331_s12 }
  0x25   : > { %1093 = vmatmul.msk.bf16.vlgmr.msra.gmra.mxu0 %vm302_vm1, %v289_v4  ;;  %s601_s6 = scalar_lea.vmem %s1439_s22, %s1110_s5  ;;  %s1118_s9 = smul.u32 4294967286, %s1331_s12 }
  0x26   : > { %s1009_s8 = scalar_lea.vmem %s1439_s22, %s1113_s7  ;;  %s1123_s18 = smul.u32 4294967282, %s1331_s12 }
  0x27   : > { %617 = vmatpush.bf16.msrb.mxu0 %v1132_v2  ;;  %692 = vmatpush.bf16.msrb.mxu1 %v1132_v2  ;;  %s1016_s17 = scalar_lea.vmem %s1439_s22, %s1118_s9  ;;  %s1083_s20 = sshll.u32 %s1432_s15, 3 }
  0x28   : > { %767 = vmatpush.bf16.msrb.mxu2 %v1132_v2  ;;  %842 = vmatpush.bf16.msrb.mxu3 %v1132_v2  ;;  %s1023_s19 = scalar_lea.vmem %s1439_s22, %s1123_s18  ;;  %s285_s22 = smul.u32 7, %s1331_s12 }
  0x29   : > { %s1531_s27 = scalar_lea.vmem %s1601_s2, %s1083_s20  ;;  %s989_s15 = smul.u32 5, %s1331_s12 }
  0x2a   : > { %s372_s28 = scalar_lea.vmem %s1531_s27, %s285_s22  ;;  %s1346_s29 = smov 96  }
  0x2b   : > { %s990_s30 = scalar_lea.vmem %s1531_s27, %s989_s15  ;;  %s1002_s5 = scalar_lea.vmem %s1531_s27, %s1331_s12 }
  0x2c   : > { %s1011_s7 = smul.u32 4294967293, %s1331_s12 }
  0x2e   : > { %s1012_s9 = scalar_lea.vmem %s1531_s27, %s1011_s7 }
  0xa2   : > { %v315_v6 = vpop.f32.mrf.mxu0 }
  0xa3   : > { %v319_v7 = vadd.f32 %v315_v6, %v288_v5 }
  0xa5   : > { %1195 = vtanh.f32 %v319_v7  ;;  %v1094_v11 = vmul.f32 -1.442695, %v319_v7 }
  0xa7   : > { %1197 = vpow2.f32 %v1094_v11 }
  0xaa   : > { %v317_v8 = vpop.f32.mrf.mxu0 }
  0xab   : > { %v1196_v9 = vpop.eup %1195 }
  0xac   : > { %346 = vrot.lane.b32.xlu0 %v1196_v9, %s1344_s24 }
  0xad   : > { %v1198_v12 = vpop.eup %1197 }
  0xae   : > { %v323_v13 = vadd.f32 1.0, %v1198_v12 }
  0xb0   : > { %1199 = vrcp.f32 %v323_v13  ;;  %v335_v19 = vand.u32 2147483648, %v323_v13  ;;  %vm329_vm3 = vweird.f32 %v323_v13  ;;  %v333_v20 = vand.u32 2147483647, %v323_v13 }
  0xb2   : > { %v336_v22 = vor.u32 1.1754944e-38, %v335_v19  ;;  %vm334_vm5 = vcmp.eq.f32.partialorder %v333_v20, 8.507059e+37 }
  0xb4   : > { %341 = vrot.lane.b32.xlu0 %v284_v10, %s1345_s25 }
  0xb6   : > { %v1200_v14 = vpop.eup %1199 }
  0xb7   : > { %v325_v15 = vmul.f32 %v1200_v14, %v323_v13  ;;  %vm330_vm2 = vweird.f32 %v1200_v14 }
  0xb8   : > { %vm331_vm4 = vmor %vm329_vm3, %vm330_vm2 }
  0xb9   : > { %v326_v16 = vsub.f32 1.0, %v325_v15 }
  0xbb   : > { %v327_v17 = vmul.f32 %v1200_v14, %v326_v16 }
  0xbd   : > { %v328_v18 = vadd.f32 %v1200_v14, %v327_v17 }
  0xbf   : > { %v332_v21 = vsel %vm331_vm4, %v1200_v14, %v328_v18 }
  0xc0   : > { %v337_v24 = vsel %vm334_vm5, %v336_v22, %v332_v21 }
 0x11e   : > { %v347_v23 = vpop.permute.xlu0 %346 }
 0x11f   : > { %v349_v25 = vmul.f32 %v347_v23, %v337_v24 }
 0x121   : > { %351 = vrot.lane.b32.xlu1 %v349_v25, %s1345_s25 }
 0x126   : > { %v342_v26 = vpop.permute.xlu0 %341 }
 0x127   : > { %v344_v27 = vmul.f32 %v342_v26, %v337_v24 }
 0x193   : > { %v352_v28 = vpop.permute.xlu1 %351 }
 0x194   : > { %v354_v29 = vadd.f32 %v352_v28, %v344_v27 }
 0x196   : > { %1201 = vtanh.f32 %v354_v29 }
 0x19c   : > { %v1202_v30 = vpop.eup %1201 }
 0x19d   : > { %357 = vrot.lane.b32.xlu1 %v1202_v30, %s1344_s24 }
 0x20f   : > { %v358_v31 = vpop.permute.xlu1 %357 }
 0x210   : > { %v360_v32 = vmul.f32 %v358_v31, %v337_v24 }
 0x212   : > { %v1446_v33 = vpack.c.bf16 %v360_v32, %v360_v32 }
 0x214   : > { %v380_v34 = vunpack.c.l.b16 %v1446_v33 }
 0x216   : > { %v381_v35 = vpack.c.b16 %v380_v34, %v380_v34  ;;  %v1106_v34 = vld [vmem:[%s1000_s3 + $0x6] sm:$0x3] }
 0x218   : > { %382 = vrot.lane.b32.xlu2 %v381_v35, %s1345_s25 }
 0x272   : > { %v383_v36 = vpop.permute.xlu2 %382 }
 0x273   : > { %1097 = vmatmul.msk.bf16.vlgmr.msra.gmra.mxu1 %vm302_vm1, %v383_v36 }
 0x2f0   : > { %v396_v38 = vpop.f32.mrf.mxu1 }
 0x2f1   : > { %v400_v39 = vadd.f32 %v1096_v37, %v396_v38 }
 0x2f3   : > { %1203 = vtanh.f32 %v400_v39  ;;  %v1098_v42 = vmul.f32 -1.442695, %v400_v39 }
 0x2f5   : > { %1205 = vpow2.f32 %v1098_v42 }
 0x2f8   : > { %v398_v40 = vpop.f32.mrf.mxu1 }
 0x2f9   : > { %v1204_v41 = vpop.eup %1203 }
 0x2fa   : > { %423 = vrot.lane.b32.xlu2 %v1204_v41, %s1344_s24 }
 0x2fb   : > { %v1206_v43 = vpop.eup %1205 }
 0x2fc   : > { %v404_v44 = vadd.f32 1.0, %v1206_v43 }
 0x2fe   : > { %1207 = vrcp.f32 %v404_v44  ;;  %v416_v50 = vand.u32 2147483648, %v404_v44  ;;  %vm410_vm7 = vweird.f32 %v404_v44  ;;  %v414_v51 = vand.u32 2147483647, %v404_v44 }
 0x300   : > { %v417_v53 = vor.u32 1.1754944e-38, %v416_v50  ;;  %vm415_vm9 = vcmp.eq.f32.partialorder %v414_v51, 8.507059e+37 }
 0x304   : > { %v1208_v45 = vpop.eup %1207 }
 0x305   : > { %v406_v46 = vmul.f32 %v1208_v45, %v404_v44  ;;  %vm411_vm6 = vweird.f32 %v1208_v45 }
 0x306   : > { %vm412_vm8 = vmor %vm410_vm7, %vm411_vm6 }
 0x307   : > { %v407_v47 = vsub.f32 1.0, %v406_v46 }
 0x309   : > { %v408_v48 = vmul.f32 %v1208_v45, %v407_v47 }
 0x30b   : > { %v409_v49 = vadd.f32 %v1208_v45, %v408_v48 }
 0x30d   : > { %v413_v52 = vsel %vm412_vm8, %v1208_v45, %v409_v49 }
 0x30e   : > { %v418_v55 = vsel %vm415_vm9, %v417_v53, %v413_v52 }
 0x30f   : > { %v421_v57 = vmul.f32 %v418_v55, %v354_v29 }
 0x354   : > { %v424_v54 = vpop.permute.xlu2 %423 }
 0x355   : > { %v426_v56 = vmul.f32 %v424_v54, %v418_v55 }
 0x357   : > { %428 = vrot.lane.b32.xlu0 %v426_v56, %s1345_s25 }
 0x3c9   : > { %v429_v58 = vpop.permute.xlu0 %428 }
 0x3ca   : > { %v431_v59 = vadd.f32 %v429_v58, %v421_v57 }
 0x3cc   : > { %1209 = vtanh.f32 %v431_v59 }
 0x3d2   : > { %v1210_v60 = vpop.eup %1209 }
 0x3d3   : > { %434 = vrot.lane.b32.xlu1 %v1210_v60, %s1344_s24 }
 0x445   : > { %v435_v61 = vpop.permute.xlu1 %434 }
 0x446   : > { %v437_v62 = vmul.f32 %v435_v61, %v418_v55 }
 0x448   : > { %v1456_v63 = vpack.c.bf16 %v437_v62, %v437_v62 }
 0x44a   : > { %v455_v0 = vunpack.c.l.b16 %v1456_v63 }
 0x44c   : > { %v456_v1 = vpack.c.b16 %v455_v0, %v455_v0 }
 0x44e   : > { %457 = vrot.lane.b32.xlu2 %v456_v1, %s1345_s25  ;;  %v602_v1 = vld [vmem:[%s601_s6] sm:$0x3]  ;;  %s671_s6 = scalar_lea.vmem %s1531_s27, %s599_s4  ;;  %s1025_s4 = smul.u32 4294967289, %s1331_s12 }
 0x4a8   : > { %v458_v2 = vpop.permute.xlu2 %457 }
 0x4a9   : > { %1102 = vmatmul.msk.bf16.vlgmr.msra.gmra.mxu2 %vm302_vm1, %v458_v2 }
 0x52c   : > { %v471_v4 = vpop.f32.mrf.mxu2 }
 0x52d   : > { %v475_v5 = vadd.f32 %v1101_v3, %v471_v4 }
 0x52f   : > { %1211 = vtanh.f32 %v475_v5  ;;  %v1103_v8 = vmul.f32 -1.442695, %v475_v5 }
 0x531   : > { %1213 = vpow2.f32 %v1103_v8 }
 0x534   : > { %v473_v6 = vpop.f32.mrf.mxu2 }
 0x535   : > { %v1212_v7 = vpop.eup %1211 }
 0x536   : > { %498 = vrot.lane.b32.xlu0 %v1212_v7, %s1344_s24 }
 0x537   : > { %v1214_v9 = vpop.eup %1213 }
 0x538   : > { %v479_v10 = vadd.f32 1.0, %v1214_v9 }
 0x53a   : > { %1215 = vrcp.f32 %v479_v10  ;;  %v491_v16 = vand.u32 2147483648, %v479_v10  ;;  %vm485_vm11 = vweird.f32 %v479_v10  ;;  %v489_v17 = vand.u32 2147483647, %v479_v10 }
 0x53c   : > { %v492_v19 = vor.u32 1.1754944e-38, %v491_v16  ;;  %vm490_vm13 = vcmp.eq.f32.partialorder %v489_v17, 8.507059e+37 }
 0x540   : > { %v1216_v11 = vpop.eup %1215 }
 0x541   : > { %v481_v12 = vmul.f32 %v1216_v11, %v479_v10  ;;  %vm486_vm10 = vweird.f32 %v1216_v11 }
 0x542   : > { %vm487_vm12 = vmor %vm485_vm11, %vm486_vm10 }
 0x543   : > { %v482_v13 = vsub.f32 1.0, %v481_v12 }
 0x545   : > { %v483_v14 = vmul.f32 %v1216_v11, %v482_v13 }
 0x547   : > { %v484_v15 = vadd.f32 %v1216_v11, %v483_v14 }
 0x549   : > { %v488_v18 = vsel %vm487_vm12, %v1216_v11, %v484_v15 }
 0x54a   : > { %v493_v21 = vsel %vm490_vm13, %v492_v19, %v488_v18 }
 0x54b   : > { %v496_v23 = vmul.f32 %v493_v21, %v431_v59 }
 0x5a8   : > { %v499_v20 = vpop.permute.xlu0 %498 }
 0x5a9   : > { %v501_v22 = vmul.f32 %v499_v20, %v493_v21 }
 0x5ab   : > { %503 = vrot.lane.b32.xlu1 %v501_v22, %s1345_s25 }
 0x61d   : > { %v504_v24 = vpop.permute.xlu1 %503 }
 0x61e   : > { %v506_v25 = vadd.f32 %v504_v24, %v496_v23 }
 0x620   : > { %1217 = vtanh.f32 %v506_v25 }
 0x626   : > { %v1218_v26 = vpop.eup %1217 }
 0x627   : > { %509 = vrot.lane.b32.xlu2 %v1218_v26, %s1344_s24 }
 0x681   : > { %v510_v27 = vpop.permute.xlu2 %509 }
 0x682   : > { %v512_v28 = vmul.f32 %v510_v27, %v493_v21 }
 0x684   : > { %v1466_v29 = vpack.c.bf16 %v512_v28, %v512_v28 }
 0x686   : > { %v529_v30 = vunpack.c.l.b16 %v1466_v29 }
 0x688   : > { %v530_v31 = vpack.c.b16 %v529_v30, %v529_v30 }
 0x68a   : > { %531 = vrot.lane.b32.xlu0 %v530_v31, %s1345_s25 }
 0x6fc   : > { %v532_v32 = vpop.permute.xlu0 %531 }
 0x6fd   : > { %1107 = vmatmul.msk.bf16.vlgmr.msra.gmra.mxu3 %vm302_vm1, %v532_v32  ;;  %v1114_v32 = vld [vmem:[%s1009_s8 + $0xa] sm:$0x3]  ;;  %s1018_s8 = smul.u32 4294967291, %s1331_s12 }
 0x780   : > { %v545_v35 = vpop.f32.mrf.mxu3 }
 0x781   : > { %v549_v36 = vadd.f32 %v1106_v34, %v545_v35 }
 0x783   : > { %1219 = vtanh.f32 %v549_v36  ;;  %v1108_v39 = vmul.f32 -1.442695, %v549_v36 }
 0x785   : > { %1221 = vpow2.f32 %v1108_v39 }
 0x788   : > { %v547_v37 = vpop.f32.mrf.mxu3 }
 0x789   : > { %v1220_v38 = vpop.eup %1219 }
 0x78a   : > { %572 = vrot.lane.b32.xlu1 %v1220_v38, %s1344_s24 }
 0x78b   : > { %v1222_v40 = vpop.eup %1221 }
 0x78c   : > { %v553_v41 = vadd.f32 1.0, %v1222_v40 }
 0x78e   : > { %1223 = vrcp.f32 %v553_v41  ;;  %v565_v47 = vand.u32 2147483648, %v553_v41  ;;  %vm559_vm15 = vweird.f32 %v553_v41  ;;  %v563_v48 = vand.u32 2147483647, %v553_v41 }
 0x790   : > { %v566_v50 = vor.u32 1.1754944e-38, %v565_v47  ;;  %vm564_vm3 = vcmp.eq.f32.partialorder %v563_v48, 8.507059e+37 }
 0x794   : > { %v1224_v42 = vpop.eup %1223 }
 0x795   : > { %v555_v43 = vmul.f32 %v1224_v42, %v553_v41  ;;  %vm560_vm14 = vweird.f32 %v1224_v42 }
 0x796   : > { %vm561_vm2 = vmor %vm559_vm15, %vm560_vm14 }
 0x797   : > { %v556_v44 = vsub.f32 1.0, %v555_v43 }
 0x799   : > { %v557_v45 = vmul.f32 %v1224_v42, %v556_v44 }
 0x79b   : > { %v558_v46 = vadd.f32 %v1224_v42, %v557_v45 }
 0x79d   : > { %v562_v49 = vsel %vm561_vm2, %v1224_v42, %v558_v46  ;;  %vm364_vm2 = vcmask 1040384  }
 0x79e   : > { %v567_v52 = vsel %vm564_vm3, %v566_v50, %v562_v49 }
 0x79f   : > { %v570_v54 = vmul.f32 %v567_v52, %v506_v25 }
 0x7fc   : > { %v573_v51 = vpop.permute.xlu1 %572 }
 0x7fd   : > { %v575_v53 = vmul.f32 %v573_v51, %v567_v52 }
 0x7ff   : > { %577 = vrot.lane.b32.xlu2 %v575_v53, %s1345_s25 }
 0x859   : > { %v578_v55 = vpop.permute.xlu2 %577 }
 0x85a   : > { %v580_v56 = vadd.f32 %v578_v55, %v570_v54 }
 0x85c   : > { %1225 = vtanh.f32 %v580_v56 }
 0x862   : > { %v1226_v57 = vpop.eup %1225 }
 0x863   : > { %583 = vrot.lane.b32.xlu0 %v1226_v57, %s1344_s24 }
 0x8d5   : > { %v584_v58 = vpop.permute.xlu0 %583 }
 0x8d6   : > { %v586_v59 = vmul.f32 %v584_v58, %v567_v52 }
 0x8d8   : > { %v1476_v60 = vpack.c.bf16 %v586_v59, %v586_v59 }
 0x8da   : > { %v603_v61 = vunpack.c.l.b16 %v1476_v60 }
 0x8dc   : > { %v604_v62 = vpack.c.b16 %v603_v61, %v603_v61 }
 0x8de   : > { %605 = vrot.lane.b32.xlu1 %v604_v62, %s1345_s25 }
 0x950   : > { %v606_v0 = vpop.permute.xlu1 %605 }
 0x951   : > { %1111 = vmatmul.msk.bf16.vlgmr.msrb.gmra.mxu0 %vm302_vm1, %v606_v0 }
 0x9ce   : > { %v619_v2 = vpop.f32.mrf.mxu0 }
 0x9cf   : > { %v623_v3 = vadd.f32 %v619_v2, %v602_v1  ;;  %v1119_v1 = vld [vmem:[%s1016_s17 + $0xc] sm:$0x3]  ;;  %s1019_s17 = scalar_lea.vmem %s1531_s27, %s1018_s8 }
 0x9d1   : > { %1227 = vtanh.f32 %v623_v3  ;;  %v1112_v6 = vmul.f32 -1.442695, %v623_v3 }
 0x9d3   : > { %1229 = vpow2.f32 %v1112_v6 }
 0x9d6   : > { %v621_v4 = vpop.f32.mrf.mxu0 }
 0x9d7   : > { %v1228_v5 = vpop.eup %1227 }
 0x9d8   : > { %646 = vrot.lane.b32.xlu2 %v1228_v5, %s1344_s24 }
 0x9d9   : > { %v1230_v7 = vpop.eup %1229 }
 0x9da   : > { %v627_v8 = vadd.f32 1.0, %v1230_v7 }
 0x9dc   : > { %1231 = vrcp.f32 %v627_v8  ;;  %v639_v14 = vand.u32 2147483648, %v627_v8  ;;  %vm633_vm5 = vweird.f32 %v627_v8  ;;  %v637_v15 = vand.u32 2147483647, %v627_v8 }
 0x9de   : > { %v640_v17 = vor.u32 1.1754944e-38, %v639_v14  ;;  %vm638_vm7 = vcmp.eq.f32.partialorder %v637_v15, 8.507059e+37 }
 0x9e2   : > { %v1232_v9 = vpop.eup %1231 }
 0x9e3   : > { %v629_v10 = vmul.f32 %v1232_v9, %v627_v8  ;;  %vm634_vm4 = vweird.f32 %v1232_v9 }
 0x9e4   : > { %vm635_vm6 = vmor %vm633_vm5, %vm634_vm4 }
 0x9e5   : > { %v630_v11 = vsub.f32 1.0, %v629_v10 }
 0x9e7   : > { %v631_v12 = vmul.f32 %v1232_v9, %v630_v11 }
 0x9e9   : > { %v632_v13 = vadd.f32 %v1232_v9, %v631_v12 }
 0x9eb   : > { %v636_v16 = vsel %vm635_vm6, %v1232_v9, %v632_v13  ;;  %vm373_vm6 = vcmask 253952  }
 0x9ec   : > { %v641_v19 = vsel %vm638_vm7, %v640_v17, %v636_v16 }
 0x9ed   : > { %v644_v21 = vmul.f32 %v641_v19, %v580_v56 }
 0xa32   : > { %v647_v18 = vpop.permute.xlu2 %646 }
 0xa33   : > { %v649_v20 = vmul.f32 %v647_v18, %v641_v19 }
 0xa35   : > { %651 = vrot.lane.b32.xlu0 %v649_v20, %s1345_s25 }
 0xaa7   : > { %v652_v22 = vpop.permute.xlu0 %651 }
 0xaa8   : > { %v654_v23 = vadd.f32 %v652_v22, %v644_v21 }
 0xaaa   : > { %1233 = vtanh.f32 %v654_v23 }
 0xab0   : > { %v1234_v24 = vpop.eup %1233 }
 0xab1   : > { %657 = vrot.lane.b32.xlu1 %v1234_v24, %s1344_s24 }
 0xb23   : > { %v658_v25 = vpop.permute.xlu1 %657 }
 0xb24   : > { %v660_v26 = vmul.f32 %v658_v25, %v641_v19 }
 0xb26   : > { %v1488_v27 = vpack.c.bf16 %v660_v26, %v660_v26 }
 0xb28   : > { %v678_v28 = vunpack.c.l.b16 %v1488_v27 }
 0xb2a   : > { %v679_v30 = vpack.c.b16 %v678_v28, %v678_v28 }
 0xb2c   : > { %680 = vrot.lane.b32.xlu2 %v679_v30, %s1345_s25 }
 0xb86   : > { %v681_v31 = vpop.permute.xlu2 %680 }
 0xb87   : > { %1115 = vmatmul.msk.bf16.vlgmr.msrb.gmra.mxu1 %vm302_vm1, %v681_v31 }
 0xc04   : > { %v694_v34 = vpop.f32.mrf.mxu1 }
 0xc05   : > { %v698_v35 = vadd.f32 %v1114_v32, %v694_v34  ;;  %v1124_v34 = vld [vmem:[%s1023_s19 + $0xe] sm:$0x3] }
 0xc07   : > { %1235 = vtanh.f32 %v698_v35  ;;  %v1116_v38 = vmul.f32 -1.442695, %v698_v35 }
 0xc09   : > { %1237 = vpow2.f32 %v1116_v38 }
 0xc0c   : > { %v696_v36 = vpop.f32.mrf.mxu1 }
 0xc0d   : > { %v1236_v37 = vpop.eup %1235 }
 0xc0e   : > { %721 = vrot.lane.b32.xlu0 %v1236_v37, %s1344_s24 }
 0xc0f   : > { %v1238_v39 = vpop.eup %1237 }
 0xc10   : > { %v702_v40 = vadd.f32 1.0, %v1238_v39  ;;  %v363_v39 = vrot.slane %v1446_v33, 3 }
 0xc12   : > { %1239 = vrcp.f32 %v702_v40  ;;  %v714_v46 = vand.u32 2147483648, %v702_v40  ;;  %vm708_vm9 = vweird.f32 %v702_v40  ;;  %v712_v47 = vand.u32 2147483647, %v702_v40 }
 0xc14   : > { %v715_v49 = vor.u32 1.1754944e-38, %v714_v46  ;;  %vm713_vm11 = vcmp.eq.f32.partialorder %v712_v47, 8.507059e+37 }
 0xc18   : > { %v1240_v41 = vpop.eup %1239 }
 0xc19   : > { %v704_v42 = vmul.f32 %v1240_v41, %v702_v40  ;;  %vm709_vm8 = vweird.f32 %v1240_v41  ;;  %v367_v40 = vsel %vm364_vm2, %v1446_v33, %v363_v39 }
 0xc1a   : > { %vm710_vm10 = vmor %vm708_vm9, %vm709_vm8 }
 0xc1b   : > { %v705_v43 = vsub.f32 1.0, %v704_v42 }
 0xc1d   : > { %v706_v44 = vmul.f32 %v1240_v41, %v705_v43 }
 0xc1f   : > { %v707_v45 = vadd.f32 %v1240_v41, %v706_v44 }
 0xc21   : > { %v711_v48 = vsel %vm710_vm10, %v1240_v41, %v707_v45  ;;  %v589_v41 = vrot.slane %v1476_v60, 3 }
 0xc22   : > { %v716_v51 = vsel %vm713_vm11, %v715_v49, %v711_v48 }
 0xc23   : > { %v719_v53 = vmul.f32 %v716_v51, %v654_v23  ;;  %v592_v42 = vsel %vm364_vm2, %v1476_v60, %v589_v41 }
 0xc80   : > { %v722_v50 = vpop.permute.xlu0 %721 }
 0xc81   : > { %v724_v52 = vmul.f32 %v722_v50, %v716_v51 }
 0xc83   : > { %726 = vrot.lane.b32.xlu1 %v724_v52, %s1345_s25 }
 0xcf5   : > { %v727_v54 = vpop.permute.xlu1 %726 }
 0xcf6   : > { %v729_v55 = vadd.f32 %v727_v54, %v719_v53 }
 0xcf8   : > { %1241 = vtanh.f32 %v729_v55 }
 0xcfe   : > { %v1242_v56 = vpop.eup %1241 }
 0xcff   : > { %732 = vrot.lane.b32.xlu2 %v1242_v56, %s1344_s24 }
 0xd59   : > { %v733_v57 = vpop.permute.xlu2 %732 }
 0xd5a   : > { %v735_v58 = vmul.f32 %v733_v57, %v716_v51 }
 0xd5c   : > { %v1498_v59 = vpack.c.bf16 %v735_v58, %v735_v58  ;;  %v440_v58 = vrot.slane %v1456_v63, 3 }
 0xd5e   : > { %v753_v61 = vunpack.c.l.b16 %v1498_v59 }
 0xd60   : > { %v754_v62 = vpack.c.b16 %v753_v61, %v753_v61 }
 0xd62   : > { %755 = vrot.lane.b32.xlu0 %v754_v62, %s1345_s25  ;;  %v443_v62 = vsel %vm364_vm2, %v1456_v63, %v440_v58 }
 0xdd4   : > { %v756_v0 = vpop.permute.xlu0 %755 }
 0xdd5   : > { %1120 = vmatmul.msk.bf16.vlgmr.msrb.gmra.mxu2 %vm302_vm1, %v756_v0  ;;  %v663_v0 = vrot.slane %v1488_v27, 3 }
 0xe58   : > { %v769_v2 = vpop.f32.mrf.mxu2 }
 0xe59   : > { %v773_v3 = vadd.f32 %v1119_v1, %v769_v2  ;;  %v666_v1 = vsel %vm364_vm2, %v1488_v27, %v663_v0  ;;  %v515_v27 = vrot.slane %v1466_v29, 3 }
 0xe5b   : > { %1243 = vtanh.f32 %v773_v3  ;;  %v1121_v6 = vmul.f32 -1.442695, %v773_v3 }
 0xe5d   : > { %1245 = vpow2.f32 %v1121_v6  ;;  %v518_v6 = vsel %vm364_vm2, %v1466_v29, %v515_v27 }
 0xe60   : > { %v771_v4 = vpop.f32.mrf.mxu2 }
 0xe61   : > { %v1244_v5 = vpop.eup %1243 }
 0xe62   : > { %796 = vrot.lane.b32.xlu1 %v1244_v5, %s1344_s24 }
 0xe63   : > { %v1246_v7 = vpop.eup %1245 }
 0xe64   : > { %v777_v8 = vadd.f32 1.0, %v1246_v7  ;;  %v738_v7 = vrot.slane %v1498_v59, 3 }
 0xe66   : > { %1247 = vrcp.f32 %v777_v8  ;;  %v789_v14 = vand.u32 2147483648, %v777_v8  ;;  %vm783_vm13 = vweird.f32 %v777_v8  ;;  %v787_v15 = vand.u32 2147483647, %v777_v8 }
 0xe68   : > { %v790_v17 = vor.u32 1.1754944e-38, %v789_v14  ;;  %vm788_vm15 = vcmp.eq.f32.partialorder %v787_v15, 8.507059e+37 }
 0xe6c   : > { %v1248_v9 = vpop.eup %1247 }
 0xe6d   : > { %v779_v10 = vmul.f32 %v1248_v9, %v777_v8  ;;  %vm784_vm12 = vweird.f32 %v1248_v9  ;;  %v741_v8 = vsel %vm364_vm2, %v1498_v59, %v738_v7 }
 0xe6e   : > { %vm785_vm14 = vmor %vm783_vm13, %vm784_vm12 }
 0xe6f   : > { %v780_v11 = vsub.f32 1.0, %v779_v10 }
 0xe71   : > { %v781_v12 = vmul.f32 %v1248_v9, %v780_v11 }
 0xe73   : > { %v782_v13 = vadd.f32 %v1248_v9, %v781_v12 }
 0xe75   : > { %v786_v16 = vsel %vm785_vm14, %v1248_v9, %v782_v13 }
 0xe76   : > { %v791_v19 = vsel %vm788_vm15, %v790_v17, %v786_v16 }
 0xe77   : > { %v794_v21 = vmul.f32 %v791_v19, %v729_v55 }
 0xed4   : > { %v797_v18 = vpop.permute.xlu1 %796 }
 0xed5   : > { %v799_v20 = vmul.f32 %v797_v18, %v791_v19 }
 0xed7   : > { %801 = vrot.lane.b32.xlu2 %v799_v20, %s1345_s25 }
 0xf31   : > { %v802_v22 = vpop.permute.xlu2 %801 }
 0xf32   : > { %v1507_v23 = vadd.f32 %v802_v22, %v794_v21 }
 0xf34   : > { %1249 = vtanh.f32 %v1507_v23 }
 0xf3a   : > { %v1250_v24 = vpop.eup %1249 }
 0xf3b   : > { %807 = vrot.lane.b32.xlu0 %v1250_v24, %s1344_s24 }
 0xfad   : > { %v808_v25 = vpop.permute.xlu0 %807 }
 0xfae   : > { %v810_v26 = vmul.f32 %v808_v25, %v791_v19 }
 0xfb0   : > { %v811_v28 = vpack.c.bf16 %v810_v26, %v810_v26 }
 0xfb2   : > { %v828_v30 = vunpack.c.l.b16 %v811_v28  ;;  %v813_v43 = vrot.slane %v811_v28, 3 }
 0xfb4   : > { %v829_v31 = vpack.c.b16 %v828_v30, %v828_v30  ;;  %v816_v44 = vsel %vm364_vm2, %v811_v28, %v813_v43 }
 0xfb6   : > { %830 = vrot.lane.b32.xlu1 %v829_v31, %s1345_s25 }
0x1028   : > { %v831_v32 = vpop.permute.xlu1 %830 }
0x1029   : > { %1125 = vmatmul.msk.bf16.vlgmr.msrb.gmra.mxu3 %vm302_vm1, %v831_v32 }
0x10ac   : > { %v844_v35 = vpop.f32.mrf.mxu3 }
0x10ad   : > { %v848_v36 = vadd.f32 %v1124_v34, %v844_v35 }
0x10af   : > { %1251 = vtanh.f32 %v848_v36  ;;  %v1126_v45 = vmul.f32 -1.442695, %v848_v36 }
0x10b1   : > { %1253 = vpow2.f32 %v1126_v45 }
0x10b4   : > { %v846_v37 = vpop.f32.mrf.mxu3 }
0x10b5   : > { %v1252_v38 = vpop.eup %1251 }
0x10b6   : > { %871 = vrot.lane.b32.xlu2 %v1252_v38, %s1344_s24 }
0x10b7   : > { %v1254_v46 = vpop.eup %1253 }
0x10b8   : > { %v852_v47 = vadd.f32 1.0, %v1254_v46 }
0x10ba   : > { %1255 = vrcp.f32 %v852_v47  ;;  %v864_v60 = vand.u32 2147483648, %v852_v47  ;;  %vm858_vm3 = vweird.f32 %v852_v47  ;;  %v862_v52 = vand.u32 2147483647, %v852_v47 }
0x10bc   : > { %v865_v54 = vor.u32 1.1754944e-38, %v864_v60  ;;  %vm863_vm5 = vcmp.eq.f32.partialorder %v862_v52, 8.507059e+37 }
0x10be   : > { %369 = vrot.lane.b32.xlu2 %v367_v40, %s1345_s25 }
0x10c0   : > { %v1256_v33 = vpop.eup %1255 }
0x10c1   : > { %v854_v48 = vmul.f32 %v1256_v33, %v852_v47  ;;  %vm859_vm1 = vweird.f32 %v1256_v33 }
0x10c2   : > { %vm860_vm4 = vmor %vm858_vm3, %vm859_vm1 }
0x10c3   : > { %v855_v49 = vsub.f32 1.0, %v854_v48 }
0x10c5   : > { %v856_v50 = vmul.f32 %v1256_v33, %v855_v49 }
0x10c6   : > { %594 = vrot.lane.b32.xlu2 %v592_v42, %s1345_s25 }
0x10c7   : > { %v857_v51 = vadd.f32 %v1256_v33, %v856_v50 }
0x10c9   : > { %v861_v53 = vsel %vm860_vm4, %v1256_v33, %v857_v51 }
0x10ca   : > { %v866_v56 = vsel %vm863_vm5, %v865_v54, %v861_v53 }
0x10cb   : > { %v869_v2 = vmul.f32 %v866_v56, %v1507_v23 }
0x10ce   : > { %818 = vrot.lane.b32.xlu2 %v816_v44, %s1345_s25 }
0x1110   : > { %v872_v55 = vpop.permute.xlu2 %871 }
0x1111   : > { %v874_v57 = vmul.f32 %v872_v55, %v866_v56 }
0x1113   : > { %876 = vrot.lane.b32.xlu0 %v874_v57, %s1345_s25 }
0x1118   : > { %v370_v61 = vpop.permute.xlu2 %369 }
0x1119   : > { %374 = vst.msk [vmem:[%s372_s28] sm:$0x1] %vm373_vm6, %v370_v61 }
0x111b   : > { %445 = vrot.lane.b32.xlu0 %v443_v62, %s1345_s25 }
0x1120   : > { %v595_v9 = vpop.permute.xlu2 %594 }
0x1123   : > { %668 = vrot.lane.b32.xlu0 %v666_v1, %s1345_s25 }
0x1128   : > { %v819_v10 = vpop.permute.xlu2 %818 }
0x1185   : > { %v877_v3 = vpop.permute.xlu0 %876 }
0x1186   : > { %v879_v4 = vadd.f32 %v877_v3, %v869_v2 }
0x1188   : > { %1257 = vtanh.f32 %v879_v4  ;;  %905 = vrot.lane.b32.xlu2 %v879_v4, %s1346_s29 }
0x118d   : > { %v446_v5 = vpop.permute.xlu0 %445 }
0x118e   : > { %v1258_v63 = vpop.eup %1257  ;;  %1099 = vst.msk [vmem:[%s990_s30 + $0x1] sm:$0x1] %vm373_vm6, %v446_v5 }
0x118f   : > { %882 = vrot.lane.b32.xlu1 %v1258_v63, %s1344_s24  ;;  %s996_s24 = smul.u32 3, %s1331_s12 }
0x1191   : > { %s997_s3 = scalar_lea.vmem %s1531_s27, %s996_s24 }
0x1195   : > { %v669_v16 = vpop.permute.xlu0 %668 }
0x1197   : > { %520 = vrot.lane.b32.xlu1 %v518_v6, %s1345_s25 }
0x119f   : > { %743 = vrot.lane.b32.xlu1 %v741_v8, %s1345_s25 }
0x11e2   : > { %v906_v11 = vpop.permute.xlu2 %905 }
0x11e3   : > { %908 = vst.msk [vmem:[#allocation3] sm:$0x3] %vm276_vm0, %v906_v11 }
0x1201   : > { %v883_v29 = vpop.permute.xlu1 %882 }
0x1202   : > { %v885_v12 = vmul.f32 %v883_v29, %v866_v56 }
0x1204   : > { %v886_v13 = vpack.c.bf16 %v885_v12, %v885_v12  ;;  %899 = vrot.lane.b32.xlu1 %v885_v12, %s1345_s25 }
0x1206   : > { %v888_v14 = vrot.slane %v886_v13, 3 }
0x1208   : > { %v891_v59 = vsel %vm364_vm2, %v886_v13, %v888_v14 }
0x1209   : > { %v521_v15 = vpop.permute.xlu1 %520  ;;  %893 = vrot.lane.b32.xlu0 %v891_v59, %s1345_s25  ;;  %s1026_s25 = scalar_lea.vmem %s1531_s27, %s1025_s4 }
0x120a   : > { %1104 = vst.msk [vmem:[%s997_s3 + $0x2] sm:$0x1] %vm373_vm6, %v521_v15 }
0x120b   : > { %1109 = vst.msk [vmem:[%s1002_s5 + $0x3] sm:$0x1] %vm373_vm6, %v595_v9 }
0x120c   : > { %672 = vst.msk [vmem:[%s671_s6] sm:$0x1] %vm373_vm6, %v669_v16 }
0x1211   : > { %v744_v17 = vpop.permute.xlu1 %743 }
0x1212   : > { %1117 = vst.msk [vmem:[%s1012_s9 + $0x5] sm:$0x1] %vm373_vm6, %v744_v17 }
0x1213   : > { %1122 = vst.msk [vmem:[%s1019_s17 + $0x6] sm:$0x1] %vm373_vm6, %v819_v10 }
0x1276   : > { %v900_v18 = vpop.permute.xlu1 %899 }
0x1277   : > { %903 = vst.msk [vmem:[#allocation2] sm:$0x3] %vm276_vm0, %v900_v18 }
0x127b   : > { %v894_v19 = vpop.permute.xlu0 %893 }
0x127c   : > { %1127 = vst.msk [vmem:[%s1026_s25 + $0x7] sm:$0x1] %vm373_vm6, %v894_v19 }
0x127d PF: > { %s15_s14 = sadd.s32 1, %s1339_s14   ;;  %s1604_s9 = smov %s1323_s10 }
0x127e   : > { %p12_p0 = scmp.ge.s32.totalorder %s15_s14, 4   ;;  %s1605_s10 = smov %s1327_s11 }
0x127f   : > { %s1606_s11 = smov %s1411_s21  ;;  %s1607_s12 = smov %s1335_s13 }
0x1280   : > { %s1608_s13 = smov %s1610_s16  ;;  %14 = sbr.rel (!%p12_p0) target bundleno = 4 (0x4), region = 91 }
0x1285   :  { %949 = vsyncpa [#allocation5], 1 }
0x1286   :  { %951 = vsyncpa [#allocation5 + $0x1], 1 }

// kernel: lstm_model_forward.9
= control target key start
LH: loop header
LB: loop body
LE: loop exit
PB: predicated region body
PF: predicated region fallthrough
CT: control target
= control target key end

     0   :  { %s217_s0 = inlined_call_operand.vmem [shape: bf16[2,32], index: 0, kind: input, shape index: {}]   ;;  %s218_s1 = inlined_call_operand.vmem [shape: bf16[2,32], index: 1, kind: input, shape index: {}]   ;;  %s219_s2 = inlined_call_operand.vmem [shape: bf16[32,4], index: 2, kind: input, shape index: {}]   ;;  %s220_s3 = inlined_call_operand.vmem [shape: bf16[32,4], index: 3, kind: input, shape index: {}]   ;;  %s221_s4 = inlined_call_operand.vmem [shape: f32[1,4], index: 4, kind: input, shape index: {}]   ;;  %s222_s5 = inlined_call_operand.hbm [shape: f32[2,4], index: 5, kind: output, shape index: {}]  }
   0x1   :  { %v133_v0 = vld [vmem:[%s220_s3 + $0x8] sm:$0xff]  ;;  %v132_v2 = vld [vmem:[%s220_s3] sm:$0xff] }
   0x2   :  { %v131_v1 = vld [vmem:[%s219_s2 + $0x8] sm:$0xff]  ;;  %54 = vmatpush.bf16.msra.mxu0 %v133_v0  ;;  %v130_v3 = vld [vmem:[%s219_s2] sm:$0xff] }
   0x3   :  { %82 = vmatpush.bf16.msra.mxu1 %v131_v1 }
   0x4   :  { %10 = vsyncpa [#allocation3], 0  ;;  %v27_v4 = vld [vmem:[%s218_s1] sm:$0x1]  ;;  %vm44_vm0 = vcmask 261120   ;;  %s162_s2 = smov [#allocation2]  }
   0x5   :  { %v22_v5 = vld [vmem:[%s217_s0] sm:$0x1]  ;;  %s101_s6 = sshll.u32 %s162_s2, 4  ;;  %s103_s9 = sshll.u32 %s222_s5, 4  ;;  %vm94_vm1 = vcmask 25600   ;;  %s102_s6 = int_to_ptr.vmem [resolvable:$true] %s101_s6  ;;  %s104_s9 = int_to_ptr.hbm [resolvable:$true] %s103_s9 }
   0x6   :  { %55 = vmatpush.bf16.msra.mxu0 %v132_v2  ;;  %v135_v6 = vld [vmem:[%s221_s4] ss:$0 sm:$0xff] }
   0x7   :  { %83 = vmatpush.bf16.msra.mxu1 %v130_v3 }
   0x9   :  { %120 = vmatmul.msk.bf16.vlgmr.msra.gmra.mxu0 %vm44_vm0, %v27_v4 }
   0xa   :  { %129 = vmatmul.msk.bf16.vlgmr.msra.gmra.mxu1 %vm44_vm0, %v22_v5 }
  0x86   :  { %v57_v7 = vpop.f32.mrf.mxu0 }
  0x87   :  { %v85_v8 = vpop.f32.mrf.mxu1 }
  0x88   :  { %v86_v9 = vadd.f32 %v85_v8, %v57_v7 }
  0x8a   :  { %v93_v10 = vadd.f32 %v135_v6, %v86_v9 }
  0x8c   :  { %95 = vst.msk [vmem:[#allocation2] sm:$0x3] %vm94_vm1, %v93_v10 }
  0x8d   :  { %106 = dma.vmem_to_hbm [thread:$0]  %s102_s6, 32, %s104_s9, [#allocation3]  }
  0x8e   :  { %v59_v11 = vpop.f32.mrf.mxu0 }
  0x8f   :  { %v87_v12 = vpop.f32.mrf.mxu1 }
  0x90   :  { %160 = dma.done.wait [#allocation3], 32  }
  0x91   :  { %161 = vsyncadd [#allocation3], 4294967264 }
  0x92   :  { %111 = vsyncpa [#allocation3], 1 }

</bundles_post_ra>
